<compile_context>
chip_gen: v6e
topology: v6e:2x2x1
jax: 0.10.0
libtpu: 0.0.40
codegen_flags: <defaults>
</compile_context>

<pallas_src>
import jax
import jax.numpy as jnp
from jax.experimental import pallas as pl
from jax.experimental.pallas import tpu as pltpu


# ------------------------------------------------------------------ kernel --
def make_encoder_kernel(num_layers, T, B, H):
    """Fused kernel: time-major embedded input -> stacked LSTM layers.

    Ref layout (inputs, outputs, scratch):
      len_ref : (B, 1) int32      valid lengths
      x_ref   : (T, B, E) f32     time-major embedded input
      per layer l:
        wih_l : (D_in, 4H)        gate-packed, pre-transposed input weights
        whh_l : (H, 4H)           gate-packed, pre-transposed recurrent weights
        b_l   : (1, 4H)           gate-packed combined bias (b_ih + b_hh)
      y_ref   : (T, B, H)         top-layer per-timestep outputs (zero past len)
      hN_ref  : (L, B, H)         hidden state at last valid timestep, per layer
      cN_ref  : (L, B, H)         cell state at last valid timestep, per layer
      xp_ref  : (T*B, 4H) VMEM    scratch: hoisted input projection
      act_ref : (T*B, H)  VMEM    scratch: inter-layer activations
    """

    def kernel(*refs):
        len_ref = refs[0]
        x_ref = refs[1]
        layer_refs = refs[2:2 + 3 * num_layers]
        y_ref, hN_ref, cN_ref = refs[2 + 3 * num_layers:2 + 3 * num_layers + 3]
        xp_ref, act_ref = refs[2 + 3 * num_layers + 3:]

        f32 = jnp.float32
        lengths = len_ref[...]                                     # (B, 1) int32

        E_in = x_ref.shape[2]

        for l in range(num_layers):
            wih_ref = layer_refs[3 * l + 0]                        # (D_in, 4H)
            whh_ref = layer_refs[3 * l + 1]                        # (H, 4H)
            b_ref = layer_refs[3 * l + 2]                          # (1, 4H)

            if l == 0:
                x_flat = x_ref[...].reshape(T * B, E_in).astype(f32)
            else:
                x_flat = act_ref[...]                              # (T*B, H)

            # Hoisted, FUSED input projection: one (T*B, D) @ (D, 4H) matmul
            # + packed bias, landed in VMEM scratch (bounds its lifetime).
            xp_ref[...] = (jnp.dot(x_flat, wih_ref[...],
                                   preferred_element_type=f32) + b_ref[...])

            # Recurrent weights loaded once per layer (single lane-dense slab).
            W = whh_ref[...]                                       # (H, 4H)

            h = jnp.zeros((B, H), f32)
            c = jnp.zeros((B, H), f32)
            for t in range(T):                                     # static unroll
                xp_t = xp_ref[t * B:(t + 1) * B, :]                # (B, 4H)
                # ONE fused recurrent matmul per step on the serial path.
                gates = xp_t + jnp.dot(h, W, preferred_element_type=f32)
                i_g = jax.nn.sigmoid(gates[:, 0 * H:1 * H])
                f_g = jax.nn.sigmoid(gates[:, 1 * H:2 * H])
                g_g = jnp.tanh(gates[:, 2 * H:3 * H])
                o_g = jax.nn.sigmoid(gates[:, 3 * H:4 * H])
                c_new = f_g * c + i_g * g_g
                h_new = o_g * jnp.tanh(c_new)

                m = lengths > t                                    # (B, 1) bool
                c = jnp.where(m, c_new, c)
                h = jnp.where(m, h_new, h)
                y_t = jnp.where(m, h_new, jnp.zeros_like(h_new))
                if l == num_layers - 1:
                    y_ref[t] = y_t                                 # static index
                else:
                    act_ref[t * B:(t + 1) * B, :] = y_t            # next layer in

            hN_ref[l] = h
            cN_ref[l] = c
            # TODO(synk): inter-layer dropout (training-only in PyTorch) omitted — eval semantics.

    return kernel


# ----------------------------------------------------------------- wrapper --
@jax.jit
def encoder_apply(embedding, wihs, whhs, bs, input_seq, lengths):
    """input_seq: (B, T) int32; lengths: (B,) int32.

    Returns (outputs (B,T,H), (hidden (L,B,H), cell (L,B,H))).
    """
    B, T = input_seq.shape
    L = len(wihs)
    H = whhs[0].shape[0]

    embedded = jnp.take(embedding, input_seq, axis=0)              # (B, T, E)
    x_tm = jnp.transpose(embedded, (1, 0, 2)).astype(jnp.float32)  # (T, B, E)
    lengths_2d = lengths.astype(jnp.int32).reshape(B, 1)

    flat_w = []
    for l in range(L):
        flat_w += [wihs[l], whhs[l], bs[l]]

    vmem = pl.BlockSpec(memory_space=pltpu.MemorySpace.VMEM)
    y_tm, hidden, cell = pl.pallas_call(
        make_encoder_kernel(L, T, B, H),
        out_shape=(
            jax.ShapeDtypeStruct((T, B, H), jnp.float32),
            jax.ShapeDtypeStruct((L, B, H), jnp.float32),
            jax.ShapeDtypeStruct((L, B, H), jnp.float32),
        ),
        in_specs=[vmem] * (2 + len(flat_w)),
        out_specs=(vmem, vmem, vmem),
        scratch_shapes=[
            pltpu.VMEM((T * B, 4 * H), jnp.float32),   # xp_ref
            pltpu.VMEM((T * B, H), jnp.float32),       # act_ref
        ],
    )(lengths_2d, x_tm, *flat_w)

    outputs = jnp.transpose(y_tm, (1, 0, 2))                       # (B, T, H)
    return outputs, (hidden, cell)


# ------------------------------------------------------------------ params --
class EncoderParams:
    """Deterministic init mirroring nn.Embedding + nn.LSTM shapes.

    Weights are gate-packed / pre-transposed once here so the forward pass
    does not emit transposes in front of the pallas_call:
      wih : (D_in, 4H)  = w_ih.T, gate column order [i | f | g | o]
      whh : (H, 4H)     = w_hh.T
      b   : (1, 4H)     = b_ih + b_hh
    """

    def __init__(self, key, input_vocab_size, embed_size, hidden_size, num_layers):
        self.embed_size = embed_size
        self.hidden_size = hidden_size
        self.num_layers = num_layers
        H = hidden_size
        k_emb, k_rnn = jax.random.split(key)
        # nn.Embedding default: N(0, 1)
        self.embedding = jax.random.normal(
            k_emb, (input_vocab_size, embed_size), dtype=jnp.float32)
        # nn.LSTM default: U(-1/sqrt(H), 1/sqrt(H))
        bound = 1.0 / (hidden_size ** 0.5)
        self.layers = []          # raw PyTorch-layout params (for the reference)
        wihs, whhs, bs = [], [], []
        for l in range(num_layers):
            in_sz = embed_size if l == 0 else hidden_size
            k_rnn, k1, k2, k3, k4 = jax.random.split(k_rnn, 5)
            w_ih = jax.random.uniform(k1, (4 * H, in_sz),
                                      minval=-bound, maxval=bound, dtype=jnp.float32)
            w_hh = jax.random.uniform(k2, (4 * H, H),
                                      minval=-bound, maxval=bound, dtype=jnp.float32)
            b_ih = jax.random.uniform(k3, (4 * H,),
                                      minval=-bound, maxval=bound, dtype=jnp.float32)
            b_hh = jax.random.uniform(k4, (4 * H,),
                                      minval=-bound, maxval=bound, dtype=jnp.float32)
            self.layers.append((w_ih, w_hh, b_ih, b_hh))

            # Fused gate packing for the kernel (done once).
            wihs.append(jnp.asarray(w_ih.T))                       # (in_sz, 4H)
            whhs.append(jnp.asarray(w_hh.T))                       # (H, 4H)
            bs.append((b_ih + b_hh).reshape(1, 4 * H))             # (1, 4H)
        self.wihs = tuple(wihs)
        self.whhs = tuple(whhs)
        self.bs = tuple(bs)


def encoder_forward(params, input_seq, lengths):
    return encoder_apply(params.embedding, params.wihs, params.whhs,
                         params.bs, input_seq, lengths)


# -------------------------------------------------------------- pure-JAX ref --
def encoder_reference(params, input_seq, lengths):
    B, T = input_seq.shape
    H = params.hidden_size
    x = params.embedding[input_seq].astype(jnp.float32)            # (B, T, E)
    lengths = lengths.astype(jnp.int32)
    h_all, c_all = [], []
    for (w_ih, w_hh, b_ih, b_hh) in params.layers:
        h = jnp.zeros((B, H), jnp.float32)
        c = jnp.zeros((B, H), jnp.float32)
        ys = []
        for t in range(T):
            x_t = x[:, t, :]
            gates = x_t @ w_ih.T + h @ w_hh.T + b_ih + b_hh
            i_g = jax.nn.sigmoid(gates[:, 0 * H:1 * H])
            f_g = jax.nn.sigmoid(gates[:, 1 * H:2 * H])
            g_g = jnp.tanh(gates[:, 2 * H:3 * H])
            o_g = jax.nn.sigmoid(gates[:, 3 * H:4 * H])
            c_new = f_g * c + i_g * g_g
            h_new = o_g * jnp.tanh(c_new)
            mask = (lengths > t)[:, None]
            h = jnp.where(mask, h_new, h)
            c = jnp.where(mask, c_new, c)
            ys.append(jnp.where(mask, h_new, 0.0))
        x = jnp.stack(ys, axis=1)
        h_all.append(h)
        c_all.append(c)
    return x, (jnp.stack(h_all, 0), jnp.stack(c_all, 0))


# -------------------------------------------------------------------- main --
if __name__ == "__main__":
    input_vocab_size = 32
    embed_size = 64
    hidden_size = 64
    num_encoder_layers = 3
    B, T = 8, 8

    key = jax.random.PRNGKey(0)
    k_params, k_tokens = jax.random.split(key)
    params = EncoderParams(k_params, input_vocab_size, embed_size,
                           hidden_size, num_encoder_layers)

    input_seq = jax.random.randint(k_tokens, (B, T), 0, input_vocab_size,
                                   dtype=jnp.int32)
    lengths = jnp.array([8, 5, 7, 3, 8, 2, 6, 4], dtype=jnp.int32)

    outputs, (hidden, cell) = encoder_forward(params, input_seq, lengths)
    jax.block_until_ready((outputs, hidden, cell))

    ref_out, (ref_h, ref_c) = encoder_reference(params, input_seq, lengths)
    assert outputs.shape == (B, T, hidden_size)
    assert hidden.shape == (num_encoder_layers, B, hidden_size)
    assert cell.shape == (num_encoder_layers, B, hidden_size)
    assert jnp.allclose(outputs, ref_out, atol=1e-5)
    assert jnp.allclose(hidden, ref_h, atol=1e-5)
    assert jnp.allclose(cell, ref_c, atol=1e-5)

    print("KERNEL_OK")
</pallas_src>

<mosaic_0001>
module attributes {stable_mosaic.version = 11 : i64} {
  func.func @kernel(%arg0: memref<8x1xi32, #tpu.memory_space<vmem>>, %arg1: memref<8x8x64xf32, #tpu.memory_space<vmem>>, %arg2: memref<64x256xf32, #tpu.memory_space<vmem>>, %arg3: memref<64x256xf32, #tpu.memory_space<vmem>>, %arg4: memref<1x256xf32, #tpu.memory_space<vmem>>, %arg5: memref<64x256xf32, #tpu.memory_space<vmem>>, %arg6: memref<64x256xf32, #tpu.memory_space<vmem>>, %arg7: memref<1x256xf32, #tpu.memory_space<vmem>>, %arg8: memref<64x256xf32, #tpu.memory_space<vmem>>, %arg9: memref<64x256xf32, #tpu.memory_space<vmem>>, %arg10: memref<1x256xf32, #tpu.memory_space<vmem>>, %arg11: memref<8x8x64xf32, #tpu.memory_space<vmem>>, %arg12: memref<3x8x64xf32, #tpu.memory_space<vmem>>, %arg13: memref<3x8x64xf32, #tpu.memory_space<vmem>>, %arg14: memref<64x256xf32, #tpu.memory_space<vmem>>, %arg15: memref<64x64xf32, #tpu.memory_space<vmem>>) attributes {dimension_semantics = [], scalar_prefetch = 0 : i64, scratch_operands = 2 : i64, tpu.core_type = #tpu.core_type<tc>} {
    %c0 = arith.constant 0 : index
    %c0_0 = arith.constant 0 : index
    %0 = vector.load %arg0[%c0, %c0_0] : memref<8x1xi32, #tpu.memory_space<vmem>>, vector<8x1xi32>
    %c0_1 = arith.constant 0 : index
    %c0_2 = arith.constant 0 : index
    %c0_3 = arith.constant 0 : index
    %1 = vector.load %arg1[%c0_1, %c0_2, %c0_3] : memref<8x8x64xf32, #tpu.memory_space<vmem>>, vector<8x8x64xf32>
    %2 = vector.shape_cast %1 : vector<8x8x64xf32> to vector<64x64xf32>
    %c0_4 = arith.constant 0 : index
    %c0_5 = arith.constant 0 : index
    %3 = vector.load %arg2[%c0_4, %c0_5] : memref<64x256xf32, #tpu.memory_space<vmem>>, vector<64x256xf32>
    %cst = arith.constant dense<0.000000e+00> : vector<64x256xf32>
    %4 = tpu.matmul %2, %3, %cst {dimension_numbers = #tpu.dot_dimension_numbers<[1], [0], [0], [1], [0, 0, 1, 1], [], []>} : vector<64x64xf32>, vector<64x256xf32>, vector<64x256xf32> -> vector<64x256xf32>
    %c0_6 = arith.constant 0 : index
    %c0_7 = arith.constant 0 : index
    %5 = vector.load %arg4[%c0_6, %c0_7] : memref<1x256xf32, #tpu.memory_space<vmem>>, vector<1x256xf32>
    %6 = vector.broadcast %5 : vector<1x256xf32> to vector<64x256xf32>
    %7 = arith.addf %4, %6 : vector<64x256xf32>
    %c0_8 = arith.constant 0 : index
    %c0_9 = arith.constant 0 : index
    %8 = vector.load %arg14[%c0_8, %c0_9] : memref<64x256xf32, #tpu.memory_space<vmem>>, vector<64x256xf32>
    tpu.vector_store %arg14[%c0_8, %c0_9], %7 {strides = array<i32>} : memref<64x256xf32, #tpu.memory_space<vmem>>, vector<64x256xf32>,
    %c0_10 = arith.constant 0 : index
    %c0_11 = arith.constant 0 : index
    %9 = vector.load %arg3[%c0_10, %c0_11] : memref<64x256xf32, #tpu.memory_space<vmem>>, vector<64x256xf32>
    %cst_12 = arith.constant 0.000000e+00 : f32
    %10 = vector.broadcast %cst_12 : f32 to vector<8x64xf32>
    %cst_13 = arith.constant 0.000000e+00 : f32
    %11 = vector.broadcast %cst_13 : f32 to vector<8x64xf32>
    %c0_14 = arith.constant 0 : index
    %c0_15 = arith.constant 0 : index
    %12 = vector.load %arg14[%c0_14, %c0_15] : memref<64x256xf32, #tpu.memory_space<vmem>>, vector<8x256xf32>
    %cst_16 = arith.constant dense<0.000000e+00> : vector<8x256xf32>
    %13 = tpu.matmul %10, %9, %cst_16 {dimension_numbers = #tpu.dot_dimension_numbers<[1], [0], [0], [1], [0, 0, 1, 1], [], []>} : vector<8x64xf32>, vector<64x256xf32>, vector<8x256xf32> -> vector<8x256xf32>
    %14 = arith.addf %12, %13 : vector<8x256xf32>
    %15 = vector.extract_strided_slice %14 {offsets = [0, 0], sizes = [8, 64], strides = [1, 1]} : vector<8x256xf32> to vector<8x64xf32>
    %16 = arith.negf %15 : vector<8x64xf32>
    %17 = math.exp %16 : vector<8x64xf32>
    %cst_17 = arith.constant 1.000000e+00 : f32
    %18 = vector.broadcast %cst_17 : f32 to vector<8x64xf32>
    %19 = arith.addf %18, %17 : vector<8x64xf32>
    %20 = arith.divf %18, %19 : vector<8x64xf32>
    %21 = vector.extract_strided_slice %14 {offsets = [0, 64], sizes = [8, 64], strides = [1, 1]} : vector<8x256xf32> to vector<8x64xf32>
    %22 = arith.negf %21 : vector<8x64xf32>
    %23 = math.exp %22 : vector<8x64xf32>
    %cst_18 = arith.constant 1.000000e+00 : f32
    %24 = vector.broadcast %cst_18 : f32 to vector<8x64xf32>
    %25 = arith.addf %24, %23 : vector<8x64xf32>
    %26 = arith.divf %24, %25 : vector<8x64xf32>
    %27 = vector.extract_strided_slice %14 {offsets = [0, 128], sizes = [8, 64], strides = [1, 1]} : vector<8x256xf32> to vector<8x64xf32>
    %28 = math.tanh %27 : vector<8x64xf32>
    %29 = vector.extract_strided_slice %14 {offsets = [0, 192], sizes = [8, 64], strides = [1, 1]} : vector<8x256xf32> to vector<8x64xf32>
    %30 = arith.negf %29 : vector<8x64xf32>
    %31 = math.exp %30 : vector<8x64xf32>
    %cst_19 = arith.constant 1.000000e+00 : f32
    %32 = vector.broadcast %cst_19 : f32 to vector<8x64xf32>
    %33 = arith.addf %32, %31 : vector<8x64xf32>
    %34 = arith.divf %32, %33 : vector<8x64xf32>
    %35 = arith.mulf %26, %11 : vector<8x64xf32>
    %36 = arith.mulf %20, %28 : vector<8x64xf32>
    %37 = arith.addf %35, %36 : vector<8x64xf32>
    %38 = math.tanh %37 : vector<8x64xf32>
    %39 = arith.mulf %34, %38 : vector<8x64xf32>
    %c0_i32 = arith.constant 0 : i32
    %40 = vector.broadcast %c0_i32 : i32 to vector<8x1xi32>
    %41 = arith.cmpi sgt, %0, %40 : vector<8x1xi32>
    %42 = vector.shape_cast %41 : vector<8x1xi1> to vector<8x1xi1>
    %43 = vector.broadcast %42 : vector<8x1xi1> to vector<8x64xi1>
    %44 = arith.select %43, %37, %11 : vector<8x64xi1>, vector<8x64xf32>
    %45 = vector.shape_cast %41 : vector<8x1xi1> to vector<8x1xi1>
    %46 = vector.broadcast %45 : vector<8x1xi1> to vector<8x64xi1>
    %47 = arith.select %46, %39, %10 : vector<8x64xi1>, vector<8x64xf32>
    %cst_20 = arith.constant 0.000000e+00 : f32
    %48 = vector.broadcast %cst_20 : f32 to vector<8x64xf32>
    %49 = vector.shape_cast %41 : vector<8x1xi1> to vector<8x1xi1>
    %50 = vector.broadcast %49 : vector<8x1xi1> to vector<8x64xi1>
    %51 = arith.select %50, %39, %48 : vector<8x64xi1>, vector<8x64xf32>
    %c0_21 = arith.constant 0 : index
    %c0_22 = arith.constant 0 : index
    %52 = vector.load %arg15[%c0_21, %c0_22] : memref<64x64xf32, #tpu.memory_space<vmem>>, vector<8x64xf32>
    tpu.vector_store %arg15[%c0_21, %c0_22], %51 {strides = array<i32>} : memref<64x64xf32, #tpu.memory_space<vmem>>, vector<8x64xf32>,
    %c8 = arith.constant 8 : index
    %c0_23 = arith.constant 0 : index
    %53 = vector.load %arg14[%c8, %c0_23] : memref<64x256xf32, #tpu.memory_space<vmem>>, vector<8x256xf32>
    %cst_24 = arith.constant dense<0.000000e+00> : vector<8x256xf32>
    %54 = tpu.matmul %47, %9, %cst_24 {dimension_numbers = #tpu.dot_dimension_numbers<[1], [0], [0], [1], [0, 0, 1, 1], [], []>} : vector<8x64xf32>, vector<64x256xf32>, vector<8x256xf32> -> vector<8x256xf32>
    %55 = arith.addf %53, %54 : vector<8x256xf32>
    %56 = vector.extract_strided_slice %55 {offsets = [0, 0], sizes = [8, 64], strides = [1, 1]} : vector<8x256xf32> to vector<8x64xf32>
    %57 = arith.negf %56 : vector<8x64xf32>
    %58 = math.exp %57 : vector<8x64xf32>
    %cst_25 = arith.constant 1.000000e+00 : f32
    %59 = vector.broadcast %cst_25 : f32 to vector<8x64xf32>
    %60 = arith.addf %59, %58 : vector<8x64xf32>
    %61 = arith.divf %59, %60 : vector<8x64xf32>
    %62 = vector.extract_strided_slice %55 {offsets = [0, 64], sizes = [8, 64], strides = [1, 1]} : vector<8x256xf32> to vector<8x64xf32>
    %63 = arith.negf %62 : vector<8x64xf32>
    %64 = math.exp %63 : vector<8x64xf32>
    %cst_26 = arith.constant 1.000000e+00 : f32
    %65 = vector.broadcast %cst_26 : f32 to vector<8x64xf32>
    %66 = arith.addf %65, %64 : vector<8x64xf32>
    %67 = arith.divf %65, %66 : vector<8x64xf32>
    %68 = vector.extract_strided_slice %55 {offsets = [0, 128], sizes = [8, 64], strides = [1, 1]} : vector<8x256xf32> to vector<8x64xf32>
    %69 = math.tanh %68 : vector<8x64xf32>
    %70 = vector.extract_strided_slice %55 {offsets = [0, 192], sizes = [8, 64], strides = [1, 1]} : vector<8x256xf32> to vector<8x64xf32>
    %71 = arith.negf %70 : vector<8x64xf32>
    %72 = math.exp %71 : vector<8x64xf32>
    %cst_27 = arith.constant 1.000000e+00 : f32
    %73 = vector.broadcast %cst_27 : f32 to vector<8x64xf32>
    %74 = arith.addf %73, %72 : vector<8x64xf32>
    %75 = arith.divf %73, %74 : vector<8x64xf32>
    %76 = arith.mulf %67, %44 : vector<8x64xf32>
    %77 = arith.mulf %61, %69 : vector<8x64xf32>
    %78 = arith.addf %76, %77 : vector<8x64xf32>
    %79 = math.tanh %78 : vector<8x64xf32>
    %80 = arith.mulf %75, %79 : vector<8x64xf32>
    %c1_i32 = arith.constant 1 : i32
    %81 = vector.broadcast %c1_i32 : i32 to vector<8x1xi32>
    %82 = arith.cmpi sgt, %0, %81 : vector<8x1xi32>
    %83 = vector.shape_cast %82 : vector<8x1xi1> to vector<8x1xi1>
    %84 = vector.broadcast %83 : vector<8x1xi1> to vector<8x64xi1>
    %85 = arith.select %84, %78, %44 : vector<8x64xi1>, vector<8x64xf32>
    %86 = vector.shape_cast %82 : vector<8x1xi1> to vector<8x1xi1>
    %87 = vector.broadcast %86 : vector<8x1xi1> to vector<8x64xi1>
    %88 = arith.select %87, %80, %47 : vector<8x64xi1>, vector<8x64xf32>
    %cst_28 = arith.constant 0.000000e+00 : f32
    %89 = vector.broadcast %cst_28 : f32 to vector<8x64xf32>
    %90 = vector.shape_cast %82 : vector<8x1xi1> to vector<8x1xi1>
    %91 = vector.broadcast %90 : vector<8x1xi1> to vector<8x64xi1>
    %92 = arith.select %91, %80, %89 : vector<8x64xi1>, vector<8x64xf32>
    %c8_29 = arith.constant 8 : index
    %c0_30 = arith.constant 0 : index
    %93 = vector.load %arg15[%c8_29, %c0_30] : memref<64x64xf32, #tpu.memory_space<vmem>>, vector<8x64xf32>
    tpu.vector_store %arg15[%c8_29, %c0_30], %92 {strides = array<i32>} : memref<64x64xf32, #tpu.memory_space<vmem>>, vector<8x64xf32>,
    %c16 = arith.constant 16 : index
    %c0_31 = arith.constant 0 : index
    %94 = vector.load %arg14[%c16, %c0_31] : memref<64x256xf32, #tpu.memory_space<vmem>>, vector<8x256xf32>
    %cst_32 = arith.constant dense<0.000000e+00> : vector<8x256xf32>
    %95 = tpu.matmul %88, %9, %cst_32 {dimension_numbers = #tpu.dot_dimension_numbers<[1], [0], [0], [1], [0, 0, 1, 1], [], []>} : vector<8x64xf32>, vector<64x256xf32>, vector<8x256xf32> -> vector<8x256xf32>
    %96 = arith.addf %94, %95 : vector<8x256xf32>
    %97 = vector.extract_strided_slice %96 {offsets = [0, 0], sizes = [8, 64], strides = [1, 1]} : vector<8x256xf32> to vector<8x64xf32>
    %98 = arith.negf %97 : vector<8x64xf32>
    %99 = math.exp %98 : vector<8x64xf32>
    %cst_33 = arith.constant 1.000000e+00 : f32
    %100 = vector.broadcast %cst_33 : f32 to vector<8x64xf32>
    %101 = arith.addf %100, %99 : vector<8x64xf32>
    %102 = arith.divf %100, %101 : vector<8x64xf32>
    %103 = vector.extract_strided_slice %96 {offsets = [0, 64], sizes = [8, 64], strides = [1, 1]} : vector<8x256xf32> to vector<8x64xf32>
    %104 = arith.negf %103 : vector<8x64xf32>
    %105 = math.exp %104 : vector<8x64xf32>
    %cst_34 = arith.constant 1.000000e+00 : f32
    %106 = vector.broadcast %cst_34 : f32 to vector<8x64xf32>
    %107 = arith.addf %106, %105 : vector<8x64xf32>
    %108 = arith.divf %106, %107 : vector<8x64xf32>
    %109 = vector.extract_strided_slice %96 {offsets = [0, 128], sizes = [8, 64], strides = [1, 1]} : vector<8x256xf32> to vector<8x64xf32>
    %110 = math.tanh %109 : vector<8x64xf32>
    %111 = vector.extract_strided_slice %96 {offsets = [0, 192], sizes = [8, 64], strides = [1, 1]} : vector<8x256xf32> to vector<8x64xf32>
    %112 = arith.negf %111 : vector<8x64xf32>
    %113 = math.exp %112 : vector<8x64xf32>
    %cst_35 = arith.constant 1.000000e+00 : f32
    %114 = vector.broadcast %cst_35 : f32 to vector<8x64xf32>
    %115 = arith.addf %114, %113 : vector<8x64xf32>
    %116 = arith.divf %114, %115 : vector<8x64xf32>
    %117 = arith.mulf %108, %85 : vector<8x64xf32>
    %118 = arith.mulf %102, %110 : vector<8x64xf32>
    %119 = arith.addf %117, %118 : vector<8x64xf32>
    %120 = math.tanh %119 : vector<8x64xf32>
    %121 = arith.mulf %116, %120 : vector<8x64xf32>
    %c2_i32 = arith.constant 2 : i32
    %122 = vector.broadcast %c2_i32 : i32 to vector<8x1xi32>
    %123 = arith.cmpi sgt, %0, %122 : vector<8x1xi32>
    %124 = vector.shape_cast %123 : vector<8x1xi1> to vector<8x1xi1>
    %125 = vector.broadcast %124 : vector<8x1xi1> to vector<8x64xi1>
    %126 = arith.select %125, %119, %85 : vector<8x64xi1>, vector<8x64xf32>
    %127 = vector.shape_cast %123 : vector<8x1xi1> to vector<8x1xi1>
    %128 = vector.broadcast %127 : vector<8x1xi1> to vector<8x64xi1>
    %129 = arith.select %128, %121, %88 : vector<8x64xi1>, vector<8x64xf32>
    %cst_36 = arith.constant 0.000000e+00 : f32
    %130 = vector.broadcast %cst_36 : f32 to vector<8x64xf32>
    %131 = vector.shape_cast %123 : vector<8x1xi1> to vector<8x1xi1>
    %132 = vector.broadcast %131 : vector<8x1xi1> to vector<8x64xi1>
    %133 = arith.select %132, %121, %130 : vector<8x64xi1>, vector<8x64xf32>
    %c16_37 = arith.constant 16 : index
    %c0_38 = arith.constant 0 : index
    %134 = vector.load %arg15[%c16_37, %c0_38] : memref<64x64xf32, #tpu.memory_space<vmem>>, vector<8x64xf32>
    tpu.vector_store %arg15[%c16_37, %c0_38], %133 {strides = array<i32>} : memref<64x64xf32, #tpu.memory_space<vmem>>, vector<8x64xf32>,
    %c24 = arith.constant 24 : index
    %c0_39 = arith.constant 0 : index
    %135 = vector.load %arg14[%c24, %c0_39] : memref<64x256xf32, #tpu.memory_space<vmem>>, vector<8x256xf32>
    %cst_40 = arith.constant dense<0.000000e+00> : vector<8x256xf32>
    %136 = tpu.matmul %129, %9, %cst_40 {dimension_numbers = #tpu.dot_dimension_numbers<[1], [0], [0], [1], [0, 0, 1, 1], [], []>} : vector<8x64xf32>, vector<64x256xf32>, vector<8x256xf32> -> vector<8x256xf32>
    %137 = arith.addf %135, %136 : vector<8x256xf32>
    %138 = vector.extract_strided_slice %137 {offsets = [0, 0], sizes = [8, 64], strides = [1, 1]} : vector<8x256xf32> to vector<8x64xf32>
    %139 = arith.negf %138 : vector<8x64xf32>
    %140 = math.exp %139 : vector<8x64xf32>
    %cst_41 = arith.constant 1.000000e+00 : f32
    %141 = vector.broadcast %cst_41 : f32 to vector<8x64xf32>
    %142 = arith.addf %141, %140 : vector<8x64xf32>
    %143 = arith.divf %141, %142 : vector<8x64xf32>
    %144 = vector.extract_strided_slice %137 {offsets = [0, 64], sizes = [8, 64], strides = [1, 1]} : vector<8x256xf32> to vector<8x64xf32>
    %145 = arith.negf %144 : vector<8x64xf32>
    %146 = math.exp %145 : vector<8x64xf32>
    %cst_42 = arith.constant 1.000000e+00 : f32
    %147 = vector.broadcast %cst_42 : f32 to vector<8x64xf32>
    %148 = arith.addf %147, %146 : vector<8x64xf32>
    %149 = arith.divf %147, %148 : vector<8x64xf32>
    %150 = vector.extract_strided_slice %137 {offsets = [0, 128], sizes = [8, 64], strides = [1, 1]} : vector<8x256xf32> to vector<8x64xf32>
    %151 = math.tanh %150 : vector<8x64xf32>
    %152 = vector.extract_strided_slice %137 {offsets = [0, 192], sizes = [8, 64], strides = [1, 1]} : vector<8x256xf32> to vector<8x64xf32>
    %153 = arith.negf %152 : vector<8x64xf32>
    %154 = math.exp %153 : vector<8x64xf32>
    %cst_43 = arith.constant 1.000000e+00 : f32
    %155 = vector.broadcast %cst_43 : f32 to vector<8x64xf32>
    %156 = arith.addf %155, %154 : vector<8x64xf32>
    %157 = arith.divf %155, %156 : vector<8x64xf32>
    %158 = arith.mulf %149, %126 : vector<8x64xf32>
    %159 = arith.mulf %143, %151 : vector<8x64xf32>
    %160 = arith.addf %158, %159 : vector<8x64xf32>
    %161 = math.tanh %160 : vector<8x64xf32>
    %162 = arith.mulf %157, %161 : vector<8x64xf32>
    %c3_i32 = arith.constant 3 : i32
    %163 = vector.broadcast %c3_i32 : i32 to vector<8x1xi32>
    %164 = arith.cmpi sgt, %0, %163 : vector<8x1xi32>
    %165 = vector.shape_cast %164 : vector<8x1xi1> to vector<8x1xi1>
    %166 = vector.broadcast %165 : vector<8x1xi1> to vector<8x64xi1>
    %167 = arith.select %166, %160, %126 : vector<8x64xi1>, vector<8x64xf32>
    %168 = vector.shape_cast %164 : vector<8x1xi1> to vector<8x1xi1>
    %169 = vector.broadcast %168 : vector<8x1xi1> to vector<8x64xi1>
    %170 = arith.select %169, %162, %129 : vector<8x64xi1>, vector<8x64xf32>
    %cst_44 = arith.constant 0.000000e+00 : f32
    %171 = vector.broadcast %cst_44 : f32 to vector<8x64xf32>
    %172 = vector.shape_cast %164 : vector<8x1xi1> to vector<8x1xi1>
    %173 = vector.broadcast %172 : vector<8x1xi1> to vector<8x64xi1>
    %174 = arith.select %173, %162, %171 : vector<8x64xi1>, vector<8x64xf32>
    %c24_45 = arith.constant 24 : index
    %c0_46 = arith.constant 0 : index
    %175 = vector.load %arg15[%c24_45, %c0_46] : memref<64x64xf32, #tpu.memory_space<vmem>>, vector<8x64xf32>
    tpu.vector_store %arg15[%c24_45, %c0_46], %174 {strides = array<i32>} : memref<64x64xf32, #tpu.memory_space<vmem>>, vector<8x64xf32>,
    %c32 = arith.constant 32 : index
    %c0_47 = arith.constant 0 : index
    %176 = vector.load %arg14[%c32, %c0_47] : memref<64x256xf32, #tpu.memory_space<vmem>>, vector<8x256xf32>
    %cst_48 = arith.constant dense<0.000000e+00> : vector<8x256xf32>
    %177 = tpu.matmul %170, %9, %cst_48 {dimension_numbers = #tpu.dot_dimension_numbers<[1], [0], [0], [1], [0, 0, 1, 1], [], []>} : vector<8x64xf32>, vector<64x256xf32>, vector<8x256xf32> -> vector<8x256xf32>
    %178 = arith.addf %176, %177 : vector<8x256xf32>
    %179 = vector.extract_strided_slice %178 {offsets = [0, 0], sizes = [8, 64], strides = [1, 1]} : vector<8x256xf32> to vector<8x64xf32>
    %180 = arith.negf %179 : vector<8x64xf32>
    %181 = math.exp %180 : vector<8x64xf32>
    %cst_49 = arith.constant 1.000000e+00 : f32
    %182 = vector.broadcast %cst_49 : f32 to vector<8x64xf32>
    %183 = arith.addf %182, %181 : vector<8x64xf32>
    %184 = arith.divf %182, %183 : vector<8x64xf32>
    %185 = vector.extract_strided_slice %178 {offsets = [0, 64], sizes = [8, 64], strides = [1, 1]} : vector<8x256xf32> to vector<8x64xf32>
    %186 = arith.negf %185 : vector<8x64xf32>
    %187 = math.exp %186 : vector<8x64xf32>
    %cst_50 = arith.constant 1.000000e+00 : f32
    %188 = vector.broadcast %cst_50 : f32 to vector<8x64xf32>
    %189 = arith.addf %188, %187 : vector<8x64xf32>
    %190 = arith.divf %188, %189 : vector<8x64xf32>
    %191 = vector.extract_strided_slice %178 {offsets = [0, 128], sizes = [8, 64], strides = [1, 1]} : vector<8x256xf32> to vector<8x64xf32>
    %192 = math.tanh %191 : vector<8x64xf32>
    %193 = vector.extract_strided_slice %178 {offsets = [0, 192], sizes = [8, 64], strides = [1, 1]} : vector<8x256xf32> to vector<8x64xf32>
    %194 = arith.negf %193 : vector<8x64xf32>
    %195 = math.exp %194 : vector<8x64xf32>
    %cst_51 = arith.constant 1.000000e+00 : f32
    %196 = vector.broadcast %cst_51 : f32 to vector<8x64xf32>
    %197 = arith.addf %196, %195 : vector<8x64xf32>
    %198 = arith.divf %196, %197 : vector<8x64xf32>
    %199 = arith.mulf %190, %167 : vector<8x64xf32>
    %200 = arith.mulf %184, %192 : vector<8x64xf32>
    %201 = arith.addf %199, %200 : vector<8x64xf32>
    %202 = math.tanh %201 : vector<8x64xf32>
    %203 = arith.mulf %198, %202 : vector<8x64xf32>
    %c4_i32 = arith.constant 4 : i32
    %204 = vector.broadcast %c4_i32 : i32 to vector<8x1xi32>
    %205 = arith.cmpi sgt, %0, %204 : vector<8x1xi32>
    %206 = vector.shape_cast %205 : vector<8x1xi1> to vector<8x1xi1>
    %207 = vector.broadcast %206 : vector<8x1xi1> to vector<8x64xi1>
    %208 = arith.select %207, %201, %167 : vector<8x64xi1>, vector<8x64xf32>
    %209 = vector.shape_cast %205 : vector<8x1xi1> to vector<8x1xi1>
    %210 = vector.broadcast %209 : vector<8x1xi1> to vector<8x64xi1>
    %211 = arith.select %210, %203, %170 : vector<8x64xi1>, vector<8x64xf32>
    %cst_52 = arith.constant 0.000000e+00 : f32
    %212 = vector.broadcast %cst_52 : f32 to vector<8x64xf32>
    %213 = vector.shape_cast %205 : vector<8x1xi1> to vector<8x1xi1>
    %214 = vector.broadcast %213 : vector<8x1xi1> to vector<8x64xi1>
    %215 = arith.select %214, %203, %212 : vector<8x64xi1>, vector<8x64xf32>
    %c32_53 = arith.constant 32 : index
    %c0_54 = arith.constant 0 : index
    %216 = vector.load %arg15[%c32_53, %c0_54] : memref<64x64xf32, #tpu.memory_space<vmem>>, vector<8x64xf32>
    tpu.vector_store %arg15[%c32_53, %c0_54], %215 {strides = array<i32>} : memref<64x64xf32, #tpu.memory_space<vmem>>, vector<8x64xf32>,
    %c40 = arith.constant 40 : index
    %c0_55 = arith.constant 0 : index
    %217 = vector.load %arg14[%c40, %c0_55] : memref<64x256xf32, #tpu.memory_space<vmem>>, vector<8x256xf32>
    %cst_56 = arith.constant dense<0.000000e+00> : vector<8x256xf32>
    %218 = tpu.matmul %211, %9, %cst_56 {dimension_numbers = #tpu.dot_dimension_numbers<[1], [0], [0], [1], [0, 0, 1, 1], [], []>} : vector<8x64xf32>, vector<64x256xf32>, vector<8x256xf32> -> vector<8x256xf32>
    %219 = arith.addf %217, %218 : vector<8x256xf32>
    %220 = vector.extract_strided_slice %219 {offsets = [0, 0], sizes = [8, 64], strides = [1, 1]} : vector<8x256xf32> to vector<8x64xf32>
    %221 = arith.negf %220 : vector<8x64xf32>
    %222 = math.exp %221 : vector<8x64xf32>
    %cst_57 = arith.constant 1.000000e+00 : f32
    %223 = vector.broadcast %cst_57 : f32 to vector<8x64xf32>
    %224 = arith.addf %223, %222 : vector<8x64xf32>
    %225 = arith.divf %223, %224 : vector<8x64xf32>
    %226 = vector.extract_strided_slice %219 {offsets = [0, 64], sizes = [8, 64], strides = [1, 1]} : vector<8x256xf32> to vector<8x64xf32>
    %227 = arith.negf %226 : vector<8x64xf32>
    %228 = math.exp %227 : vector<8x64xf32>
    %cst_58 = arith.constant 1.000000e+00 : f32
    %229 = vector.broadcast %cst_58 : f32 to vector<8x64xf32>
    %230 = arith.addf %229, %228 : vector<8x64xf32>
    %231 = arith.divf %229, %230 : vector<8x64xf32>
    %232 = vector.extract_strided_slice %219 {offsets = [0, 128], sizes = [8, 64], strides = [1, 1]} : vector<8x256xf32> to vector<8x64xf32>
    %233 = math.tanh %232 : vector<8x64xf32>
    %234 = vector.extract_strided_slice %219 {offsets = [0, 192], sizes = [8, 64], strides = [1, 1]} : vector<8x256xf32> to vector<8x64xf32>
    %235 = arith.negf %234 : vector<8x64xf32>
    %236 = math.exp %235 : vector<8x64xf32>
    %cst_59 = arith.constant 1.000000e+00 : f32
    %237 = vector.broadcast %cst_59 : f32 to vector<8x64xf32>
    %238 = arith.addf %237, %236 : vector<8x64xf32>
    %239 = arith.divf %237, %238 : vector<8x64xf32>
    %240 = arith.mulf %231, %208 : vector<8x64xf32>
    %241 = arith.mulf %225, %233 : vector<8x64xf32>
    %242 = arith.addf %240, %241 : vector<8x64xf32>
    %243 = math.tanh %242 : vector<8x64xf32>
    %244 = arith.mulf %239, %243 : vector<8x64xf32>
    %c5_i32 = arith.constant 5 : i32
    %245 = vector.broadcast %c5_i32 : i32 to vector<8x1xi32>
    %246 = arith.cmpi sgt, %0, %245 : vector<8x1xi32>
    %247 = vector.shape_cast %246 : vector<8x1xi1> to vector<8x1xi1>
    %248 = vector.broadcast %247 : vector<8x1xi1> to vector<8x64xi1>
    %249 = arith.select %248, %242, %208 : vector<8x64xi1>, vector<8x64xf32>
    %250 = vector.shape_cast %246 : vector<8x1xi1> to vector<8x1xi1>
    %251 = vector.broadcast %250 : vector<8x1xi1> to vector<8x64xi1>
    %252 = arith.select %251, %244, %211 : vector<8x64xi1>, vector<8x64xf32>
    %cst_60 = arith.constant 0.000000e+00 : f32
    %253 = vector.broadcast %cst_60 : f32 to vector<8x64xf32>
    %254 = vector.shape_cast %246 : vector<8x1xi1> to vector<8x1xi1>
    %255 = vector.broadcast %254 : vector<8x1xi1> to vector<8x64xi1>
    %256 = arith.select %255, %244, %253 : vector<8x64xi1>, vector<8x64xf32>
    %c40_61 = arith.constant 40 : index
    %c0_62 = arith.constant 0 : index
    %257 = vector.load %arg15[%c40_61, %c0_62] : memref<64x64xf32, #tpu.memory_space<vmem>>, vector<8x64xf32>
    tpu.vector_store %arg15[%c40_61, %c0_62], %256 {strides = array<i32>} : memref<64x64xf32, #tpu.memory_space<vmem>>, vector<8x64xf32>,
    %c48 = arith.constant 48 : index
    %c0_63 = arith.constant 0 : index
    %258 = vector.load %arg14[%c48, %c0_63] : memref<64x256xf32, #tpu.memory_space<vmem>>, vector<8x256xf32>
    %cst_64 = arith.constant dense<0.000000e+00> : vector<8x256xf32>
    %259 = tpu.matmul %252, %9, %cst_64 {dimension_numbers = #tpu.dot_dimension_numbers<[1], [0], [0], [1], [0, 0, 1, 1], [], []>} : vector<8x64xf32>, vector<64x256xf32>, vector<8x256xf32> -> vector<8x256xf32>
    %260 = arith.addf %258, %259 : vector<8x256xf32>
    %261 = vector.extract_strided_slice %260 {offsets = [0, 0], sizes = [8, 64], strides = [1, 1]} : vector<8x256xf32> to vector<8x64xf32>
    %262 = arith.negf %261 : vector<8x64xf32>
    %263 = math.exp %262 : vector<8x64xf32>
    %cst_65 = arith.constant 1.000000e+00 : f32
    %264 = vector.broadcast %cst_65 : f32 to vector<8x64xf32>
    %265 = arith.addf %264, %263 : vector<8x64xf32>
    %266 = arith.divf %264, %265 : vector<8x64xf32>
    %267 = vector.extract_strided_slice %260 {offsets = [0, 64], sizes = [8, 64], strides = [1, 1]} : vector<8x256xf32> to vector<8x64xf32>
    %268 = arith.negf %267 : vector<8x64xf32>
    %269 = math.exp %268 : vector<8x64xf32>
    %cst_66 = arith.constant 1.000000e+00 : f32
    %270 = vector.broadcast %cst_66 : f32 to vector<8x64xf32>
    %271 = arith.addf %270, %269 : vector<8x64xf32>
    %272 = arith.divf %270, %271 : vector<8x64xf32>
    %273 = vector.extract_strided_slice %260 {offsets = [0, 128], sizes = [8, 64], strides = [1, 1]} : vector<8x256xf32> to vector<8x64xf32>
    %274 = math.tanh %273 : vector<8x64xf32>
    %275 = vector.extract_strided_slice %260 {offsets = [0, 192], sizes = [8, 64], strides = [1, 1]} : vector<8x256xf32> to vector<8x64xf32>
    %276 = arith.negf %275 : vector<8x64xf32>
    %277 = math.exp %276 : vector<8x64xf32>
    %cst_67 = arith.constant 1.000000e+00 : f32
    %278 = vector.broadcast %cst_67 : f32 to vector<8x64xf32>
    %279 = arith.addf %278, %277 : vector<8x64xf32>
    %280 = arith.divf %278, %279 : vector<8x64xf32>
    %281 = arith.mulf %272, %249 : vector<8x64xf32>
    %282 = arith.mulf %266, %274 : vector<8x64xf32>
    %283 = arith.addf %281, %282 : vector<8x64xf32>
    %284 = math.tanh %283 : vector<8x64xf32>
    %285 = arith.mulf %280, %284 : vector<8x64xf32>
    %c6_i32 = arith.constant 6 : i32
    %286 = vector.broadcast %c6_i32 : i32 to vector<8x1xi32>
    %287 = arith.cmpi sgt, %0, %286 : vector<8x1xi32>
    %288 = vector.shape_cast %287 : vector<8x1xi1> to vector<8x1xi1>
    %289 = vector.broadcast %288 : vector<8x1xi1> to vector<8x64xi1>
    %290 = arith.select %289, %283, %249 : vector<8x64xi1>, vector<8x64xf32>
    %291 = vector.shape_cast %287 : vector<8x1xi1> to vector<8x1xi1>
    %292 = vector.broadcast %291 : vector<8x1xi1> to vector<8x64xi1>
    %293 = arith.select %292, %285, %252 : vector<8x64xi1>, vector<8x64xf32>
    %cst_68 = arith.constant 0.000000e+00 : f32
    %294 = vector.broadcast %cst_68 : f32 to vector<8x64xf32>
    %295 = vector.shape_cast %287 : vector<8x1xi1> to vector<8x1xi1>
    %296 = vector.broadcast %295 : vector<8x1xi1> to vector<8x64xi1>
    %297 = arith.select %296, %285, %294 : vector<8x64xi1>, vector<8x64xf32>
    %c48_69 = arith.constant 48 : index
    %c0_70 = arith.constant 0 : index
    %298 = vector.load %arg15[%c48_69, %c0_70] : memref<64x64xf32, #tpu.memory_space<vmem>>, vector<8x64xf32>
    tpu.vector_store %arg15[%c48_69, %c0_70], %297 {strides = array<i32>} : memref<64x64xf32, #tpu.memory_space<vmem>>, vector<8x64xf32>,
    %c56 = arith.constant 56 : index
    %c0_71 = arith.constant 0 : index
    %299 = vector.load %arg14[%c56, %c0_71] : memref<64x256xf32, #tpu.memory_space<vmem>>, vector<8x256xf32>
    %cst_72 = arith.constant dense<0.000000e+00> : vector<8x256xf32>
    %300 = tpu.matmul %293, %9, %cst_72 {dimension_numbers = #tpu.dot_dimension_numbers<[1], [0], [0], [1], [0, 0, 1, 1], [], []>} : vector<8x64xf32>, vector<64x256xf32>, vector<8x256xf32> -> vector<8x256xf32>
    %301 = arith.addf %299, %300 : vector<8x256xf32>
    %302 = vector.extract_strided_slice %301 {offsets = [0, 0], sizes = [8, 64], strides = [1, 1]} : vector<8x256xf32> to vector<8x64xf32>
    %303 = arith.negf %302 : vector<8x64xf32>
    %304 = math.exp %303 : vector<8x64xf32>
    %cst_73 = arith.constant 1.000000e+00 : f32
    %305 = vector.broadcast %cst_73 : f32 to vector<8x64xf32>
    %306 = arith.addf %305, %304 : vector<8x64xf32>
    %307 = arith.divf %305, %306 : vector<8x64xf32>
    %308 = vector.extract_strided_slice %301 {offsets = [0, 64], sizes = [8, 64], strides = [1, 1]} : vector<8x256xf32> to vector<8x64xf32>
    %309 = arith.negf %308 : vector<8x64xf32>
    %310 = math.exp %309 : vector<8x64xf32>
    %cst_74 = arith.constant 1.000000e+00 : f32
    %311 = vector.broadcast %cst_74 : f32 to vector<8x64xf32>
    %312 = arith.addf %311, %310 : vector<8x64xf32>
    %313 = arith.divf %311, %312 : vector<8x64xf32>
    %314 = vector.extract_strided_slice %301 {offsets = [0, 128], sizes = [8, 64], strides = [1, 1]} : vector<8x256xf32> to vector<8x64xf32>
    %315 = math.tanh %314 : vector<8x64xf32>
    %316 = vector.extract_strided_slice %301 {offsets = [0, 192], sizes = [8, 64], strides = [1, 1]} : vector<8x256xf32> to vector<8x64xf32>
    %317 = arith.negf %316 : vector<8x64xf32>
    %318 = math.exp %317 : vector<8x64xf32>
    %cst_75 = arith.constant 1.000000e+00 : f32
    %319 = vector.broadcast %cst_75 : f32 to vector<8x64xf32>
    %320 = arith.addf %319, %318 : vector<8x64xf32>
    %321 = arith.divf %319, %320 : vector<8x64xf32>
    %322 = arith.mulf %313, %290 : vector<8x64xf32>
    %323 = arith.mulf %307, %315 : vector<8x64xf32>
    %324 = arith.addf %322, %323 : vector<8x64xf32>
    %325 = math.tanh %324 : vector<8x64xf32>
    %326 = arith.mulf %321, %325 : vector<8x64xf32>
    %c7_i32 = arith.constant 7 : i32
    %327 = vector.broadcast %c7_i32 : i32 to vector<8x1xi32>
    %328 = arith.cmpi sgt, %0, %327 : vector<8x1xi32>
    %329 = vector.shape_cast %328 : vector<8x1xi1> to vector<8x1xi1>
    %330 = vector.broadcast %329 : vector<8x1xi1> to vector<8x64xi1>
    %331 = arith.select %330, %324, %290 : vector<8x64xi1>, vector<8x64xf32>
    %332 = vector.shape_cast %328 : vector<8x1xi1> to vector<8x1xi1>
    %333 = vector.broadcast %332 : vector<8x1xi1> to vector<8x64xi1>
    %334 = arith.select %333, %326, %293 : vector<8x64xi1>, vector<8x64xf32>
    %cst_76 = arith.constant 0.000000e+00 : f32
    %335 = vector.broadcast %cst_76 : f32 to vector<8x64xf32>
    %336 = vector.shape_cast %328 : vector<8x1xi1> to vector<8x1xi1>
    %337 = vector.broadcast %336 : vector<8x1xi1> to vector<8x64xi1>
    %338 = arith.select %337, %326, %335 : vector<8x64xi1>, vector<8x64xf32>
    %c56_77 = arith.constant 56 : index
    %c0_78 = arith.constant 0 : index
    %339 = vector.load %arg15[%c56_77, %c0_78] : memref<64x64xf32, #tpu.memory_space<vmem>>, vector<8x64xf32>
    tpu.vector_store %arg15[%c56_77, %c0_78], %338 {strides = array<i32>} : memref<64x64xf32, #tpu.memory_space<vmem>>, vector<8x64xf32>,
    %c0_79 = arith.constant 0 : index
    %c0_80 = arith.constant 0 : index
    %c0_81 = arith.constant 0 : index
    %340 = vector.load %arg12[%c0_79, %c0_80, %c0_81] : memref<3x8x64xf32, #tpu.memory_space<vmem>>, vector<1x8x64xf32>
    %341 = vector.shape_cast %340 : vector<1x8x64xf32> to vector<8x64xf32>
    %342 = vector.shape_cast %334 : vector<8x64xf32> to vector<1x8x64xf32>
    tpu.vector_store %arg12[%c0_79, %c0_80, %c0_81], %342 {strides = array<i32>} : memref<3x8x64xf32, #tpu.memory_space<vmem>>, vector<1x8x64xf32>,
    %c0_82 = arith.constant 0 : index
    %c0_83 = arith.constant 0 : index
    %c0_84 = arith.constant 0 : index
    %343 = vector.load %arg13[%c0_82, %c0_83, %c0_84] : memref<3x8x64xf32, #tpu.memory_space<vmem>>, vector<1x8x64xf32>
    %344 = vector.shape_cast %343 : vector<1x8x64xf32> to vector<8x64xf32>
    %345 = vector.shape_cast %331 : vector<8x64xf32> to vector<1x8x64xf32>
    tpu.vector_store %arg13[%c0_82, %c0_83, %c0_84], %345 {strides = array<i32>} : memref<3x8x64xf32, #tpu.memory_space<vmem>>, vector<1x8x64xf32>,
    %c0_85 = arith.constant 0 : index
    %c0_86 = arith.constant 0 : index
    %346 = vector.load %arg15[%c0_85, %c0_86] : memref<64x64xf32, #tpu.memory_space<vmem>>, vector<64x64xf32>
    %c0_87 = arith.constant 0 : index
    %c0_88 = arith.constant 0 : index
    %347 = vector.load %arg5[%c0_87, %c0_88] : memref<64x256xf32, #tpu.memory_space<vmem>>, vector<64x256xf32>
    %cst_89 = arith.constant dense<0.000000e+00> : vector<64x256xf32>
    %348 = tpu.matmul %346, %347, %cst_89 {dimension_numbers = #tpu.dot_dimension_numbers<[1], [0], [0], [1], [0, 0, 1, 1], [], []>} : vector<64x64xf32>, vector<64x256xf32>, vector<64x256xf32> -> vector<64x256xf32>
    %c0_90 = arith.constant 0 : index
    %c0_91 = arith.constant 0 : index
    %349 = vector.load %arg7[%c0_90, %c0_91] : memref<1x256xf32, #tpu.memory_space<vmem>>, vector<1x256xf32>
    %350 = vector.broadcast %349 : vector<1x256xf32> to vector<64x256xf32>
    %351 = arith.addf %348, %350 : vector<64x256xf32>
    %c0_92 = arith.constant 0 : index
    %c0_93 = arith.constant 0 : index
    %352 = vector.load %arg14[%c0_92, %c0_93] : memref<64x256xf32, #tpu.memory_space<vmem>>, vector<64x256xf32>
    tpu.vector_store %arg14[%c0_92, %c0_93], %351 {strides = array<i32>} : memref<64x256xf32, #tpu.memory_space<vmem>>, vector<64x256xf32>,
    %c0_94 = arith.constant 0 : index
    %c0_95 = arith.constant 0 : index
    %353 = vector.load %arg6[%c0_94, %c0_95] : memref<64x256xf32, #tpu.memory_space<vmem>>, vector<64x256xf32>
    %cst_96 = arith.constant 0.000000e+00 : f32
    %354 = vector.broadcast %cst_96 : f32 to vector<8x64xf32>
    %cst_97 = arith.constant 0.000000e+00 : f32
    %355 = vector.broadcast %cst_97 : f32 to vector<8x64xf32>
    %c0_98 = arith.constant 0 : index
    %c0_99 = arith.constant 0 : index
    %356 = vector.load %arg14[%c0_98, %c0_99] : memref<64x256xf32, #tpu.memory_space<vmem>>, vector<8x256xf32>
    %cst_100 = arith.constant dense<0.000000e+00> : vector<8x256xf32>
    %357 = tpu.matmul %354, %353, %cst_100 {dimension_numbers = #tpu.dot_dimension_numbers<[1], [0], [0], [1], [0, 0, 1, 1], [], []>} : vector<8x64xf32>, vector<64x256xf32>, vector<8x256xf32> -> vector<8x256xf32>
    %358 = arith.addf %356, %357 : vector<8x256xf32>
    %359 = vector.extract_strided_slice %358 {offsets = [0, 0], sizes = [8, 64], strides = [1, 1]} : vector<8x256xf32> to vector<8x64xf32>
    %360 = arith.negf %359 : vector<8x64xf32>
    %361 = math.exp %360 : vector<8x64xf32>
    %cst_101 = arith.constant 1.000000e+00 : f32
    %362 = vector.broadcast %cst_101 : f32 to vector<8x64xf32>
    %363 = arith.addf %362, %361 : vector<8x64xf32>
    %364 = arith.divf %362, %363 : vector<8x64xf32>
    %365 = vector.extract_strided_slice %358 {offsets = [0, 64], sizes = [8, 64], strides = [1, 1]} : vector<8x256xf32> to vector<8x64xf32>
    %366 = arith.negf %365 : vector<8x64xf32>
    %367 = math.exp %366 : vector<8x64xf32>
    %cst_102 = arith.constant 1.000000e+00 : f32
    %368 = vector.broadcast %cst_102 : f32 to vector<8x64xf32>
    %369 = arith.addf %368, %367 : vector<8x64xf32>
    %370 = arith.divf %368, %369 : vector<8x64xf32>
    %371 = vector.extract_strided_slice %358 {offsets = [0, 128], sizes = [8, 64], strides = [1, 1]} : vector<8x256xf32> to vector<8x64xf32>
    %372 = math.tanh %371 : vector<8x64xf32>
    %373 = vector.extract_strided_slice %358 {offsets = [0, 192], sizes = [8, 64], strides = [1, 1]} : vector<8x256xf32> to vector<8x64xf32>
    %374 = arith.negf %373 : vector<8x64xf32>
    %375 = math.exp %374 : vector<8x64xf32>
    %cst_103 = arith.constant 1.000000e+00 : f32
    %376 = vector.broadcast %cst_103 : f32 to vector<8x64xf32>
    %377 = arith.addf %376, %375 : vector<8x64xf32>
    %378 = arith.divf %376, %377 : vector<8x64xf32>
    %379 = arith.mulf %370, %355 : vector<8x64xf32>
    %380 = arith.mulf %364, %372 : vector<8x64xf32>
    %381 = arith.addf %379, %380 : vector<8x64xf32>
    %382 = math.tanh %381 : vector<8x64xf32>
    %383 = arith.mulf %378, %382 : vector<8x64xf32>
    %c0_i32_104 = arith.constant 0 : i32
    %384 = vector.broadcast %c0_i32_104 : i32 to vector<8x1xi32>
    %385 = arith.cmpi sgt, %0, %384 : vector<8x1xi32>
    %386 = vector.shape_cast %385 : vector<8x1xi1> to vector<8x1xi1>
    %387 = vector.broadcast %386 : vector<8x1xi1> to vector<8x64xi1>
    %388 = arith.select %387, %381, %355 : vector<8x64xi1>, vector<8x64xf32>
    %389 = vector.shape_cast %385 : vector<8x1xi1> to vector<8x1xi1>
    %390 = vector.broadcast %389 : vector<8x1xi1> to vector<8x64xi1>
    %391 = arith.select %390, %383, %354 : vector<8x64xi1>, vector<8x64xf32>
    %cst_105 = arith.constant 0.000000e+00 : f32
    %392 = vector.broadcast %cst_105 : f32 to vector<8x64xf32>
    %393 = vector.shape_cast %385 : vector<8x1xi1> to vector<8x1xi1>
    %394 = vector.broadcast %393 : vector<8x1xi1> to vector<8x64xi1>
    %395 = arith.select %394, %383, %392 : vector<8x64xi1>, vector<8x64xf32>
    %c0_106 = arith.constant 0 : index
    %c0_107 = arith.constant 0 : index
    %396 = vector.load %arg15[%c0_106, %c0_107] : memref<64x64xf32, #tpu.memory_space<vmem>>, vector<8x64xf32>
    tpu.vector_store %arg15[%c0_106, %c0_107], %395 {strides = array<i32>} : memref<64x64xf32, #tpu.memory_space<vmem>>, vector<8x64xf32>,
    %c8_108 = arith.constant 8 : index
    %c0_109 = arith.constant 0 : index
    %397 = vector.load %arg14[%c8_108, %c0_109] : memref<64x256xf32, #tpu.memory_space<vmem>>, vector<8x256xf32>
    %cst_110 = arith.constant dense<0.000000e+00> : vector<8x256xf32>
    %398 = tpu.matmul %391, %353, %cst_110 {dimension_numbers = #tpu.dot_dimension_numbers<[1], [0], [0], [1], [0, 0, 1, 1], [], []>} : vector<8x64xf32>, vector<64x256xf32>, vector<8x256xf32> -> vector<8x256xf32>
    %399 = arith.addf %397, %398 : vector<8x256xf32>
    %400 = vector.extract_strided_slice %399 {offsets = [0, 0], sizes = [8, 64], strides = [1, 1]} : vector<8x256xf32> to vector<8x64xf32>
    %401 = arith.negf %400 : vector<8x64xf32>
    %402 = math.exp %401 : vector<8x64xf32>
    %cst_111 = arith.constant 1.000000e+00 : f32
    %403 = vector.broadcast %cst_111 : f32 to vector<8x64xf32>
    %404 = arith.addf %403, %402 : vector<8x64xf32>
    %405 = arith.divf %403, %404 : vector<8x64xf32>
    %406 = vector.extract_strided_slice %399 {offsets = [0, 64], sizes = [8, 64], strides = [1, 1]} : vector<8x256xf32> to vector<8x64xf32>
    %407 = arith.negf %406 : vector<8x64xf32>
    %408 = math.exp %407 : vector<8x64xf32>
    %cst_112 = arith.constant 1.000000e+00 : f32
    %409 = vector.broadcast %cst_112 : f32 to vector<8x64xf32>
    %410 = arith.addf %409, %408 : vector<8x64xf32>
    %411 = arith.divf %409, %410 : vector<8x64xf32>
    %412 = vector.extract_strided_slice %399 {offsets = [0, 128], sizes = [8, 64], strides = [1, 1]} : vector<8x256xf32> to vector<8x64xf32>
    %413 = math.tanh %412 : vector<8x64xf32>
    %414 = vector.extract_strided_slice %399 {offsets = [0, 192], sizes = [8, 64], strides = [1, 1]} : vector<8x256xf32> to vector<8x64xf32>
    %415 = arith.negf %414 : vector<8x64xf32>
    %416 = math.exp %415 : vector<8x64xf32>
    %cst_113 = arith.constant 1.000000e+00 : f32
    %417 = vector.broadcast %cst_113 : f32 to vector<8x64xf32>
    %418 = arith.addf %417, %416 : vector<8x64xf32>
    %419 = arith.divf %417, %418 : vector<8x64xf32>
    %420 = arith.mulf %411, %388 : vector<8x64xf32>
    %421 = arith.mulf %405, %413 : vector<8x64xf32>
    %422 = arith.addf %420, %421 : vector<8x64xf32>
    %423 = math.tanh %422 : vector<8x64xf32>
    %424 = arith.mulf %419, %423 : vector<8x64xf32>
    %c1_i32_114 = arith.constant 1 : i32
    %425 = vector.broadcast %c1_i32_114 : i32 to vector<8x1xi32>
    %426 = arith.cmpi sgt, %0, %425 : vector<8x1xi32>
    %427 = vector.shape_cast %426 : vector<8x1xi1> to vector<8x1xi1>
    %428 = vector.broadcast %427 : vector<8x1xi1> to vector<8x64xi1>
    %429 = arith.select %428, %422, %388 : vector<8x64xi1>, vector<8x64xf32>
    %430 = vector.shape_cast %426 : vector<8x1xi1> to vector<8x1xi1>
    %431 = vector.broadcast %430 : vector<8x1xi1> to vector<8x64xi1>
    %432 = arith.select %431, %424, %391 : vector<8x64xi1>, vector<8x64xf32>
    %cst_115 = arith.constant 0.000000e+00 : f32
    %433 = vector.broadcast %cst_115 : f32 to vector<8x64xf32>
    %434 = vector.shape_cast %426 : vector<8x1xi1> to vector<8x1xi1>
    %435 = vector.broadcast %434 : vector<8x1xi1> to vector<8x64xi1>
    %436 = arith.select %435, %424, %433 : vector<8x64xi1>, vector<8x64xf32>
    %c8_116 = arith.constant 8 : index
    %c0_117 = arith.constant 0 : index
    %437 = vector.load %arg15[%c8_116, %c0_117] : memref<64x64xf32, #tpu.memory_space<vmem>>, vector<8x64xf32>
    tpu.vector_store %arg15[%c8_116, %c0_117], %436 {strides = array<i32>} : memref<64x64xf32, #tpu.memory_space<vmem>>, vector<8x64xf32>,
    %c16_118 = arith.constant 16 : index
    %c0_119 = arith.constant 0 : index
    %438 = vector.load %arg14[%c16_118, %c0_119] : memref<64x256xf32, #tpu.memory_space<vmem>>, vector<8x256xf32>
    %cst_120 = arith.constant dense<0.000000e+00> : vector<8x256xf32>
    %439 = tpu.matmul %432, %353, %cst_120 {dimension_numbers = #tpu.dot_dimension_numbers<[1], [0], [0], [1], [0, 0, 1, 1], [], []>} : vector<8x64xf32>, vector<64x256xf32>, vector<8x256xf32> -> vector<8x256xf32>
    %440 = arith.addf %438, %439 : vector<8x256xf32>
    %441 = vector.extract_strided_slice %440 {offsets = [0, 0], sizes = [8, 64], strides = [1, 1]} : vector<8x256xf32> to vector<8x64xf32>
    %442 = arith.negf %441 : vector<8x64xf32>
    %443 = math.exp %442 : vector<8x64xf32>
    %cst_121 = arith.constant 1.000000e+00 : f32
    %444 = vector.broadcast %cst_121 : f32 to vector<8x64xf32>
    %445 = arith.addf %444, %443 : vector<8x64xf32>
    %446 = arith.divf %444, %445 : vector<8x64xf32>
    %447 = vector.extract_strided_slice %440 {offsets = [0, 64], sizes = [8, 64], strides = [1, 1]} : vector<8x256xf32> to vector<8x64xf32>
    %448 = arith.negf %447 : vector<8x64xf32>
    %449 = math.exp %448 : vector<8x64xf32>
    %cst_122 = arith.constant 1.000000e+00 : f32
    %450 = vector.broadcast %cst_122 : f32 to vector<8x64xf32>
    %451 = arith.addf %450, %449 : vector<8x64xf32>
    %452 = arith.divf %450, %451 : vector<8x64xf32>
    %453 = vector.extract_strided_slice %440 {offsets = [0, 128], sizes = [8, 64], strides = [1, 1]} : vector<8x256xf32> to vector<8x64xf32>
    %454 = math.tanh %453 : vector<8x64xf32>
    %455 = vector.extract_strided_slice %440 {offsets = [0, 192], sizes = [8, 64], strides = [1, 1]} : vector<8x256xf32> to vector<8x64xf32>
    %456 = arith.negf %455 : vector<8x64xf32>
    %457 = math.exp %456 : vector<8x64xf32>
    %cst_123 = arith.constant 1.000000e+00 : f32
    %458 = vector.broadcast %cst_123 : f32 to vector<8x64xf32>
    %459 = arith.addf %458, %457 : vector<8x64xf32>
    %460 = arith.divf %458, %459 : vector<8x64xf32>
    %461 = arith.mulf %452, %429 : vector<8x64xf32>
    %462 = arith.mulf %446, %454 : vector<8x64xf32>
    %463 = arith.addf %461, %462 : vector<8x64xf32>
    %464 = math.tanh %463 : vector<8x64xf32>
    %465 = arith.mulf %460, %464 : vector<8x64xf32>
    %c2_i32_124 = arith.constant 2 : i32
    %466 = vector.broadcast %c2_i32_124 : i32 to vector<8x1xi32>
    %467 = arith.cmpi sgt, %0, %466 : vector<8x1xi32>
    %468 = vector.shape_cast %467 : vector<8x1xi1> to vector<8x1xi1>
    %469 = vector.broadcast %468 : vector<8x1xi1> to vector<8x64xi1>
    %470 = arith.select %469, %463, %429 : vector<8x64xi1>, vector<8x64xf32>
    %471 = vector.shape_cast %467 : vector<8x1xi1> to vector<8x1xi1>
    %472 = vector.broadcast %471 : vector<8x1xi1> to vector<8x64xi1>
    %473 = arith.select %472, %465, %432 : vector<8x64xi1>, vector<8x64xf32>
    %cst_125 = arith.constant 0.000000e+00 : f32
    %474 = vector.broadcast %cst_125 : f32 to vector<8x64xf32>
    %475 = vector.shape_cast %467 : vector<8x1xi1> to vector<8x1xi1>
    %476 = vector.broadcast %475 : vector<8x1xi1> to vector<8x64xi1>
    %477 = arith.select %476, %465, %474 : vector<8x64xi1>, vector<8x64xf32>
    %c16_126 = arith.constant 16 : index
    %c0_127 = arith.constant 0 : index
    %478 = vector.load %arg15[%c16_126, %c0_127] : memref<64x64xf32, #tpu.memory_space<vmem>>, vector<8x64xf32>
    tpu.vector_store %arg15[%c16_126, %c0_127], %477 {strides = array<i32>} : memref<64x64xf32, #tpu.memory_space<vmem>>, vector<8x64xf32>,
    %c24_128 = arith.constant 24 : index
    %c0_129 = arith.constant 0 : index
    %479 = vector.load %arg14[%c24_128, %c0_129] : memref<64x256xf32, #tpu.memory_space<vmem>>, vector<8x256xf32>
    %cst_130 = arith.constant dense<0.000000e+00> : vector<8x256xf32>
    %480 = tpu.matmul %473, %353, %cst_130 {dimension_numbers = #tpu.dot_dimension_numbers<[1], [0], [0], [1], [0, 0, 1, 1], [], []>} : vector<8x64xf32>, vector<64x256xf32>, vector<8x256xf32> -> vector<8x256xf32>
    %481 = arith.addf %479, %480 : vector<8x256xf32>
    %482 = vector.extract_strided_slice %481 {offsets = [0, 0], sizes = [8, 64], strides = [1, 1]} : vector<8x256xf32> to vector<8x64xf32>
    %483 = arith.negf %482 : vector<8x64xf32>
    %484 = math.exp %483 : vector<8x64xf32>
    %cst_131 = arith.constant 1.000000e+00 : f32
    %485 = vector.broadcast %cst_131 : f32 to vector<8x64xf32>
    %486 = arith.addf %485, %484 : vector<8x64xf32>
    %487 = arith.divf %485, %486 : vector<8x64xf32>
    %488 = vector.extract_strided_slice %481 {offsets = [0, 64], sizes = [8, 64], strides = [1, 1]} : vector<8x256xf32> to vector<8x64xf32>
    %489 = arith.negf %488 : vector<8x64xf32>
    %490 = math.exp %489 : vector<8x64xf32>
    %cst_132 = arith.constant 1.000000e+00 : f32
    %491 = vector.broadcast %cst_132 : f32 to vector<8x64xf32>
    %492 = arith.addf %491, %490 : vector<8x64xf32>
    %493 = arith.divf %491, %492 : vector<8x64xf32>
    %494 = vector.extract_strided_slice %481 {offsets = [0, 128], sizes = [8, 64], strides = [1, 1]} : vector<8x256xf32> to vector<8x64xf32>
    %495 = math.tanh %494 : vector<8x64xf32>
    %496 = vector.extract_strided_slice %481 {offsets = [0, 192], sizes = [8, 64], strides = [1, 1]} : vector<8x256xf32> to vector<8x64xf32>
    %497 = arith.negf %496 : vector<8x64xf32>
    %498 = math.exp %497 : vector<8x64xf32>
    %cst_133 = arith.constant 1.000000e+00 : f32
    %499 = vector.broadcast %cst_133 : f32 to vector<8x64xf32>
    %500 = arith.addf %499, %498 : vector<8x64xf32>
    %501 = arith.divf %499, %500 : vector<8x64xf32>
    %502 = arith.mulf %493, %470 : vector<8x64xf32>
    %503 = arith.mulf %487, %495 : vector<8x64xf32>
    %504 = arith.addf %502, %503 : vector<8x64xf32>
    %505 = math.tanh %504 : vector<8x64xf32>
    %506 = arith.mulf %501, %505 : vector<8x64xf32>
    %c3_i32_134 = arith.constant 3 : i32
    %507 = vector.broadcast %c3_i32_134 : i32 to vector<8x1xi32>
    %508 = arith.cmpi sgt, %0, %507 : vector<8x1xi32>
    %509 = vector.shape_cast %508 : vector<8x1xi1> to vector<8x1xi1>
    %510 = vector.broadcast %509 : vector<8x1xi1> to vector<8x64xi1>
    %511 = arith.select %510, %504, %470 : vector<8x64xi1>, vector<8x64xf32>
    %512 = vector.shape_cast %508 : vector<8x1xi1> to vector<8x1xi1>
    %513 = vector.broadcast %512 : vector<8x1xi1> to vector<8x64xi1>
    %514 = arith.select %513, %506, %473 : vector<8x64xi1>, vector<8x64xf32>
    %cst_135 = arith.constant 0.000000e+00 : f32
    %515 = vector.broadcast %cst_135 : f32 to vector<8x64xf32>
    %516 = vector.shape_cast %508 : vector<8x1xi1> to vector<8x1xi1>
    %517 = vector.broadcast %516 : vector<8x1xi1> to vector<8x64xi1>
    %518 = arith.select %517, %506, %515 : vector<8x64xi1>, vector<8x64xf32>
    %c24_136 = arith.constant 24 : index
    %c0_137 = arith.constant 0 : index
    %519 = vector.load %arg15[%c24_136, %c0_137] : memref<64x64xf32, #tpu.memory_space<vmem>>, vector<8x64xf32>
    tpu.vector_store %arg15[%c24_136, %c0_137], %518 {strides = array<i32>} : memref<64x64xf32, #tpu.memory_space<vmem>>, vector<8x64xf32>,
    %c32_138 = arith.constant 32 : index
    %c0_139 = arith.constant 0 : index
    %520 = vector.load %arg14[%c32_138, %c0_139] : memref<64x256xf32, #tpu.memory_space<vmem>>, vector<8x256xf32>
    %cst_140 = arith.constant dense<0.000000e+00> : vector<8x256xf32>
    %521 = tpu.matmul %514, %353, %cst_140 {dimension_numbers = #tpu.dot_dimension_numbers<[1], [0], [0], [1], [0, 0, 1, 1], [], []>} : vector<8x64xf32>, vector<64x256xf32>, vector<8x256xf32> -> vector<8x256xf32>
    %522 = arith.addf %520, %521 : vector<8x256xf32>
    %523 = vector.extract_strided_slice %522 {offsets = [0, 0], sizes = [8, 64], strides = [1, 1]} : vector<8x256xf32> to vector<8x64xf32>
    %524 = arith.negf %523 : vector<8x64xf32>
    %525 = math.exp %524 : vector<8x64xf32>
    %cst_141 = arith.constant 1.000000e+00 : f32
    %526 = vector.broadcast %cst_141 : f32 to vector<8x64xf32>
    %527 = arith.addf %526, %525 : vector<8x64xf32>
    %528 = arith.divf %526, %527 : vector<8x64xf32>
    %529 = vector.extract_strided_slice %522 {offsets = [0, 64], sizes = [8, 64], strides = [1, 1]} : vector<8x256xf32> to vector<8x64xf32>
    %530 = arith.negf %529 : vector<8x64xf32>
    %531 = math.exp %530 : vector<8x64xf32>
    %cst_142 = arith.constant 1.000000e+00 : f32
    %532 = vector.broadcast %cst_142 : f32 to vector<8x64xf32>
    %533 = arith.addf %532, %531 : vector<8x64xf32>
    %534 = arith.divf %532, %533 : vector<8x64xf32>
    %535 = vector.extract_strided_slice %522 {offsets = [0, 128], sizes = [8, 64], strides = [1, 1]} : vector<8x256xf32> to vector<8x64xf32>
    %536 = math.tanh %535 : vector<8x64xf32>
    %537 = vector.extract_strided_slice %522 {offsets = [0, 192], sizes = [8, 64], strides = [1, 1]} : vector<8x256xf32> to vector<8x64xf32>
    %538 = arith.negf %537 : vector<8x64xf32>
    %539 = math.exp %538 : vector<8x64xf32>
    %cst_143 = arith.constant 1.000000e+00 : f32
    %540 = vector.broadcast %cst_143 : f32 to vector<8x64xf32>
    %541 = arith.addf %540, %539 : vector<8x64xf32>
    %542 = arith.divf %540, %541 : vector<8x64xf32>
    %543 = arith.mulf %534, %511 : vector<8x64xf32>
    %544 = arith.mulf %528, %536 : vector<8x64xf32>
    %545 = arith.addf %543, %544 : vector<8x64xf32>
    %546 = math.tanh %545 : vector<8x64xf32>
    %547 = arith.mulf %542, %546 : vector<8x64xf32>
    %c4_i32_144 = arith.constant 4 : i32
    %548 = vector.broadcast %c4_i32_144 : i32 to vector<8x1xi32>
    %549 = arith.cmpi sgt, %0, %548 : vector<8x1xi32>
    %550 = vector.shape_cast %549 : vector<8x1xi1> to vector<8x1xi1>
    %551 = vector.broadcast %550 : vector<8x1xi1> to vector<8x64xi1>
    %552 = arith.select %551, %545, %511 : vector<8x64xi1>, vector<8x64xf32>
    %553 = vector.shape_cast %549 : vector<8x1xi1> to vector<8x1xi1>
    %554 = vector.broadcast %553 : vector<8x1xi1> to vector<8x64xi1>
    %555 = arith.select %554, %547, %514 : vector<8x64xi1>, vector<8x64xf32>
    %cst_145 = arith.constant 0.000000e+00 : f32
    %556 = vector.broadcast %cst_145 : f32 to vector<8x64xf32>
    %557 = vector.shape_cast %549 : vector<8x1xi1> to vector<8x1xi1>
    %558 = vector.broadcast %557 : vector<8x1xi1> to vector<8x64xi1>
    %559 = arith.select %558, %547, %556 : vector<8x64xi1>, vector<8x64xf32>
    %c32_146 = arith.constant 32 : index
    %c0_147 = arith.constant 0 : index
    %560 = vector.load %arg15[%c32_146, %c0_147] : memref<64x64xf32, #tpu.memory_space<vmem>>, vector<8x64xf32>
    tpu.vector_store %arg15[%c32_146, %c0_147], %559 {strides = array<i32>} : memref<64x64xf32, #tpu.memory_space<vmem>>, vector<8x64xf32>,
    %c40_148 = arith.constant 40 : index
    %c0_149 = arith.constant 0 : index
    %561 = vector.load %arg14[%c40_148, %c0_149] : memref<64x256xf32, #tpu.memory_space<vmem>>, vector<8x256xf32>
    %cst_150 = arith.constant dense<0.000000e+00> : vector<8x256xf32>
    %562 = tpu.matmul %555, %353, %cst_150 {dimension_numbers = #tpu.dot_dimension_numbers<[1], [0], [0], [1], [0, 0, 1, 1], [], []>} : vector<8x64xf32>, vector<64x256xf32>, vector<8x256xf32> -> vector<8x256xf32>
    %563 = arith.addf %561, %562 : vector<8x256xf32>
    %564 = vector.extract_strided_slice %563 {offsets = [0, 0], sizes = [8, 64], strides = [1, 1]} : vector<8x256xf32> to vector<8x64xf32>
    %565 = arith.negf %564 : vector<8x64xf32>
    %566 = math.exp %565 : vector<8x64xf32>
    %cst_151 = arith.constant 1.000000e+00 : f32
    %567 = vector.broadcast %cst_151 : f32 to vector<8x64xf32>
    %568 = arith.addf %567, %566 : vector<8x64xf32>
    %569 = arith.divf %567, %568 : vector<8x64xf32>
    %570 = vector.extract_strided_slice %563 {offsets = [0, 64], sizes = [8, 64], strides = [1, 1]} : vector<8x256xf32> to vector<8x64xf32>
    %571 = arith.negf %570 : vector<8x64xf32>
    %572 = math.exp %571 : vector<8x64xf32>
    %cst_152 = arith.constant 1.000000e+00 : f32
    %573 = vector.broadcast %cst_152 : f32 to vector<8x64xf32>
    %574 = arith.addf %573, %572 : vector<8x64xf32>
    %575 = arith.divf %573, %574 : vector<8x64xf32>
    %576 = vector.extract_strided_slice %563 {offsets = [0, 128], sizes = [8, 64], strides = [1, 1]} : vector<8x256xf32> to vector<8x64xf32>
    %577 = math.tanh %576 : vector<8x64xf32>
    %578 = vector.extract_strided_slice %563 {offsets = [0, 192], sizes = [8, 64], strides = [1, 1]} : vector<8x256xf32> to vector<8x64xf32>
    %579 = arith.negf %578 : vector<8x64xf32>
    %580 = math.exp %579 : vector<8x64xf32>
    %cst_153 = arith.constant 1.000000e+00 : f32
    %581 = vector.broadcast %cst_153 : f32 to vector<8x64xf32>
    %582 = arith.addf %581, %580 : vector<8x64xf32>
    %583 = arith.divf %581, %582 : vector<8x64xf32>
    %584 = arith.mulf %575, %552 : vector<8x64xf32>
    %585 = arith.mulf %569, %577 : vector<8x64xf32>
    %586 = arith.addf %584, %585 : vector<8x64xf32>
    %587 = math.tanh %586 : vector<8x64xf32>
    %588 = arith.mulf %583, %587 : vector<8x64xf32>
    %c5_i32_154 = arith.constant 5 : i32
    %589 = vector.broadcast %c5_i32_154 : i32 to vector<8x1xi32>
    %590 = arith.cmpi sgt, %0, %589 : vector<8x1xi32>
    %591 = vector.shape_cast %590 : vector<8x1xi1> to vector<8x1xi1>
    %592 = vector.broadcast %591 : vector<8x1xi1> to vector<8x64xi1>
    %593 = arith.select %592, %586, %552 : vector<8x64xi1>, vector<8x64xf32>
    %594 = vector.shape_cast %590 : vector<8x1xi1> to vector<8x1xi1>
    %595 = vector.broadcast %594 : vector<8x1xi1> to vector<8x64xi1>
    %596 = arith.select %595, %588, %555 : vector<8x64xi1>, vector<8x64xf32>
    %cst_155 = arith.constant 0.000000e+00 : f32
    %597 = vector.broadcast %cst_155 : f32 to vector<8x64xf32>
    %598 = vector.shape_cast %590 : vector<8x1xi1> to vector<8x1xi1>
    %599 = vector.broadcast %598 : vector<8x1xi1> to vector<8x64xi1>
    %600 = arith.select %599, %588, %597 : vector<8x64xi1>, vector<8x64xf32>
    %c40_156 = arith.constant 40 : index
    %c0_157 = arith.constant 0 : index
    %601 = vector.load %arg15[%c40_156, %c0_157] : memref<64x64xf32, #tpu.memory_space<vmem>>, vector<8x64xf32>
    tpu.vector_store %arg15[%c40_156, %c0_157], %600 {strides = array<i32>} : memref<64x64xf32, #tpu.memory_space<vmem>>, vector<8x64xf32>,
    %c48_158 = arith.constant 48 : index
    %c0_159 = arith.constant 0 : index
    %602 = vector.load %arg14[%c48_158, %c0_159] : memref<64x256xf32, #tpu.memory_space<vmem>>, vector<8x256xf32>
    %cst_160 = arith.constant dense<0.000000e+00> : vector<8x256xf32>
    %603 = tpu.matmul %596, %353, %cst_160 {dimension_numbers = #tpu.dot_dimension_numbers<[1], [0], [0], [1], [0, 0, 1, 1], [], []>} : vector<8x64xf32>, vector<64x256xf32>, vector<8x256xf32> -> vector<8x256xf32>
    %604 = arith.addf %602, %603 : vector<8x256xf32>
    %605 = vector.extract_strided_slice %604 {offsets = [0, 0], sizes = [8, 64], strides = [1, 1]} : vector<8x256xf32> to vector<8x64xf32>
    %606 = arith.negf %605 : vector<8x64xf32>
    %607 = math.exp %606 : vector<8x64xf32>
    %cst_161 = arith.constant 1.000000e+00 : f32
    %608 = vector.broadcast %cst_161 : f32 to vector<8x64xf32>
    %609 = arith.addf %608, %607 : vector<8x64xf32>
    %610 = arith.divf %608, %609 : vector<8x64xf32>
    %611 = vector.extract_strided_slice %604 {offsets = [0, 64], sizes = [8, 64], strides = [1, 1]} : vector<8x256xf32> to vector<8x64xf32>
    %612 = arith.negf %611 : vector<8x64xf32>
    %613 = math.exp %612 : vector<8x64xf32>
    %cst_162 = arith.constant 1.000000e+00 : f32
    %614 = vector.broadcast %cst_162 : f32 to vector<8x64xf32>
    %615 = arith.addf %614, %613 : vector<8x64xf32>
    %616 = arith.divf %614, %615 : vector<8x64xf32>
    %617 = vector.extract_strided_slice %604 {offsets = [0, 128], sizes = [8, 64], strides = [1, 1]} : vector<8x256xf32> to vector<8x64xf32>
    %618 = math.tanh %617 : vector<8x64xf32>
    %619 = vector.extract_strided_slice %604 {offsets = [0, 192], sizes = [8, 64], strides = [1, 1]} : vector<8x256xf32> to vector<8x64xf32>
    %620 = arith.negf %619 : vector<8x64xf32>
    %621 = math.exp %620 : vector<8x64xf32>
    %cst_163 = arith.constant 1.000000e+00 : f32
    %622 = vector.broadcast %cst_163 : f32 to vector<8x64xf32>
    %623 = arith.addf %622, %621 : vector<8x64xf32>
    %624 = arith.divf %622, %623 : vector<8x64xf32>
    %625 = arith.mulf %616, %593 : vector<8x64xf32>
    %626 = arith.mulf %610, %618 : vector<8x64xf32>
    %627 = arith.addf %625, %626 : vector<8x64xf32>
    %628 = math.tanh %627 : vector<8x64xf32>
    %629 = arith.mulf %624, %628 : vector<8x64xf32>
    %c6_i32_164 = arith.constant 6 : i32
    %630 = vector.broadcast %c6_i32_164 : i32 to vector<8x1xi32>
    %631 = arith.cmpi sgt, %0, %630 : vector<8x1xi32>
    %632 = vector.shape_cast %631 : vector<8x1xi1> to vector<8x1xi1>
    %633 = vector.broadcast %632 : vector<8x1xi1> to vector<8x64xi1>
    %634 = arith.select %633, %627, %593 : vector<8x64xi1>, vector<8x64xf32>
    %635 = vector.shape_cast %631 : vector<8x1xi1> to vector<8x1xi1>
    %636 = vector.broadcast %635 : vector<8x1xi1> to vector<8x64xi1>
    %637 = arith.select %636, %629, %596 : vector<8x64xi1>, vector<8x64xf32>
    %cst_165 = arith.constant 0.000000e+00 : f32
    %638 = vector.broadcast %cst_165 : f32 to vector<8x64xf32>
    %639 = vector.shape_cast %631 : vector<8x1xi1> to vector<8x1xi1>
    %640 = vector.broadcast %639 : vector<8x1xi1> to vector<8x64xi1>
    %641 = arith.select %640, %629, %638 : vector<8x64xi1>, vector<8x64xf32>
    %c48_166 = arith.constant 48 : index
    %c0_167 = arith.constant 0 : index
    %642 = vector.load %arg15[%c48_166, %c0_167] : memref<64x64xf32, #tpu.memory_space<vmem>>, vector<8x64xf32>
    tpu.vector_store %arg15[%c48_166, %c0_167], %641 {strides = array<i32>} : memref<64x64xf32, #tpu.memory_space<vmem>>, vector<8x64xf32>,
    %c56_168 = arith.constant 56 : index
    %c0_169 = arith.constant 0 : index
    %643 = vector.load %arg14[%c56_168, %c0_169] : memref<64x256xf32, #tpu.memory_space<vmem>>, vector<8x256xf32>
    %cst_170 = arith.constant dense<0.000000e+00> : vector<8x256xf32>
    %644 = tpu.matmul %637, %353, %cst_170 {dimension_numbers = #tpu.dot_dimension_numbers<[1], [0], [0], [1], [0, 0, 1, 1], [], []>} : vector<8x64xf32>, vector<64x256xf32>, vector<8x256xf32> -> vector<8x256xf32>
    %645 = arith.addf %643, %644 : vector<8x256xf32>
    %646 = vector.extract_strided_slice %645 {offsets = [0, 0], sizes = [8, 64], strides = [1, 1]} : vector<8x256xf32> to vector<8x64xf32>
    %647 = arith.negf %646 : vector<8x64xf32>
    %648 = math.exp %647 : vector<8x64xf32>
    %cst_171 = arith.constant 1.000000e+00 : f32
    %649 = vector.broadcast %cst_171 : f32 to vector<8x64xf32>
    %650 = arith.addf %649, %648 : vector<8x64xf32>
    %651 = arith.divf %649, %650 : vector<8x64xf32>
    %652 = vector.extract_strided_slice %645 {offsets = [0, 64], sizes = [8, 64], strides = [1, 1]} : vector<8x256xf32> to vector<8x64xf32>
    %653 = arith.negf %652 : vector<8x64xf32>
    %654 = math.exp %653 : vector<8x64xf32>
    %cst_172 = arith.constant 1.000000e+00 : f32
    %655 = vector.broadcast %cst_172 : f32 to vector<8x64xf32>
    %656 = arith.addf %655, %654 : vector<8x64xf32>
    %657 = arith.divf %655, %656 : vector<8x64xf32>
    %658 = vector.extract_strided_slice %645 {offsets = [0, 128], sizes = [8, 64], strides = [1, 1]} : vector<8x256xf32> to vector<8x64xf32>
    %659 = math.tanh %658 : vector<8x64xf32>
    %660 = vector.extract_strided_slice %645 {offsets = [0, 192], sizes = [8, 64], strides = [1, 1]} : vector<8x256xf32> to vector<8x64xf32>
    %661 = arith.negf %660 : vector<8x64xf32>
    %662 = math.exp %661 : vector<8x64xf32>
    %cst_173 = arith.constant 1.000000e+00 : f32
    %663 = vector.broadcast %cst_173 : f32 to vector<8x64xf32>
    %664 = arith.addf %663, %662 : vector<8x64xf32>
    %665 = arith.divf %663, %664 : vector<8x64xf32>
    %666 = arith.mulf %657, %634 : vector<8x64xf32>
    %667 = arith.mulf %651, %659 : vector<8x64xf32>
    %668 = arith.addf %666, %667 : vector<8x64xf32>
    %669 = math.tanh %668 : vector<8x64xf32>
    %670 = arith.mulf %665, %669 : vector<8x64xf32>
    %c7_i32_174 = arith.constant 7 : i32
    %671 = vector.broadcast %c7_i32_174 : i32 to vector<8x1xi32>
    %672 = arith.cmpi sgt, %0, %671 : vector<8x1xi32>
    %673 = vector.shape_cast %672 : vector<8x1xi1> to vector<8x1xi1>
    %674 = vector.broadcast %673 : vector<8x1xi1> to vector<8x64xi1>
    %675 = arith.select %674, %668, %634 : vector<8x64xi1>, vector<8x64xf32>
    %676 = vector.shape_cast %672 : vector<8x1xi1> to vector<8x1xi1>
    %677 = vector.broadcast %676 : vector<8x1xi1> to vector<8x64xi1>
    %678 = arith.select %677, %670, %637 : vector<8x64xi1>, vector<8x64xf32>
    %cst_175 = arith.constant 0.000000e+00 : f32
    %679 = vector.broadcast %cst_175 : f32 to vector<8x64xf32>
    %680 = vector.shape_cast %672 : vector<8x1xi1> to vector<8x1xi1>
    %681 = vector.broadcast %680 : vector<8x1xi1> to vector<8x64xi1>
    %682 = arith.select %681, %670, %679 : vector<8x64xi1>, vector<8x64xf32>
    %c56_176 = arith.constant 56 : index
    %c0_177 = arith.constant 0 : index
    %683 = vector.load %arg15[%c56_176, %c0_177] : memref<64x64xf32, #tpu.memory_space<vmem>>, vector<8x64xf32>
    tpu.vector_store %arg15[%c56_176, %c0_177], %682 {strides = array<i32>} : memref<64x64xf32, #tpu.memory_space<vmem>>, vector<8x64xf32>,
    %c1 = arith.constant 1 : index
    %c0_178 = arith.constant 0 : index
    %c0_179 = arith.constant 0 : index
    %684 = vector.load %arg12[%c1, %c0_178, %c0_179] : memref<3x8x64xf32, #tpu.memory_space<vmem>>, vector<1x8x64xf32>
    %685 = vector.shape_cast %684 : vector<1x8x64xf32> to vector<8x64xf32>
    %686 = vector.shape_cast %678 : vector<8x64xf32> to vector<1x8x64xf32>
    tpu.vector_store %arg12[%c1, %c0_178, %c0_179], %686 {strides = array<i32>} : memref<3x8x64xf32, #tpu.memory_space<vmem>>, vector<1x8x64xf32>,
    %c1_180 = arith.constant 1 : index
    %c0_181 = arith.constant 0 : index
    %c0_182 = arith.constant 0 : index
    %687 = vector.load %arg13[%c1_180, %c0_181, %c0_182] : memref<3x8x64xf32, #tpu.memory_space<vmem>>, vector<1x8x64xf32>
    %688 = vector.shape_cast %687 : vector<1x8x64xf32> to vector<8x64xf32>
    %689 = vector.shape_cast %675 : vector<8x64xf32> to vector<1x8x64xf32>
    tpu.vector_store %arg13[%c1_180, %c0_181, %c0_182], %689 {strides = array<i32>} : memref<3x8x64xf32, #tpu.memory_space<vmem>>, vector<1x8x64xf32>,
    %c0_183 = arith.constant 0 : index
    %c0_184 = arith.constant 0 : index
    %690 = vector.load %arg15[%c0_183, %c0_184] : memref<64x64xf32, #tpu.memory_space<vmem>>, vector<64x64xf32>
    %c0_185 = arith.constant 0 : index
    %c0_186 = arith.constant 0 : index
    %691 = vector.load %arg8[%c0_185, %c0_186] : memref<64x256xf32, #tpu.memory_space<vmem>>, vector<64x256xf32>
    %cst_187 = arith.constant dense<0.000000e+00> : vector<64x256xf32>
    %692 = tpu.matmul %690, %691, %cst_187 {dimension_numbers = #tpu.dot_dimension_numbers<[1], [0], [0], [1], [0, 0, 1, 1], [], []>} : vector<64x64xf32>, vector<64x256xf32>, vector<64x256xf32> -> vector<64x256xf32>
    %c0_188 = arith.constant 0 : index
    %c0_189 = arith.constant 0 : index
    %693 = vector.load %arg10[%c0_188, %c0_189] : memref<1x256xf32, #tpu.memory_space<vmem>>, vector<1x256xf32>
    %694 = vector.broadcast %693 : vector<1x256xf32> to vector<64x256xf32>
    %695 = arith.addf %692, %694 : vector<64x256xf32>
    %c0_190 = arith.constant 0 : index
    %c0_191 = arith.constant 0 : index
    %696 = vector.load %arg14[%c0_190, %c0_191] : memref<64x256xf32, #tpu.memory_space<vmem>>, vector<64x256xf32>
    tpu.vector_store %arg14[%c0_190, %c0_191], %695 {strides = array<i32>} : memref<64x256xf32, #tpu.memory_space<vmem>>, vector<64x256xf32>,
    %c0_192 = arith.constant 0 : index
    %c0_193 = arith.constant 0 : index
    %697 = vector.load %arg9[%c0_192, %c0_193] : memref<64x256xf32, #tpu.memory_space<vmem>>, vector<64x256xf32>
    %cst_194 = arith.constant 0.000000e+00 : f32
    %698 = vector.broadcast %cst_194 : f32 to vector<8x64xf32>
    %cst_195 = arith.constant 0.000000e+00 : f32
    %699 = vector.broadcast %cst_195 : f32 to vector<8x64xf32>
    %c0_196 = arith.constant 0 : index
    %c0_197 = arith.constant 0 : index
    %700 = vector.load %arg14[%c0_196, %c0_197] : memref<64x256xf32, #tpu.memory_space<vmem>>, vector<8x256xf32>
    %cst_198 = arith.constant dense<0.000000e+00> : vector<8x256xf32>
    %701 = tpu.matmul %698, %697, %cst_198 {dimension_numbers = #tpu.dot_dimension_numbers<[1], [0], [0], [1], [0, 0, 1, 1], [], []>} : vector<8x64xf32>, vector<64x256xf32>, vector<8x256xf32> -> vector<8x256xf32>
    %702 = arith.addf %700, %701 : vector<8x256xf32>
    %703 = vector.extract_strided_slice %702 {offsets = [0, 0], sizes = [8, 64], strides = [1, 1]} : vector<8x256xf32> to vector<8x64xf32>
    %704 = arith.negf %703 : vector<8x64xf32>
    %705 = math.exp %704 : vector<8x64xf32>
    %cst_199 = arith.constant 1.000000e+00 : f32
    %706 = vector.broadcast %cst_199 : f32 to vector<8x64xf32>
    %707 = arith.addf %706, %705 : vector<8x64xf32>
    %708 = arith.divf %706, %707 : vector<8x64xf32>
    %709 = vector.extract_strided_slice %702 {offsets = [0, 64], sizes = [8, 64], strides = [1, 1]} : vector<8x256xf32> to vector<8x64xf32>
    %710 = arith.negf %709 : vector<8x64xf32>
    %711 = math.exp %710 : vector<8x64xf32>
    %cst_200 = arith.constant 1.000000e+00 : f32
    %712 = vector.broadcast %cst_200 : f32 to vector<8x64xf32>
    %713 = arith.addf %712, %711 : vector<8x64xf32>
    %714 = arith.divf %712, %713 : vector<8x64xf32>
    %715 = vector.extract_strided_slice %702 {offsets = [0, 128], sizes = [8, 64], strides = [1, 1]} : vector<8x256xf32> to vector<8x64xf32>
    %716 = math.tanh %715 : vector<8x64xf32>
    %717 = vector.extract_strided_slice %702 {offsets = [0, 192], sizes = [8, 64], strides = [1, 1]} : vector<8x256xf32> to vector<8x64xf32>
    %718 = arith.negf %717 : vector<8x64xf32>
    %719 = math.exp %718 : vector<8x64xf32>
    %cst_201 = arith.constant 1.000000e+00 : f32
    %720 = vector.broadcast %cst_201 : f32 to vector<8x64xf32>
    %721 = arith.addf %720, %719 : vector<8x64xf32>
    %722 = arith.divf %720, %721 : vector<8x64xf32>
    %723 = arith.mulf %714, %699 : vector<8x64xf32>
    %724 = arith.mulf %708, %716 : vector<8x64xf32>
    %725 = arith.addf %723, %724 : vector<8x64xf32>
    %726 = math.tanh %725 : vector<8x64xf32>
    %727 = arith.mulf %722, %726 : vector<8x64xf32>
    %c0_i32_202 = arith.constant 0 : i32
    %728 = vector.broadcast %c0_i32_202 : i32 to vector<8x1xi32>
    %729 = arith.cmpi sgt, %0, %728 : vector<8x1xi32>
    %730 = vector.shape_cast %729 : vector<8x1xi1> to vector<8x1xi1>
    %731 = vector.broadcast %730 : vector<8x1xi1> to vector<8x64xi1>
    %732 = arith.select %731, %725, %699 : vector<8x64xi1>, vector<8x64xf32>
    %733 = vector.shape_cast %729 : vector<8x1xi1> to vector<8x1xi1>
    %734 = vector.broadcast %733 : vector<8x1xi1> to vector<8x64xi1>
    %735 = arith.select %734, %727, %698 : vector<8x64xi1>, vector<8x64xf32>
    %cst_203 = arith.constant 0.000000e+00 : f32
    %736 = vector.broadcast %cst_203 : f32 to vector<8x64xf32>
    %737 = vector.shape_cast %729 : vector<8x1xi1> to vector<8x1xi1>
    %738 = vector.broadcast %737 : vector<8x1xi1> to vector<8x64xi1>
    %739 = arith.select %738, %727, %736 : vector<8x64xi1>, vector<8x64xf32>
    %c0_204 = arith.constant 0 : index
    %c0_205 = arith.constant 0 : index
    %c0_206 = arith.constant 0 : index
    %740 = vector.load %arg11[%c0_204, %c0_205, %c0_206] : memref<8x8x64xf32, #tpu.memory_space<vmem>>, vector<1x8x64xf32>
    %741 = vector.shape_cast %740 : vector<1x8x64xf32> to vector<8x64xf32>
    %742 = vector.shape_cast %739 : vector<8x64xf32> to vector<1x8x64xf32>
    tpu.vector_store %arg11[%c0_204, %c0_205, %c0_206], %742 {strides = array<i32>} : memref<8x8x64xf32, #tpu.memory_space<vmem>>, vector<1x8x64xf32>,
    %c8_207 = arith.constant 8 : index
    %c0_208 = arith.constant 0 : index
    %743 = vector.load %arg14[%c8_207, %c0_208] : memref<64x256xf32, #tpu.memory_space<vmem>>, vector<8x256xf32>
    %cst_209 = arith.constant dense<0.000000e+00> : vector<8x256xf32>
    %744 = tpu.matmul %735, %697, %cst_209 {dimension_numbers = #tpu.dot_dimension_numbers<[1], [0], [0], [1], [0, 0, 1, 1], [], []>} : vector<8x64xf32>, vector<64x256xf32>, vector<8x256xf32> -> vector<8x256xf32>
    %745 = arith.addf %743, %744 : vector<8x256xf32>
    %746 = vector.extract_strided_slice %745 {offsets = [0, 0], sizes = [8, 64], strides = [1, 1]} : vector<8x256xf32> to vector<8x64xf32>
    %747 = arith.negf %746 : vector<8x64xf32>
    %748 = math.exp %747 : vector<8x64xf32>
    %cst_210 = arith.constant 1.000000e+00 : f32
    %749 = vector.broadcast %cst_210 : f32 to vector<8x64xf32>
    %750 = arith.addf %749, %748 : vector<8x64xf32>
    %751 = arith.divf %749, %750 : vector<8x64xf32>
    %752 = vector.extract_strided_slice %745 {offsets = [0, 64], sizes = [8, 64], strides = [1, 1]} : vector<8x256xf32> to vector<8x64xf32>
    %753 = arith.negf %752 : vector<8x64xf32>
    %754 = math.exp %753 : vector<8x64xf32>
    %cst_211 = arith.constant 1.000000e+00 : f32
    %755 = vector.broadcast %cst_211 : f32 to vector<8x64xf32>
    %756 = arith.addf %755, %754 : vector<8x64xf32>
    %757 = arith.divf %755, %756 : vector<8x64xf32>
    %758 = vector.extract_strided_slice %745 {offsets = [0, 128], sizes = [8, 64], strides = [1, 1]} : vector<8x256xf32> to vector<8x64xf32>
    %759 = math.tanh %758 : vector<8x64xf32>
    %760 = vector.extract_strided_slice %745 {offsets = [0, 192], sizes = [8, 64], strides = [1, 1]} : vector<8x256xf32> to vector<8x64xf32>
    %761 = arith.negf %760 : vector<8x64xf32>
    %762 = math.exp %761 : vector<8x64xf32>
    %cst_212 = arith.constant 1.000000e+00 : f32
    %763 = vector.broadcast %cst_212 : f32 to vector<8x64xf32>
    %764 = arith.addf %763, %762 : vector<8x64xf32>
    %765 = arith.divf %763, %764 : vector<8x64xf32>
    %766 = arith.mulf %757, %732 : vector<8x64xf32>
    %767 = arith.mulf %751, %759 : vector<8x64xf32>
    %768 = arith.addf %766, %767 : vector<8x64xf32>
    %769 = math.tanh %768 : vector<8x64xf32>
    %770 = arith.mulf %765, %769 : vector<8x64xf32>
    %c1_i32_213 = arith.constant 1 : i32
    %771 = vector.broadcast %c1_i32_213 : i32 to vector<8x1xi32>
    %772 = arith.cmpi sgt, %0, %771 : vector<8x1xi32>
    %773 = vector.shape_cast %772 : vector<8x1xi1> to vector<8x1xi1>
    %774 = vector.broadcast %773 : vector<8x1xi1> to vector<8x64xi1>
    %775 = arith.select %774, %768, %732 : vector<8x64xi1>, vector<8x64xf32>
    %776 = vector.shape_cast %772 : vector<8x1xi1> to vector<8x1xi1>
    %777 = vector.broadcast %776 : vector<8x1xi1> to vector<8x64xi1>
    %778 = arith.select %777, %770, %735 : vector<8x64xi1>, vector<8x64xf32>
    %cst_214 = arith.constant 0.000000e+00 : f32
    %779 = vector.broadcast %cst_214 : f32 to vector<8x64xf32>
    %780 = vector.shape_cast %772 : vector<8x1xi1> to vector<8x1xi1>
    %781 = vector.broadcast %780 : vector<8x1xi1> to vector<8x64xi1>
    %782 = arith.select %781, %770, %779 : vector<8x64xi1>, vector<8x64xf32>
    %c1_215 = arith.constant 1 : index
    %c0_216 = arith.constant 0 : index
    %c0_217 = arith.constant 0 : index
    %783 = vector.load %arg11[%c1_215, %c0_216, %c0_217] : memref<8x8x64xf32, #tpu.memory_space<vmem>>, vector<1x8x64xf32>
    %784 = vector.shape_cast %783 : vector<1x8x64xf32> to vector<8x64xf32>
    %785 = vector.shape_cast %782 : vector<8x64xf32> to vector<1x8x64xf32>
    tpu.vector_store %arg11[%c1_215, %c0_216, %c0_217], %785 {strides = array<i32>} : memref<8x8x64xf32, #tpu.memory_space<vmem>>, vector<1x8x64xf32>,
    %c16_218 = arith.constant 16 : index
    %c0_219 = arith.constant 0 : index
    %786 = vector.load %arg14[%c16_218, %c0_219] : memref<64x256xf32, #tpu.memory_space<vmem>>, vector<8x256xf32>
    %cst_220 = arith.constant dense<0.000000e+00> : vector<8x256xf32>
    %787 = tpu.matmul %778, %697, %cst_220 {dimension_numbers = #tpu.dot_dimension_numbers<[1], [0], [0], [1], [0, 0, 1, 1], [], []>} : vector<8x64xf32>, vector<64x256xf32>, vector<8x256xf32> -> vector<8x256xf32>
    %788 = arith.addf %786, %787 : vector<8x256xf32>
    %789 = vector.extract_strided_slice %788 {offsets = [0, 0], sizes = [8, 64], strides = [1, 1]} : vector<8x256xf32> to vector<8x64xf32>
    %790 = arith.negf %789 : vector<8x64xf32>
    %791 = math.exp %790 : vector<8x64xf32>
    %cst_221 = arith.constant 1.000000e+00 : f32
    %792 = vector.broadcast %cst_221 : f32 to vector<8x64xf32>
    %793 = arith.addf %792, %791 : vector<8x64xf32>
    %794 = arith.divf %792, %793 : vector<8x64xf32>
    %795 = vector.extract_strided_slice %788 {offsets = [0, 64], sizes = [8, 64], strides = [1, 1]} : vector<8x256xf32> to vector<8x64xf32>
    %796 = arith.negf %795 : vector<8x64xf32>
    %797 = math.exp %796 : vector<8x64xf32>
    %cst_222 = arith.constant 1.000000e+00 : f32
    %798 = vector.broadcast %cst_222 : f32 to vector<8x64xf32>
    %799 = arith.addf %798, %797 : vector<8x64xf32>
    %800 = arith.divf %798, %799 : vector<8x64xf32>
    %801 = vector.extract_strided_slice %788 {offsets = [0, 128], sizes = [8, 64], strides = [1, 1]} : vector<8x256xf32> to vector<8x64xf32>
    %802 = math.tanh %801 : vector<8x64xf32>
    %803 = vector.extract_strided_slice %788 {offsets = [0, 192], sizes = [8, 64], strides = [1, 1]} : vector<8x256xf32> to vector<8x64xf32>
    %804 = arith.negf %803 : vector<8x64xf32>
    %805 = math.exp %804 : vector<8x64xf32>
    %cst_223 = arith.constant 1.000000e+00 : f32
    %806 = vector.broadcast %cst_223 : f32 to vector<8x64xf32>
    %807 = arith.addf %806, %805 : vector<8x64xf32>
    %808 = arith.divf %806, %807 : vector<8x64xf32>
    %809 = arith.mulf %800, %775 : vector<8x64xf32>
    %810 = arith.mulf %794, %802 : vector<8x64xf32>
    %811 = arith.addf %809, %810 : vector<8x64xf32>
    %812 = math.tanh %811 : vector<8x64xf32>
    %813 = arith.mulf %808, %812 : vector<8x64xf32>
    %c2_i32_224 = arith.constant 2 : i32
    %814 = vector.broadcast %c2_i32_224 : i32 to vector<8x1xi32>
    %815 = arith.cmpi sgt, %0, %814 : vector<8x1xi32>
    %816 = vector.shape_cast %815 : vector<8x1xi1> to vector<8x1xi1>
    %817 = vector.broadcast %816 : vector<8x1xi1> to vector<8x64xi1>
    %818 = arith.select %817, %811, %775 : vector<8x64xi1>, vector<8x64xf32>
    %819 = vector.shape_cast %815 : vector<8x1xi1> to vector<8x1xi1>
    %820 = vector.broadcast %819 : vector<8x1xi1> to vector<8x64xi1>
    %821 = arith.select %820, %813, %778 : vector<8x64xi1>, vector<8x64xf32>
    %cst_225 = arith.constant 0.000000e+00 : f32
    %822 = vector.broadcast %cst_225 : f32 to vector<8x64xf32>
    %823 = vector.shape_cast %815 : vector<8x1xi1> to vector<8x1xi1>
    %824 = vector.broadcast %823 : vector<8x1xi1> to vector<8x64xi1>
    %825 = arith.select %824, %813, %822 : vector<8x64xi1>, vector<8x64xf32>
    %c2 = arith.constant 2 : index
    %c0_226 = arith.constant 0 : index
    %c0_227 = arith.constant 0 : index
    %826 = vector.load %arg11[%c2, %c0_226, %c0_227] : memref<8x8x64xf32, #tpu.memory_space<vmem>>, vector<1x8x64xf32>
    %827 = vector.shape_cast %826 : vector<1x8x64xf32> to vector<8x64xf32>
    %828 = vector.shape_cast %825 : vector<8x64xf32> to vector<1x8x64xf32>
    tpu.vector_store %arg11[%c2, %c0_226, %c0_227], %828 {strides = array<i32>} : memref<8x8x64xf32, #tpu.memory_space<vmem>>, vector<1x8x64xf32>,
    %c24_228 = arith.constant 24 : index
    %c0_229 = arith.constant 0 : index
    %829 = vector.load %arg14[%c24_228, %c0_229] : memref<64x256xf32, #tpu.memory_space<vmem>>, vector<8x256xf32>
    %cst_230 = arith.constant dense<0.000000e+00> : vector<8x256xf32>
    %830 = tpu.matmul %821, %697, %cst_230 {dimension_numbers = #tpu.dot_dimension_numbers<[1], [0], [0], [1], [0, 0, 1, 1], [], []>} : vector<8x64xf32>, vector<64x256xf32>, vector<8x256xf32> -> vector<8x256xf32>
    %831 = arith.addf %829, %830 : vector<8x256xf32>
    %832 = vector.extract_strided_slice %831 {offsets = [0, 0], sizes = [8, 64], strides = [1, 1]} : vector<8x256xf32> to vector<8x64xf32>
    %833 = arith.negf %832 : vector<8x64xf32>
    %834 = math.exp %833 : vector<8x64xf32>
    %cst_231 = arith.constant 1.000000e+00 : f32
    %835 = vector.broadcast %cst_231 : f32 to vector<8x64xf32>
    %836 = arith.addf %835, %834 : vector<8x64xf32>
    %837 = arith.divf %835, %836 : vector<8x64xf32>
    %838 = vector.extract_strided_slice %831 {offsets = [0, 64], sizes = [8, 64], strides = [1, 1]} : vector<8x256xf32> to vector<8x64xf32>
    %839 = arith.negf %838 : vector<8x64xf32>
    %840 = math.exp %839 : vector<8x64xf32>
    %cst_232 = arith.constant 1.000000e+00 : f32
    %841 = vector.broadcast %cst_232 : f32 to vector<8x64xf32>
    %842 = arith.addf %841, %840 : vector<8x64xf32>
    %843 = arith.divf %841, %842 : vector<8x64xf32>
    %844 = vector.extract_strided_slice %831 {offsets = [0, 128], sizes = [8, 64], strides = [1, 1]} : vector<8x256xf32> to vector<8x64xf32>
    %845 = math.tanh %844 : vector<8x64xf32>
    %846 = vector.extract_strided_slice %831 {offsets = [0, 192], sizes = [8, 64], strides = [1, 1]} : vector<8x256xf32> to vector<8x64xf32>
    %847 = arith.negf %846 : vector<8x64xf32>
    %848 = math.exp %847 : vector<8x64xf32>
    %cst_233 = arith.constant 1.000000e+00 : f32
    %849 = vector.broadcast %cst_233 : f32 to vector<8x64xf32>
    %850 = arith.addf %849, %848 : vector<8x64xf32>
    %851 = arith.divf %849, %850 : vector<8x64xf32>
    %852 = arith.mulf %843, %818 : vector<8x64xf32>
    %853 = arith.mulf %837, %845 : vector<8x64xf32>
    %854 = arith.addf %852, %853 : vector<8x64xf32>
    %855 = math.tanh %854 : vector<8x64xf32>
    %856 = arith.mulf %851, %855 : vector<8x64xf32>
    %c3_i32_234 = arith.constant 3 : i32
    %857 = vector.broadcast %c3_i32_234 : i32 to vector<8x1xi32>
    %858 = arith.cmpi sgt, %0, %857 : vector<8x1xi32>
    %859 = vector.shape_cast %858 : vector<8x1xi1> to vector<8x1xi1>
    %860 = vector.broadcast %859 : vector<8x1xi1> to vector<8x64xi1>
    %861 = arith.select %860, %854, %818 : vector<8x64xi1>, vector<8x64xf32>
    %862 = vector.shape_cast %858 : vector<8x1xi1> to vector<8x1xi1>
    %863 = vector.broadcast %862 : vector<8x1xi1> to vector<8x64xi1>
    %864 = arith.select %863, %856, %821 : vector<8x64xi1>, vector<8x64xf32>
    %cst_235 = arith.constant 0.000000e+00 : f32
    %865 = vector.broadcast %cst_235 : f32 to vector<8x64xf32>
    %866 = vector.shape_cast %858 : vector<8x1xi1> to vector<8x1xi1>
    %867 = vector.broadcast %866 : vector<8x1xi1> to vector<8x64xi1>
    %868 = arith.select %867, %856, %865 : vector<8x64xi1>, vector<8x64xf32>
    %c3 = arith.constant 3 : index
    %c0_236 = arith.constant 0 : index
    %c0_237 = arith.constant 0 : index
    %869 = vector.load %arg11[%c3, %c0_236, %c0_237] : memref<8x8x64xf32, #tpu.memory_space<vmem>>, vector<1x8x64xf32>
    %870 = vector.shape_cast %869 : vector<1x8x64xf32> to vector<8x64xf32>
    %871 = vector.shape_cast %868 : vector<8x64xf32> to vector<1x8x64xf32>
    tpu.vector_store %arg11[%c3, %c0_236, %c0_237], %871 {strides = array<i32>} : memref<8x8x64xf32, #tpu.memory_space<vmem>>, vector<1x8x64xf32>,
    %c32_238 = arith.constant 32 : index
    %c0_239 = arith.constant 0 : index
    %872 = vector.load %arg14[%c32_238, %c0_239] : memref<64x256xf32, #tpu.memory_space<vmem>>, vector<8x256xf32>
    %cst_240 = arith.constant dense<0.000000e+00> : vector<8x256xf32>
    %873 = tpu.matmul %864, %697, %cst_240 {dimension_numbers = #tpu.dot_dimension_numbers<[1], [0], [0], [1], [0, 0, 1, 1], [], []>} : vector<8x64xf32>, vector<64x256xf32>, vector<8x256xf32> -> vector<8x256xf32>
    %874 = arith.addf %872, %873 : vector<8x256xf32>
    %875 = vector.extract_strided_slice %874 {offsets = [0, 0], sizes = [8, 64], strides = [1, 1]} : vector<8x256xf32> to vector<8x64xf32>
    %876 = arith.negf %875 : vector<8x64xf32>
    %877 = math.exp %876 : vector<8x64xf32>
    %cst_241 = arith.constant 1.000000e+00 : f32
    %878 = vector.broadcast %cst_241 : f32 to vector<8x64xf32>
    %879 = arith.addf %878, %877 : vector<8x64xf32>
    %880 = arith.divf %878, %879 : vector<8x64xf32>
    %881 = vector.extract_strided_slice %874 {offsets = [0, 64], sizes = [8, 64], strides = [1, 1]} : vector<8x256xf32> to vector<8x64xf32>
    %882 = arith.negf %881 : vector<8x64xf32>
    %883 = math.exp %882 : vector<8x64xf32>
    %cst_242 = arith.constant 1.000000e+00 : f32
    %884 = vector.broadcast %cst_242 : f32 to vector<8x64xf32>
    %885 = arith.addf %884, %883 : vector<8x64xf32>
    %886 = arith.divf %884, %885 : vector<8x64xf32>
    %887 = vector.extract_strided_slice %874 {offsets = [0, 128], sizes = [8, 64], strides = [1, 1]} : vector<8x256xf32> to vector<8x64xf32>
    %888 = math.tanh %887 : vector<8x64xf32>
    %889 = vector.extract_strided_slice %874 {offsets = [0, 192], sizes = [8, 64], strides = [1, 1]} : vector<8x256xf32> to vector<8x64xf32>
    %890 = arith.negf %889 : vector<8x64xf32>
    %891 = math.exp %890 : vector<8x64xf32>
    %cst_243 = arith.constant 1.000000e+00 : f32
    %892 = vector.broadcast %cst_243 : f32 to vector<8x64xf32>
    %893 = arith.addf %892, %891 : vector<8x64xf32>
    %894 = arith.divf %892, %893 : vector<8x64xf32>
    %895 = arith.mulf %886, %861 : vector<8x64xf32>
    %896 = arith.mulf %880, %888 : vector<8x64xf32>
    %897 = arith.addf %895, %896 : vector<8x64xf32>
    %898 = math.tanh %897 : vector<8x64xf32>
    %899 = arith.mulf %894, %898 : vector<8x64xf32>
    %c4_i32_244 = arith.constant 4 : i32
    %900 = vector.broadcast %c4_i32_244 : i32 to vector<8x1xi32>
    %901 = arith.cmpi sgt, %0, %900 : vector<8x1xi32>
    %902 = vector.shape_cast %901 : vector<8x1xi1> to vector<8x1xi1>
    %903 = vector.broadcast %902 : vector<8x1xi1> to vector<8x64xi1>
    %904 = arith.select %903, %897, %861 : vector<8x64xi1>, vector<8x64xf32>
    %905 = vector.shape_cast %901 : vector<8x1xi1> to vector<8x1xi1>
    %906 = vector.broadcast %905 : vector<8x1xi1> to vector<8x64xi1>
    %907 = arith.select %906, %899, %864 : vector<8x64xi1>, vector<8x64xf32>
    %cst_245 = arith.constant 0.000000e+00 : f32
    %908 = vector.broadcast %cst_245 : f32 to vector<8x64xf32>
    %909 = vector.shape_cast %901 : vector<8x1xi1> to vector<8x1xi1>
    %910 = vector.broadcast %909 : vector<8x1xi1> to vector<8x64xi1>
    %911 = arith.select %910, %899, %908 : vector<8x64xi1>, vector<8x64xf32>
    %c4 = arith.constant 4 : index
    %c0_246 = arith.constant 0 : index
    %c0_247 = arith.constant 0 : index
    %912 = vector.load %arg11[%c4, %c0_246, %c0_247] : memref<8x8x64xf32, #tpu.memory_space<vmem>>, vector<1x8x64xf32>
    %913 = vector.shape_cast %912 : vector<1x8x64xf32> to vector<8x64xf32>
    %914 = vector.shape_cast %911 : vector<8x64xf32> to vector<1x8x64xf32>
    tpu.vector_store %arg11[%c4, %c0_246, %c0_247], %914 {strides = array<i32>} : memref<8x8x64xf32, #tpu.memory_space<vmem>>, vector<1x8x64xf32>,
    %c40_248 = arith.constant 40 : index
    %c0_249 = arith.constant 0 : index
    %915 = vector.load %arg14[%c40_248, %c0_249] : memref<64x256xf32, #tpu.memory_space<vmem>>, vector<8x256xf32>
    %cst_250 = arith.constant dense<0.000000e+00> : vector<8x256xf32>
    %916 = tpu.matmul %907, %697, %cst_250 {dimension_numbers = #tpu.dot_dimension_numbers<[1], [0], [0], [1], [0, 0, 1, 1], [], []>} : vector<8x64xf32>, vector<64x256xf32>, vector<8x256xf32> -> vector<8x256xf32>
    %917 = arith.addf %915, %916 : vector<8x256xf32>
    %918 = vector.extract_strided_slice %917 {offsets = [0, 0], sizes = [8, 64], strides = [1, 1]} : vector<8x256xf32> to vector<8x64xf32>
    %919 = arith.negf %918 : vector<8x64xf32>
    %920 = math.exp %919 : vector<8x64xf32>
    %cst_251 = arith.constant 1.000000e+00 : f32
    %921 = vector.broadcast %cst_251 : f32 to vector<8x64xf32>
    %922 = arith.addf %921, %920 : vector<8x64xf32>
    %923 = arith.divf %921, %922 : vector<8x64xf32>
    %924 = vector.extract_strided_slice %917 {offsets = [0, 64], sizes = [8, 64], strides = [1, 1]} : vector<8x256xf32> to vector<8x64xf32>
    %925 = arith.negf %924 : vector<8x64xf32>
    %926 = math.exp %925 : vector<8x64xf32>
    %cst_252 = arith.constant 1.000000e+00 : f32
    %927 = vector.broadcast %cst_252 : f32 to vector<8x64xf32>
    %928 = arith.addf %927, %926 : vector<8x64xf32>
    %929 = arith.divf %927, %928 : vector<8x64xf32>
    %930 = vector.extract_strided_slice %917 {offsets = [0, 128], sizes = [8, 64], strides = [1, 1]} : vector<8x256xf32> to vector<8x64xf32>
    %931 = math.tanh %930 : vector<8x64xf32>
    %932 = vector.extract_strided_slice %917 {offsets = [0, 192], sizes = [8, 64], strides = [1, 1]} : vector<8x256xf32> to vector<8x64xf32>
    %933 = arith.negf %932 : vector<8x64xf32>
    %934 = math.exp %933 : vector<8x64xf32>
    %cst_253 = arith.constant 1.000000e+00 : f32
    %935 = vector.broadcast %cst_253 : f32 to vector<8x64xf32>
    %936 = arith.addf %935, %934 : vector<8x64xf32>
    %937 = arith.divf %935, %936 : vector<8x64xf32>
    %938 = arith.mulf %929, %904 : vector<8x64xf32>
    %939 = arith.mulf %923, %931 : vector<8x64xf32>
    %940 = arith.addf %938, %939 : vector<8x64xf32>
    %941 = math.tanh %940 : vector<8x64xf32>
    %942 = arith.mulf %937, %941 : vector<8x64xf32>
    %c5_i32_254 = arith.constant 5 : i32
    %943 = vector.broadcast %c5_i32_254 : i32 to vector<8x1xi32>
    %944 = arith.cmpi sgt, %0, %943 : vector<8x1xi32>
    %945 = vector.shape_cast %944 : vector<8x1xi1> to vector<8x1xi1>
    %946 = vector.broadcast %945 : vector<8x1xi1> to vector<8x64xi1>
    %947 = arith.select %946, %940, %904 : vector<8x64xi1>, vector<8x64xf32>
    %948 = vector.shape_cast %944 : vector<8x1xi1> to vector<8x1xi1>
    %949 = vector.broadcast %948 : vector<8x1xi1> to vector<8x64xi1>
    %950 = arith.select %949, %942, %907 : vector<8x64xi1>, vector<8x64xf32>
    %cst_255 = arith.constant 0.000000e+00 : f32
    %951 = vector.broadcast %cst_255 : f32 to vector<8x64xf32>
    %952 = vector.shape_cast %944 : vector<8x1xi1> to vector<8x1xi1>
    %953 = vector.broadcast %952 : vector<8x1xi1> to vector<8x64xi1>
    %954 = arith.select %953, %942, %951 : vector<8x64xi1>, vector<8x64xf32>
    %c5 = arith.constant 5 : index
    %c0_256 = arith.constant 0 : index
    %c0_257 = arith.constant 0 : index
    %955 = vector.load %arg11[%c5, %c0_256, %c0_257] : memref<8x8x64xf32, #tpu.memory_space<vmem>>, vector<1x8x64xf32>
    %956 = vector.shape_cast %955 : vector<1x8x64xf32> to vector<8x64xf32>
    %957 = vector.shape_cast %954 : vector<8x64xf32> to vector<1x8x64xf32>
    tpu.vector_store %arg11[%c5, %c0_256, %c0_257], %957 {strides = array<i32>} : memref<8x8x64xf32, #tpu.memory_space<vmem>>, vector<1x8x64xf32>,
    %c48_258 = arith.constant 48 : index
    %c0_259 = arith.constant 0 : index
    %958 = vector.load %arg14[%c48_258, %c0_259] : memref<64x256xf32, #tpu.memory_space<vmem>>, vector<8x256xf32>
    %cst_260 = arith.constant dense<0.000000e+00> : vector<8x256xf32>
    %959 = tpu.matmul %950, %697, %cst_260 {dimension_numbers = #tpu.dot_dimension_numbers<[1], [0], [0], [1], [0, 0, 1, 1], [], []>} : vector<8x64xf32>, vector<64x256xf32>, vector<8x256xf32> -> vector<8x256xf32>
    %960 = arith.addf %958, %959 : vector<8x256xf32>
    %961 = vector.extract_strided_slice %960 {offsets = [0, 0], sizes = [8, 64], strides = [1, 1]} : vector<8x256xf32> to vector<8x64xf32>
    %962 = arith.negf %961 : vector<8x64xf32>
    %963 = math.exp %962 : vector<8x64xf32>
    %cst_261 = arith.constant 1.000000e+00 : f32
    %964 = vector.broadcast %cst_261 : f32 to vector<8x64xf32>
    %965 = arith.addf %964, %963 : vector<8x64xf32>
    %966 = arith.divf %964, %965 : vector<8x64xf32>
    %967 = vector.extract_strided_slice %960 {offsets = [0, 64], sizes = [8, 64], strides = [1, 1]} : vector<8x256xf32> to vector<8x64xf32>
    %968 = arith.negf %967 : vector<8x64xf32>
    %969 = math.exp %968 : vector<8x64xf32>
    %cst_262 = arith.constant 1.000000e+00 : f32
    %970 = vector.broadcast %cst_262 : f32 to vector<8x64xf32>
    %971 = arith.addf %970, %969 : vector<8x64xf32>
    %972 = arith.divf %970, %971 : vector<8x64xf32>
    %973 = vector.extract_strided_slice %960 {offsets = [0, 128], sizes = [8, 64], strides = [1, 1]} : vector<8x256xf32> to vector<8x64xf32>
    %974 = math.tanh %973 : vector<8x64xf32>
    %975 = vector.extract_strided_slice %960 {offsets = [0, 192], sizes = [8, 64], strides = [1, 1]} : vector<8x256xf32> to vector<8x64xf32>
    %976 = arith.negf %975 : vector<8x64xf32>
    %977 = math.exp %976 : vector<8x64xf32>
    %cst_263 = arith.constant 1.000000e+00 : f32
    %978 = vector.broadcast %cst_263 : f32 to vector<8x64xf32>
    %979 = arith.addf %978, %977 : vector<8x64xf32>
    %980 = arith.divf %978, %979 : vector<8x64xf32>
    %981 = arith.mulf %972, %947 : vector<8x64xf32>
    %982 = arith.mulf %966, %974 : vector<8x64xf32>
    %983 = arith.addf %981, %982 : vector<8x64xf32>
    %984 = math.tanh %983 : vector<8x64xf32>
    %985 = arith.mulf %980, %984 : vector<8x64xf32>
    %c6_i32_264 = arith.constant 6 : i32
    %986 = vector.broadcast %c6_i32_264 : i32 to vector<8x1xi32>
    %987 = arith.cmpi sgt, %0, %986 : vector<8x1xi32>
    %988 = vector.shape_cast %987 : vector<8x1xi1> to vector<8x1xi1>
    %989 = vector.broadcast %988 : vector<8x1xi1> to vector<8x64xi1>
    %990 = arith.select %989, %983, %947 : vector<8x64xi1>, vector<8x64xf32>
    %991 = vector.shape_cast %987 : vector<8x1xi1> to vector<8x1xi1>
    %992 = vector.broadcast %991 : vector<8x1xi1> to vector<8x64xi1>
    %993 = arith.select %992, %985, %950 : vector<8x64xi1>, vector<8x64xf32>
    %cst_265 = arith.constant 0.000000e+00 : f32
    %994 = vector.broadcast %cst_265 : f32 to vector<8x64xf32>
    %995 = vector.shape_cast %987 : vector<8x1xi1> to vector<8x1xi1>
    %996 = vector.broadcast %995 : vector<8x1xi1> to vector<8x64xi1>
    %997 = arith.select %996, %985, %994 : vector<8x64xi1>, vector<8x64xf32>
    %c6 = arith.constant 6 : index
    %c0_266 = arith.constant 0 : index
    %c0_267 = arith.constant 0 : index
    %998 = vector.load %arg11[%c6, %c0_266, %c0_267] : memref<8x8x64xf32, #tpu.memory_space<vmem>>, vector<1x8x64xf32>
    %999 = vector.shape_cast %998 : vector<1x8x64xf32> to vector<8x64xf32>
    %1000 = vector.shape_cast %997 : vector<8x64xf32> to vector<1x8x64xf32>
    tpu.vector_store %arg11[%c6, %c0_266, %c0_267], %1000 {strides = array<i32>} : memref<8x8x64xf32, #tpu.memory_space<vmem>>, vector<1x8x64xf32>,
    %c56_268 = arith.constant 56 : index
    %c0_269 = arith.constant 0 : index
    %1001 = vector.load %arg14[%c56_268, %c0_269] : memref<64x256xf32, #tpu.memory_space<vmem>>, vector<8x256xf32>
    %cst_270 = arith.constant dense<0.000000e+00> : vector<8x256xf32>
    %1002 = tpu.matmul %993, %697, %cst_270 {dimension_numbers = #tpu.dot_dimension_numbers<[1], [0], [0], [1], [0, 0, 1, 1], [], []>} : vector<8x64xf32>, vector<64x256xf32>, vector<8x256xf32> -> vector<8x256xf32>
    %1003 = arith.addf %1001, %1002 : vector<8x256xf32>
    %1004 = vector.extract_strided_slice %1003 {offsets = [0, 0], sizes = [8, 64], strides = [1, 1]} : vector<8x256xf32> to vector<8x64xf32>
    %1005 = arith.negf %1004 : vector<8x64xf32>
    %1006 = math.exp %1005 : vector<8x64xf32>
    %cst_271 = arith.constant 1.000000e+00 : f32
    %1007 = vector.broadcast %cst_271 : f32 to vector<8x64xf32>
    %1008 = arith.addf %1007, %1006 : vector<8x64xf32>
    %1009 = arith.divf %1007, %1008 : vector<8x64xf32>
    %1010 = vector.extract_strided_slice %1003 {offsets = [0, 64], sizes = [8, 64], strides = [1, 1]} : vector<8x256xf32> to vector<8x64xf32>
    %1011 = arith.negf %1010 : vector<8x64xf32>
    %1012 = math.exp %1011 : vector<8x64xf32>
    %cst_272 = arith.constant 1.000000e+00 : f32
    %1013 = vector.broadcast %cst_272 : f32 to vector<8x64xf32>
    %1014 = arith.addf %1013, %1012 : vector<8x64xf32>
    %1015 = arith.divf %1013, %1014 : vector<8x64xf32>
    %1016 = vector.extract_strided_slice %1003 {offsets = [0, 128], sizes = [8, 64], strides = [1, 1]} : vector<8x256xf32> to vector<8x64xf32>
    %1017 = math.tanh %1016 : vector<8x64xf32>
    %1018 = vector.extract_strided_slice %1003 {offsets = [0, 192], sizes = [8, 64], strides = [1, 1]} : vector<8x256xf32> to vector<8x64xf32>
    %1019 = arith.negf %1018 : vector<8x64xf32>
    %1020 = math.exp %1019 : vector<8x64xf32>
    %cst_273 = arith.constant 1.000000e+00 : f32
    %1021 = vector.broadcast %cst_273 : f32 to vector<8x64xf32>
    %1022 = arith.addf %1021, %1020 : vector<8x64xf32>
    %1023 = arith.divf %1021, %1022 : vector<8x64xf32>
    %1024 = arith.mulf %1015, %990 : vector<8x64xf32>
    %1025 = arith.mulf %1009, %1017 : vector<8x64xf32>
    %1026 = arith.addf %1024, %1025 : vector<8x64xf32>
    %1027 = math.tanh %1026 : vector<8x64xf32>
    %1028 = arith.mulf %1023, %1027 : vector<8x64xf32>
    %c7_i32_274 = arith.constant 7 : i32
    %1029 = vector.broadcast %c7_i32_274 : i32 to vector<8x1xi32>
    %1030 = arith.cmpi sgt, %0, %1029 : vector<8x1xi32>
    %1031 = vector.shape_cast %1030 : vector<8x1xi1> to vector<8x1xi1>
    %1032 = vector.broadcast %1031 : vector<8x1xi1> to vector<8x64xi1>
    %1033 = arith.select %1032, %1026, %990 : vector<8x64xi1>, vector<8x64xf32>
    %1034 = vector.shape_cast %1030 : vector<8x1xi1> to vector<8x1xi1>
    %1035 = vector.broadcast %1034 : vector<8x1xi1> to vector<8x64xi1>
    %1036 = arith.select %1035, %1028, %993 : vector<8x64xi1>, vector<8x64xf32>
    %cst_275 = arith.constant 0.000000e+00 : f32
    %1037 = vector.broadcast %cst_275 : f32 to vector<8x64xf32>
    %1038 = vector.shape_cast %1030 : vector<8x1xi1> to vector<8x1xi1>
    %1039 = vector.broadcast %1038 : vector<8x1xi1> to vector<8x64xi1>
    %1040 = arith.select %1039, %1028, %1037 : vector<8x64xi1>, vector<8x64xf32>
    %c7 = arith.constant 7 : index
    %c0_276 = arith.constant 0 : index
    %c0_277 = arith.constant 0 : index
    %1041 = vector.load %arg11[%c7, %c0_276, %c0_277] : memref<8x8x64xf32, #tpu.memory_space<vmem>>, vector<1x8x64xf32>
    %1042 = vector.shape_cast %1041 : vector<1x8x64xf32> to vector<8x64xf32>
    %1043 = vector.shape_cast %1040 : vector<8x64xf32> to vector<1x8x64xf32>
    tpu.vector_store %arg11[%c7, %c0_276, %c0_277], %1043 {strides = array<i32>} : memref<8x8x64xf32, #tpu.memory_space<vmem>>, vector<1x8x64xf32>,
    %c2_278 = arith.constant 2 : index
    %c0_279 = arith.constant 0 : index
    %c0_280 = arith.constant 0 : index
    %1044 = vector.load %arg12[%c2_278, %c0_279, %c0_280] : memref<3x8x64xf32, #tpu.memory_space<vmem>>, vector<1x8x64xf32>
    %1045 = vector.shape_cast %1044 : vector<1x8x64xf32> to vector<8x64xf32>
    %1046 = vector.shape_cast %1036 : vector<8x64xf32> to vector<1x8x64xf32>
    tpu.vector_store %arg12[%c2_278, %c0_279, %c0_280], %1046 {strides = array<i32>} : memref<3x8x64xf32, #tpu.memory_space<vmem>>, vector<1x8x64xf32>,
    %c2_281 = arith.constant 2 : index
    %c0_282 = arith.constant 0 : index
    %c0_283 = arith.constant 0 : index
    %1047 = vector.load %arg13[%c2_281, %c0_282, %c0_283] : memref<3x8x64xf32, #tpu.memory_space<vmem>>, vector<1x8x64xf32>
    %1048 = vector.shape_cast %1047 : vector<1x8x64xf32> to vector<8x64xf32>
    %1049 = vector.shape_cast %1033 : vector<8x64xf32> to vector<1x8x64xf32>
    tpu.vector_store %arg13[%c2_281, %c0_282, %c0_283], %1049 {strides = array<i32>} : memref<3x8x64xf32, #tpu.memory_space<vmem>>, vector<1x8x64xf32>,
    return
  }
}

</mosaic_0001>

<bundles_post_ra>
// kernel: encoder_apply.1
= control target key start
LH: loop header
LB: loop body
LE: loop exit
PB: predicated region body
PF: predicated region fallthrough
CT: control target
= control target key end

     0   :  { %19 = vsyncpa [#allocation5], 0  ;;  %s5498_s0 = inlined_call_operand.vmem [shape: s32[8,1], index: 0, kind: input, shape index: {}]   ;;  %s5499_s1 = inlined_call_operand.vmem [shape: f32[8,8,64], index: 1, kind: input, shape index: {}]   ;;  %s5500_s2 = inlined_call_operand.vmem [shape: f32[64,256], index: 2, kind: input, shape index: {}]   ;;  %s5501_s3 = inlined_call_operand.vmem [shape: f32[64,256], index: 3, kind: input, shape index: {}]   ;;  %s5502_s4 = inlined_call_operand.vmem [shape: f32[1,256], index: 4, kind: input, shape index: {}]   ;;  %s5503_s5 = inlined_call_operand.vmem [shape: f32[64,256], index: 5, kind: input, shape index: {}]   ;;  %s5504_s6 = inlined_call_operand.vmem [shape: f32[64,256], index: 6, kind: input, shape index: {}]   ;;  %s5505_s7 = inlined_call_operand.vmem [shape: f32[1,256], index: 7, kind: input, shape index: {}]   ;;  %s5506_s8 = inlined_call_operand.vmem [shape: f32[64,256], index: 8, kind: input, shape index: {}]   ;;  %s5507_s9 = inlined_call_operand.vmem [shape: f32[64,256], index: 9, kind: input, shape index: {}]   ;;  %s5508_s10 = inlined_call_operand.vmem [shape: f32[1,256], index: 10, kind: input, shape index: {}]   ;;  %s5509_s11 = inlined_call_operand.vmem [shape: f32[8,8,64], index: 11, kind: output, shape index: {0}]   ;;  %s5510_s12 = inlined_call_operand.hbm [shape: f32[3,8,64], index: 12, kind: output, shape index: {1}]   ;;  %s5511_s13 = inlined_call_operand.hbm [shape: f32[3,8,64], index: 13, kind: output, shape index: {2}]  }
   0x1   :  { %v67_v0 = vld [vmem:[%s5500_s2 + $0x78] sm:$0xff]  ;;  %v66_v2 = vld [vmem:[%s5500_s2 + $0x70] sm:$0xff]  ;;  %v65_v4 = vld [vmem:[%s5500_s2 + $0x68] sm:$0xff] }
   0x2   :  { %v3926_v1 = vld [vmem:[%s5501_s3 + $0x78] sm:$0xff]  ;;  %121 = vmatprep.subr.mxu0 %v67_v0  ;;  %v3935_v3 = vld [vmem:[%s5501_s3 + $0x70] sm:$0xff]  ;;  %v3943_v5 = vld [vmem:[%s5501_s3 + $0x68] sm:$0xff] }
   0x3   :  { %271 = vmatprep.subr.mxu1 %v3926_v1  ;;  %122 = vmatpush1.msra.mxu0 %v66_v2  ;;  %v64_v6 = vld [vmem:[%s5500_s2 + $0x60] sm:$0xff]  ;;  %v63_v8 = vld [vmem:[%s5500_s2 + $0x58] sm:$0xff]  ;;  %v62_v10 = vld [vmem:[%s5500_s2 + $0x50] sm:$0xff] }
   0x4   :  { %272 = vmatpush1.msra.mxu1 %v3935_v3  ;;  %v3952_v7 = vld [vmem:[%s5501_s3 + $0x60] sm:$0xff]  ;;  %123 = vmatprep.subr.mxu0 %v65_v4  ;;  %v3961_v9 = vld [vmem:[%s5501_s3 + $0x58] sm:$0xff]  ;;  %v3969_v11 = vld [vmem:[%s5501_s3 + $0x50] sm:$0xff] }
   0x5   :  { %273 = vmatprep.subr.mxu1 %v3943_v5  ;;  %124 = vmatpush1.msra.mxu0 %v64_v6  ;;  %v61_v12 = vld [vmem:[%s5500_s2 + $0x48] sm:$0xff]  ;;  %v60_v14 = vld [vmem:[%s5500_s2 + $0x40] sm:$0xff]  ;;  %v59_v16 = vld [vmem:[%s5500_s2 + $0x38] sm:$0xff] }
   0x6   :  { %274 = vmatpush1.msra.mxu1 %v3952_v7  ;;  %v3978_v13 = vld [vmem:[%s5501_s3 + $0x48] sm:$0xff]  ;;  %125 = vmatprep.subr.mxu0 %v63_v8  ;;  %v3987_v15 = vld [vmem:[%s5501_s3 + $0x40] sm:$0xff]  ;;  %v3996_v17 = vld [vmem:[%s5501_s3 + $0x38] sm:$0xff] }
   0x7   :  { %275 = vmatprep.subr.mxu1 %v3961_v9  ;;  %126 = vmatpush1.msra.mxu0 %v62_v10  ;;  %v58_v18 = vld [vmem:[%s5500_s2 + $0x30] sm:$0xff]  ;;  %v57_v20 = vld [vmem:[%s5500_s2 + $0x28] sm:$0xff]  ;;  %v56_v22 = vld [vmem:[%s5500_s2 + $0x20] sm:$0xff] }
   0x8   :  { %276 = vmatpush1.msra.mxu1 %v3969_v11  ;;  %127 = vmatprep.subr.mxu0 %v61_v12  ;;  %v4005_v19 = vld [vmem:[%s5501_s3 + $0x30] sm:$0xff]  ;;  %v4014_v21 = vld [vmem:[%s5501_s3 + $0x28] sm:$0xff]  ;;  %v4023_v23 = vld [vmem:[%s5501_s3 + $0x20] sm:$0xff] }
   0x9   :  { %277 = vmatprep.subr.mxu1 %v3978_v13  ;;  %128 = vmatpush1.msra.mxu0 %v60_v14  ;;  %v55_v24 = vld [vmem:[%s5500_s2 + $0x18] sm:$0xff]  ;;  %v54_v26 = vld [vmem:[%s5500_s2 + $0x10] sm:$0xff] }
   0xa   :  { %278 = vmatpush1.msra.mxu1 %v3987_v15  ;;  %129 = vmatprep.subr.mxu0 %v59_v16  ;;  %v4032_v25 = vld [vmem:[%s5501_s3 + $0x18] sm:$0xff]  ;;  %v4041_v27 = vld [vmem:[%s5501_s3 + $0x10] sm:$0xff] }
   0xb   :  { %279 = vmatprep.subr.mxu1 %v3996_v17  ;;  %130 = vmatpush1.msra.mxu0 %v58_v18 }
   0xc   :  { %280 = vmatpush1.msra.mxu1 %v4005_v19  ;;  %131 = vmatprep.subr.mxu0 %v57_v20 }
   0xd   :  { %281 = vmatprep.subr.mxu1 %v4014_v21 }
   0xe   :  { %20 = vsyncpa [#allocation7], 0  ;;  %132 = vmatpush1.msra.mxu0 %v56_v22  ;;  %282 = vmatpush1.msra.mxu1 %v4023_v23  ;;  %v53_v28 = vld [vmem:[%s5500_s2 + $0x8] sm:$0xff]  ;;  %v52_v30 = vld [vmem:[%s5500_s2] sm:$0xff]  ;;  %vm80_vm0 = vcmask 523264   ;;  %v3843_v33 = vmov 0.0   ;;  %v70_v35 = vlaneseq }
   0xf   :  { %v4050_v29 = vld [vmem:[%s5501_s3 + $0x8] sm:$0xff]  ;;  %133 = vmatprep.subr.mxu0 %v55_v24  ;;  %283 = vmatprep.subr.mxu1 %v4032_v25  ;;  %v4060_v31 = vld [vmem:[%s5501_s3] sm:$0xff]  ;;  %v3844_v34 = vmov 0   ;;  %s3845_s24 = smov 64   ;;  %s3846_s23 = smov [#allocation6]  }
  0x10   :  { %134 = vmatpush1.msra.mxu0 %v54_v26  ;;  %284 = vmatpush1.msra.mxu1 %v4041_v27  ;;  %v44_v32 = vld [vmem:[%s5499_s1] sm:$0xff]  ;;  %v71_v36 = vshrl.u32 %v70_v35, 7  ;;  %v45_v58 = vld [vmem:[%s5499_s1 + $0x8] sm:$0xff]  ;;  %s3384_s25 = sshll.u32 %s3846_s23, 4  ;;  %s3385_s25 = int_to_ptr.vmem [resolvable:$true] %s3384_s25 }
  0x11   :  { %135 = vmatprep.subr.mxu0 %v53_v28  ;;  %285 = vmatprep.subr.mxu1 %v4050_v29  ;;  %v68_v38 = vld [vmem:[%s5502_s4] sm:$0x3]  ;;  %s3799_s26 = scalar_lea.vmem %s3385_s25, 384  ;;  %p3804_p1 = scmp.lt.s32.totalorder %s3385_s25, %s3385_s25 }
  0x12   :  { %136 = vmatpush1.msra.mxu0 %v52_v30  ;;  %169 = vmatprep.mubr.f32.mxu0 %v3843_v33  ;;  %v4109_v37 = vsub.s32 0, %v71_v36  ;;  %v4118_v45 = vsub.s32 1, %v71_v36  ;;  %v4127_v53 = vld [vmem:[%s5498_s0] sm:$0xff]  ;;  %p3800_p0 = scmp.ne.s32.totalorder %s3385_s25, %s3799_s26  ;;  %p3805_p2 = scmp.lt.s32.totalorder %s3799_s26, %s3799_s26 }
  0x13   :  { %286 = vmatpush1.msra.mxu1 %v4060_v31  ;;  %319 = vmatprep.mubr.f32.mxu1 %v3843_v33  ;;  %vm350_vm1 = vcmp.gt.s32.totalorder %v4127_v53, 0  ;;  %vm462_vm3 = vcmp.gt.s32.totalorder %v4127_v53, 1  ;;  %vm578_vm5 = vcmp.gt.s32.totalorder %v4127_v53, 2  ;;  %vm694_vm7 = vcmp.gt.s32.totalorder %v4127_v53, 3 }
  0x14   :  { %3401 = vmatmul.mubr.msk.f32.vlgmr.msra.gmra.mxu0 %vm80_vm0, %v44_v32  ;;  %320 = vmatmul.mubr.f32.vlgmr.msra.gmra.mxu1 %v3843_v33  ;;  %v4115_v39 = vrot.slane %v68_v38, %v4109_v37  ;;  %v4121_v46 = vrot.slane %v68_v38, %v4118_v45  ;;  %v351_v57 = vsel %vm350_vm1, 1, %v3844_v34  ;;  %vm810_vm9 = vcmp.gt.s32.totalorder %v4127_v53, 4  ;;  %p3806_p3 = por %p3805_p2, %p3804_p1 }
  0x15   :  { %383 = vmatprep.subr.mxu1 %v3926_v1  ;;  %175 = vmatprep.mubr.f32.mxu0 %v3843_v33  ;;  %vm926_vm11 = vcmp.gt.s32.totalorder %v4127_v53, 5  ;;  %vm1042_vm13 = vcmp.gt.s32.totalorder %v4127_v53, 6  ;;  %v1203_v53 = vld [vmem:[%s5503_s5 + $0x68] sm:$0xff] }
  0x16   :  { %384 = vmatpush1.msra.mxu1 %v3935_v3  ;;  %431 = vmatprep.mubr.f32.mxu1 %v3843_v33  ;;  %p3807_p4 = pnand %p3806_p3, %p3800_p0 }
  0x17   :  { %385 = vmatprep.subr.mxu1 %v3943_v5  ;;  %499 = vmatprep.subr.mxu0 %v3926_v1 }
  0x18   :  { %386 = vmatpush1.msra.mxu1 %v3952_v7  ;;  %500 = vmatpush1.msra.mxu0 %v3935_v3 }
  0x19   :  { %387 = vmatprep.subr.mxu1 %v3961_v9  ;;  %501 = vmatprep.subr.mxu0 %v3943_v5 }
  0x1a   :  { %388 = vmatpush1.msra.mxu1 %v3969_v11  ;;  %502 = vmatpush1.msra.mxu0 %v3952_v7 }
  0x1b   :  { %389 = vmatprep.subr.mxu1 %v3978_v13  ;;  %503 = vmatprep.subr.mxu0 %v3961_v9 }
  0x1c   :  { %390 = vmatpush1.msra.mxu1 %v3987_v15  ;;  %504 = vmatpush1.msra.mxu0 %v3969_v11 }
  0x1d   :  { %391 = vmatprep.subr.mxu1 %v3996_v17  ;;  %505 = vmatprep.subr.mxu0 %v3978_v13 }
  0x1e   :  { %392 = vmatpush1.msra.mxu1 %v4005_v19  ;;  %506 = vmatpush1.msra.mxu0 %v3987_v15 }
  0x1f   :  { %393 = vmatprep.subr.mxu1 %v4014_v21  ;;  %507 = vmatprep.subr.mxu0 %v3996_v17 }
  0x20   :  { %394 = vmatpush1.msra.mxu1 %v4023_v23  ;;  %508 = vmatpush1.msra.mxu0 %v4005_v19 }
  0x21   :  { %395 = vmatprep.subr.mxu1 %v4032_v25  ;;  %509 = vmatprep.subr.mxu0 %v4014_v21 }
  0x22   :  { %396 = vmatpush1.msra.mxu1 %v4041_v27  ;;  %510 = vmatpush1.msra.mxu0 %v4023_v23 }
  0x23   :  { %397 = vmatprep.subr.mxu1 %v4050_v29  ;;  %511 = vmatprep.subr.mxu0 %v4032_v25 }
  0x24   :  { %398 = vmatpush1.msra.mxu1 %v4060_v31  ;;  %512 = vmatpush1.msra.mxu0 %v4041_v27 }
  0x25   :  { %513 = vmatprep.subr.mxu0 %v4050_v29  ;;  %615 = vmatprep.subr.mxu1 %v3926_v1 }
  0x26   :  { %514 = vmatpush1.msra.mxu0 %v4060_v31  ;;  %3508 = vset.pattern.permute.xlu0 %v3844_v34 }
  0x27   :  { %731 = vmatprep.subr.mxu0 %v3926_v1  ;;  %3509 = vset.pattern.permute.xlu1 %v3844_v34 }
  0x28   :  { %3402 = vmatmul.mubr.msk.f32.gmra.mxu0 %vm80_vm0, %v45_v58 }
  0x29   :  { %181 = vmatprep.mubr.f32.mxu0 %v3843_v33 }
  0xd4   :  { %v171_v40 = vpop.f32.mrf.mxu0  ;;  %v321_v42 = vpop.f32.mrf.mxu1 }
  0xd5   :  { %v172_v41 = vadd.f32 %v171_v40, %v4115_v39 }
  0xd6   :  { %v173_v47 = vpop.f32.mrf.mxu0  ;;  %v323_v49 = vpop.f32.mrf.mxu1 }
  0xd7   :  { %v326_v43 = vadd.f32 %v321_v42, %v172_v41  ;;  %v174_v48 = vadd.f32 %v173_v47, %v4121_v46  ;;  %v463_v41 = vsel %vm462_vm3, 1, %v3844_v34  ;;  %v46_v42 = vld [vmem:[%s5499_s1 + $0x10] sm:$0xff]  ;;  %v49_v47 = vld [vmem:[%s5499_s1 + $0x28] sm:$0xff] }
  0xd8   :  { %3403 = vmatmul.mubr.msk.f32.gmra.mxu0 %vm80_vm0, %v46_v42 }
  0xd9   :  { %v3409_v44 = vmul.f32 -1.442695, %v326_v43  ;;  %v327_v50 = vadd.f32 %v323_v49, %v174_v48  ;;  %187 = vmatprep.mubr.f32.mxu0 %v3843_v33  ;;  %v47_v43 = vld [vmem:[%s5499_s1 + $0x18] sm:$0xff]  ;;  %v50_v48 = vld [vmem:[%s5499_s1 + $0x30] sm:$0xff] }
  0xda   :  { %v51_v49 = vld [vmem:[%s5499_s1 + $0x38] sm:$0xff] }
  0xdb   :  { %3510 = vpow2.f32 %v3409_v44  ;;  %v3410_v59 = vmul.f32 -1.442695, %v327_v50  ;;  %v48_v44 = vld [vmem:[%s5499_s1 + $0x20] sm:$0xff] }
  0xdc   :  { %3512 = vtanh.f32 %v327_v50  ;;  %3404 = vmatmul.mubr.msk.f32.gmra.mxu0 %vm80_vm0, %v47_v43 }
  0xdd   :  { %193 = vmatprep.mubr.f32.mxu0 %v3843_v33 }
  0xe0   :  { %3405 = vmatmul.mubr.msk.f32.gmra.mxu0 %vm80_vm0, %v48_v44 }
  0xe1   :  { %199 = vmatprep.mubr.f32.mxu0 %v3843_v33 }
  0xe4   :  { %3406 = vmatmul.mubr.msk.f32.gmra.mxu0 %vm80_vm0, %v49_v47 }
  0xe5   :  { %205 = vmatprep.mubr.f32.mxu0 %v3843_v33 }
  0xe8   :  { %v3511_v51 = vpop.eup %3510  ;;  %v177_v14 = vpop.f32.mrf.mxu0  ;;  %3407 = vmatmul.mubr.msk.f32.gmra.mxu0 %vm80_vm0, %v50_v48 }
  0xe9   :  { %v331_v52 = vadd.f32 1.0, %v3511_v51  ;;  %v3513_v54 = vpop.eup %3512  ;;  %v178_v16 = vadd.f32 %v177_v14, %v4115_v39  ;;  %211 = vmatprep.mubr.f32.mxu0 %v3843_v33 }
  0xea   :  { %v179_v24 = vpop.f32.mrf.mxu0 }
  0xeb   :  { %3514 = vrcp.f32 %v331_v52  ;;  %v180_v28 = vadd.f32 %v179_v24, %v4121_v46 }
  0xec   :  { %3516 = vpow2.f32 %v3410_v59  ;;  %3408 = vmatmul.mubr.msk.f32.gmra.mxu0 %vm80_vm0, %v51_v49 }
  0xed   :  { %547 = vmatprep.mubr.f32.mxu0 %v3843_v33 }
  0xf8   :  { %v3515_v55 = vpop.eup %3514 }
  0xf9   :  { %v342_v56 = vmul.f32 %v3515_v55, %v3513_v54  ;;  %v3517_v60 = vpop.eup %3516  ;;  %v341_v62 = vmul.f32 0.0, %v3515_v55 }
  0xfa   :  { %v338_v61 = vadd.f32 1.0, %v3517_v60 }
  0xfb   :  { %344 = vrot.lane.b32.xlu0 %v342_v56, %s3845_s24 }
  0xfc   :  { %3518 = vrcp.f32 %v338_v61 }
  0xff   :  { %353 = vperm.xlu0 %3508, %v351_v57  }
 0x109   :  { %v3519_v2 = vpop.eup %3518 }
 0x16d   :  { %v345_v63 = vpop.permute.xlu0 %344 }
 0x16e   :  { %v4137_v0 = vadd.f32 %v345_v63, %v341_v62  ;;  %v579_v63 = vsel %vm578_vm5, 1, %v3844_v34 }
 0x170   :  { %3520 = vtanh.f32 %v4137_v0 }
 0x17a   :  { %v4140_v4 = vpop.permute.xlu0 %353 }
 0x17b   :  { %vm355_vm2 = vcmp.eq.s32.totalorder %v4140_v4, 1 }
 0x17c   :  { %v4206_v54 = vsel %vm355_vm2, %v4137_v0, 0.0 }
 0x17d   :  { %v3521_v6 = vpop.eup %3520 }
 0x17e   :  { %v349_v8 = vmul.f32 %v3521_v6, %v3519_v2 }
 0x180   :  { %v4145_v10 = vsel %vm355_vm2, %v349_v8, 0.0 }
 0x181   :  { %359 = vrot.lane.b32.xlu1 %v4145_v10, %s3845_s24 }
 0x198   :  { %v183_v2 = vpop.f32.mrf.mxu0 }
 0x19a   :  { %v185_v6 = vpop.f32.mrf.mxu0 }
 0x19c   :  { %v4245_v8 = vpop.f32.mrf.mxu0 }
 0x1f3   :  { %v360_v12 = vpop.permute.xlu1 %359 }
 0x1f4   :  { %362 = vst.msk [vmem:[#allocation3] sm:$0xff] %vm80_vm0, %v360_v12  ;;  %3411 = vmatmul.mubr.msk.f32.vlgmr.msra.gmra.mxu1 %vm80_vm0, %v360_v12 }
 0x1f5   :  { %616 = vmatpush1.msra.mxu1 %v3935_v3  ;;  %663 = vmatprep.mubr.f32.mxu1 %v3843_v33 }
 0x1f6   :  { %617 = vmatprep.subr.mxu1 %v3943_v5 }
 0x1f7   :  { %618 = vmatpush1.msra.mxu1 %v3952_v7 }
 0x1f8   :  { %619 = vmatprep.subr.mxu1 %v3961_v9 }
 0x1f9   :  { %620 = vmatpush1.msra.mxu1 %v3969_v11 }
 0x1fa   :  { %621 = vmatprep.subr.mxu1 %v3978_v13 }
 0x1fb   :  { %622 = vmatpush1.msra.mxu1 %v3987_v15 }
 0x1fc   :  { %623 = vmatprep.subr.mxu1 %v3996_v17 }
 0x1fd   :  { %624 = vmatpush1.msra.mxu1 %v4005_v19 }
 0x1fe   :  { %625 = vmatprep.subr.mxu1 %v4014_v21 }
 0x1ff   :  { %626 = vmatpush1.msra.mxu1 %v4023_v23 }
 0x200   :  { %627 = vmatprep.subr.mxu1 %v4032_v25 }
 0x201   :  { %628 = vmatpush1.msra.mxu1 %v4041_v27 }
 0x202   :  { %629 = vmatprep.subr.mxu1 %v4050_v29 }
 0x203   :  { %630 = vmatpush1.msra.mxu1 %v4060_v31 }
 0x204   :  { %847 = vmatprep.subr.mxu1 %v3926_v1 }
 0x2b4   :  { %v433_v18 = vpop.f32.mrf.mxu1 }
 0x2b5   :  { %v438_v20 = vadd.f32 %v433_v18, %v178_v16 }
 0x2b6   :  { %v435_v26 = vpop.f32.mrf.mxu1 }
 0x2b7   :  { %v3412_v22 = vmul.f32 -1.442695, %v438_v20  ;;  %v439_v30 = vadd.f32 %v435_v26, %v180_v28  ;;  %v184_v28 = vadd.f32 %v183_v2, %v4115_v39 }
 0x2b9   :  { %3522 = vpow2.f32 %v3412_v22  ;;  %v3413_v50 = vmul.f32 -1.442695, %v439_v30 }
 0x2ba   :  { %3524 = vtanh.f32 %v439_v30 }
 0x2c6   :  { %v3523_v32 = vpop.eup %3522 }
 0x2c7   :  { %v443_v35 = vadd.f32 1.0, %v3523_v32  ;;  %v3525_v36 = vpop.eup %3524 }
 0x2c9   :  { %3526 = vrcp.f32 %v443_v35 }
 0x2ca   :  { %3528 = vpow2.f32 %v3413_v50 }
 0x2d6   :  { %v3527_v38 = vpop.eup %3526 }
 0x2d7   :  { %v454_v40 = vmul.f32 %v3527_v38, %v3525_v36  ;;  %v3529_v51 = vpop.eup %3528  ;;  %v453_v55 = vmul.f32 %v3527_v38, %v4206_v54  ;;  %v186_v38 = vadd.f32 %v185_v6, %v4121_v46 }
 0x2d8   :  { %v450_v52 = vadd.f32 1.0, %v3529_v51 }
 0x2d9   :  { %456 = vrot.lane.b32.xlu1 %v454_v40, %s3845_s24 }
 0x2da   :  { %3530 = vrcp.f32 %v450_v52 }
 0x2dd   :  { %465 = vperm.xlu1 %3509, %v463_v41  }
 0x2e7   :  { %v3531_v58 = vpop.eup %3530 }
 0x34b   :  { %v457_v56 = vpop.permute.xlu1 %456 }
 0x34c   :  { %v4209_v57 = vadd.f32 %v457_v56, %v453_v55 }
 0x34e   :  { %3532 = vtanh.f32 %v4209_v57 }
 0x358   :  { %v4212_v59 = vpop.permute.xlu1 %465 }
 0x359   :  { %vm467_vm4 = vcmp.eq.s32.totalorder %v4212_v59, 1 }
 0x35a   :  { %v468_v51 = vsel %vm467_vm4, %v4209_v57, %v4206_v54  ;;  %v695_v57 = vsel %vm694_vm7, 1, %v3844_v34 }
 0x35b   :  { %v3533_v60 = vpop.eup %3532 }
 0x35c   :  { %v4214_v61 = vmul.f32 %v3533_v60, %v3531_v58 }
 0x35e   :  { %v4222_v62 = vsel %vm467_vm4, %v4214_v61, %v4145_v10  ;;  %v4247_v10 = vpop.f32.mrf.mxu0 }
 0x35f   :  { %479 = vrot.lane.b32.xlu0 %v4222_v62, %s3845_s24 }
 0x360   :  { %v4249_v12 = vpop.f32.mrf.mxu0 }
 0x362   :  { %v4251_v14 = vpop.f32.mrf.mxu0 }
 0x363   :  { %581 = vperm.xlu0 %3508, %v579_v63  }
 0x364   :  { %v4253_v16 = vpop.f32.mrf.mxu0 }
 0x366   :  { %v4255_v18 = vpop.f32.mrf.mxu0 }
 0x368   :  { %v4257_v20 = vpop.f32.mrf.mxu0 }
 0x36a   :  { %v4259_v22 = vpop.f32.mrf.mxu0 }
 0x36c   :  { %v4261_v24 = vpop.f32.mrf.mxu0 }
 0x36e   :  { %v4263_v26 = vpop.f32.mrf.mxu0 }
 0x3d1   :  { %v480_v0 = vpop.permute.xlu0 %479 }
 0x3d2   :  { %3414 = vmatmul.mubr.msk.f32.vlgmr.msra.gmra.mxu0 %vm80_vm0, %v480_v0 }
 0x3d3   :  { %732 = vmatpush1.msra.mxu0 %v3935_v3  ;;  %779 = vmatprep.mubr.f32.mxu0 %v3843_v33 }
 0x3d4   :  { %733 = vmatprep.subr.mxu0 %v3943_v5 }
 0x3d5   :  { %734 = vmatpush1.msra.mxu0 %v3952_v7 }
 0x3d6   :  { %735 = vmatprep.subr.mxu0 %v3961_v9 }
 0x3d7   :  { %736 = vmatpush1.msra.mxu0 %v3969_v11 }
 0x3d8   :  { %737 = vmatprep.subr.mxu0 %v3978_v13 }
 0x3d9   :  { %738 = vmatpush1.msra.mxu0 %v3987_v15 }
 0x3da   :  { %739 = vmatprep.subr.mxu0 %v3996_v17 }
 0x3db   :  { %740 = vmatpush1.msra.mxu0 %v4005_v19 }
 0x3dc   :  { %741 = vmatprep.subr.mxu0 %v4014_v21 }
 0x3dd   :  { %742 = vmatpush1.msra.mxu0 %v4023_v23 }
 0x3de   :  { %743 = vmatprep.subr.mxu0 %v4032_v25  ;;  %v4272_v60 = vpop.permute.xlu0 %581 }
 0x3df   :  { %744 = vmatpush1.msra.mxu0 %v4041_v27  ;;  %vm583_vm6 = vcmp.eq.s32.totalorder %v4272_v60, 1 }
 0x3e0   :  { %745 = vmatprep.subr.mxu0 %v4050_v29 }
 0x3e1   :  { %746 = vmatpush1.msra.mxu0 %v4060_v31 }
 0x3e2   :  { %963 = vmatprep.subr.mxu0 %v3926_v1 }
 0x492   :  { %v549_v30 = vpop.f32.mrf.mxu0 }
 0x493   :  { %v554_v32 = vadd.f32 %v549_v30, %v184_v28 }
 0x494   :  { %v551_v36 = vpop.f32.mrf.mxu0 }
 0x495   :  { %v3415_v35 = vmul.f32 -1.442695, %v554_v32  ;;  %v555_v40 = vadd.f32 %v551_v36, %v186_v38 }
 0x497   :  { %3534 = vpow2.f32 %v3415_v35  ;;  %v3416_v48 = vmul.f32 -1.442695, %v555_v40  ;;  %v192_v35 = vadd.f32 %v4247_v10, %v4121_v46 }
 0x498   :  { %3536 = vtanh.f32 %v555_v40 }
 0x4a4   :  { %v3535_v41 = vpop.eup %3534 }
 0x4a5   :  { %v559_v42 = vadd.f32 1.0, %v3535_v41  ;;  %v3537_v43 = vpop.eup %3536 }
 0x4a7   :  { %3538 = vrcp.f32 %v559_v42 }
 0x4a8   :  { %3540 = vpow2.f32 %v3416_v48 }
 0x4b4   :  { %v3539_v44 = vpop.eup %3538 }
 0x4b5   :  { %v570_v47 = vmul.f32 %v3539_v44, %v3537_v43  ;;  %v3541_v49 = vpop.eup %3540  ;;  %v569_v52 = vmul.f32 %v3539_v44, %v468_v51 }
 0x4b6   :  { %v566_v50 = vadd.f32 1.0, %v3541_v49 }
 0x4b7   :  { %572 = vrot.lane.b32.xlu1 %v570_v47, %s3845_s24 }
 0x4b8   :  { %3542 = vrcp.f32 %v566_v50 }
 0x4c5   :  { %v3543_v58 = vpop.eup %3542 }
 0x529   :  { %v573_v55 = vpop.permute.xlu1 %572 }
 0x52a   :  { %v575_v56 = vadd.f32 %v573_v55, %v569_v52 }
 0x52c   :  { %3544 = vtanh.f32 %v575_v56  ;;  %v584_v47 = vsel %vm583_vm6, %v575_v56, %v468_v51  ;;  %v811_v51 = vsel %vm810_vm9, 1, %v3844_v34 }
 0x539   :  { %v3545_v63 = vpop.eup %3544 }
 0x53a   :  { %v4274_v0 = vmul.f32 %v3545_v63, %v3543_v58 }
 0x53c   :  { %v585_v54 = vsel %vm583_vm6, %v4274_v0, %v4222_v62  ;;  %v190_v62 = vadd.f32 %v4245_v8, %v4115_v39 }
 0x53d   :  { %595 = vrot.lane.b32.xlu1 %v585_v54, %s3845_s24 }
 0x541   :  { %697 = vperm.xlu1 %3509, %v695_v57  }
 0x5af   :  { %v596_v2 = vpop.permute.xlu1 %595 }
 0x5b0   :  { %3417 = vmatmul.mubr.msk.f32.vlgmr.msra.gmra.mxu1 %vm80_vm0, %v596_v2 }
 0x5b1   :  { %848 = vmatpush1.msra.mxu1 %v3935_v3  ;;  %895 = vmatprep.mubr.f32.mxu1 %v3843_v33 }
 0x5b2   :  { %849 = vmatprep.subr.mxu1 %v3943_v5 }
 0x5b3   :  { %850 = vmatpush1.msra.mxu1 %v3952_v7 }
 0x5b4   :  { %851 = vmatprep.subr.mxu1 %v3961_v9 }
 0x5b5   :  { %852 = vmatpush1.msra.mxu1 %v3969_v11 }
 0x5b6   :  { %853 = vmatprep.subr.mxu1 %v3978_v13 }
 0x5b7   :  { %854 = vmatpush1.msra.mxu1 %v3987_v15 }
 0x5b8   :  { %855 = vmatprep.subr.mxu1 %v3996_v17 }
 0x5b9   :  { %856 = vmatpush1.msra.mxu1 %v4005_v19 }
 0x5ba   :  { %857 = vmatprep.subr.mxu1 %v4014_v21 }
 0x5bb   :  { %858 = vmatpush1.msra.mxu1 %v4023_v23 }
 0x5bc   :  { %859 = vmatprep.subr.mxu1 %v4032_v25  ;;  %v4309_v52 = vpop.permute.xlu1 %697 }
 0x5bd   :  { %860 = vmatpush1.msra.mxu1 %v4041_v27  ;;  %vm699_vm8 = vcmp.eq.s32.totalorder %v4309_v52, 1 }
 0x5be   :  { %861 = vmatprep.subr.mxu1 %v4050_v29 }
 0x5bf   :  { %862 = vmatpush1.msra.mxu1 %v4060_v31 }
 0x5c0   :  { %1079 = vmatprep.subr.mxu1 %v3926_v1 }
 0x670   :  { %v665_v6 = vpop.f32.mrf.mxu1 }
 0x671   :  { %v670_v28 = vadd.f32 %v665_v6, %v190_v62 }
 0x672   :  { %v667_v32 = vpop.f32.mrf.mxu1 }
 0x673   :  { %v3418_v30 = vmul.f32 -1.442695, %v670_v28  ;;  %v671_v36 = vadd.f32 %v667_v32, %v192_v35  ;;  %v198_v28 = vadd.f32 %v4251_v14, %v4121_v46 }
 0x675   :  { %3546 = vpow2.f32 %v3418_v30  ;;  %v3419_v1 = vmul.f32 -1.442695, %v671_v36 }
 0x676   :  { %3548 = vtanh.f32 %v671_v36 }
 0x682   :  { %v3547_v38 = vpop.eup %3546 }
 0x683   :  { %v675_v40 = vadd.f32 1.0, %v3547_v38  ;;  %v3549_v41 = vpop.eup %3548 }
 0x685   :  { %3550 = vrcp.f32 %v675_v40 }
 0x686   :  { %3552 = vpow2.f32 %v3419_v1 }
 0x692   :  { %v3551_v42 = vpop.eup %3550 }
 0x693   :  { %v686_v43 = vmul.f32 %v3551_v42, %v3549_v41  ;;  %v3553_v8 = vpop.eup %3552  ;;  %v685_v48 = vmul.f32 %v3551_v42, %v584_v47 }
 0x694   :  { %v682_v44 = vadd.f32 1.0, %v3553_v8 }
 0x695   :  { %688 = vrot.lane.b32.xlu0 %v686_v43, %s3845_s24 }
 0x696   :  { %3554 = vrcp.f32 %v682_v44 }
 0x6a3   :  { %v3555_v50 = vpop.eup %3554 }
 0x707   :  { %v689_v49 = vpop.permute.xlu0 %688 }
 0x708   :  { %v691_v10 = vadd.f32 %v689_v49, %v685_v48 }
 0x70a   :  { %3556 = vtanh.f32 %v691_v10  ;;  %v700_v43 = vsel %vm699_vm8, %v691_v10, %v584_v47  ;;  %v927_v47 = vsel %vm926_vm11, 1, %v3844_v34 }
 0x717   :  { %v3557_v55 = vpop.eup %3556 }
 0x718   :  { %v4311_v58 = vmul.f32 %v3557_v55, %v3555_v50 }
 0x71a   :  { %v701_v63 = vsel %vm699_vm8, %v4311_v58, %v585_v54  ;;  %v196_v54 = vadd.f32 %v4249_v12, %v4115_v39 }
 0x71b   :  { %711 = vrot.lane.b32.xlu0 %v701_v63, %s3845_s24 }
 0x71f   :  { %813 = vperm.xlu0 %3508, %v811_v51  }
 0x78d   :  { %v712_v56 = vpop.permute.xlu0 %711 }
 0x78e   :  { %3420 = vmatmul.mubr.msk.f32.vlgmr.msra.gmra.mxu0 %vm80_vm0, %v712_v56 }
 0x78f   :  { %964 = vmatpush1.msra.mxu0 %v3935_v3  ;;  %1011 = vmatprep.mubr.f32.mxu0 %v3843_v33 }
 0x790   :  { %965 = vmatprep.subr.mxu0 %v3943_v5 }
 0x791   :  { %966 = vmatpush1.msra.mxu0 %v3952_v7 }
 0x792   :  { %967 = vmatprep.subr.mxu0 %v3961_v9 }
 0x793   :  { %968 = vmatpush1.msra.mxu0 %v3969_v11 }
 0x794   :  { %969 = vmatprep.subr.mxu0 %v3978_v13 }
 0x795   :  { %970 = vmatpush1.msra.mxu0 %v3987_v15 }
 0x796   :  { %971 = vmatprep.subr.mxu0 %v3996_v17 }
 0x797   :  { %972 = vmatpush1.msra.mxu0 %v4005_v19 }
 0x798   :  { %973 = vmatprep.subr.mxu0 %v4014_v21 }
 0x799   :  { %974 = vmatpush1.msra.mxu0 %v4023_v23 }
 0x79a   :  { %975 = vmatprep.subr.mxu0 %v4032_v25  ;;  %v4344_v48 = vpop.permute.xlu0 %813 }
 0x79b   :  { %976 = vmatpush1.msra.mxu0 %v4041_v27  ;;  %vm815_vm10 = vcmp.eq.s32.totalorder %v4344_v48, 1 }
 0x79c   :  { %977 = vmatprep.subr.mxu0 %v4050_v29 }
 0x79d   :  { %978 = vmatpush1.msra.mxu0 %v4060_v31 }
 0x84e   :  { %v781_v57 = vpop.f32.mrf.mxu0 }
 0x84f   :  { %v786_v2 = vadd.f32 %v781_v57, %v196_v54 }
 0x850   :  { %v783_v6 = vpop.f32.mrf.mxu0 }
 0x851   :  { %v3421_v62 = vmul.f32 -1.442695, %v786_v2  ;;  %v787_v30 = vadd.f32 %v783_v6, %v198_v28  ;;  %v1043_v28 = vsel %vm1042_vm13, 1, %v3844_v34 }
 0x853   :  { %3558 = vpow2.f32 %v3421_v62  ;;  %v3422_v41 = vmul.f32 -1.442695, %v787_v30 }
 0x854   :  { %3560 = vtanh.f32 %v787_v30  ;;  %v1204_v30 = vld [vmem:[%s5503_s5 + $0x70] sm:$0xff] }
 0x860   :  { %v3559_v32 = vpop.eup %3558 }
 0x861   :  { %v791_v35 = vadd.f32 1.0, %v3559_v32  ;;  %v3561_v36 = vpop.eup %3560 }
 0x863   :  { %3562 = vrcp.f32 %v791_v35  ;;  %v1202_v35 = vld [vmem:[%s5503_s5 + $0x60] sm:$0xff] }
 0x864   :  { %3564 = vpow2.f32 %v3422_v41  ;;  %v1198_v41 = vld [vmem:[%s5503_s5 + $0x40] sm:$0xff] }
 0x870   :  { %v3563_v38 = vpop.eup %3562 }
 0x871   :  { %v802_v40 = vmul.f32 %v3563_v38, %v3561_v36  ;;  %v3565_v12 = vpop.eup %3564  ;;  %v801_v1 = vmul.f32 %v3563_v38, %v700_v43  ;;  %v1201_v36 = vld [vmem:[%s5503_s5 + $0x58] sm:$0xff]  ;;  %v1200_v38 = vld [vmem:[%s5503_s5 + $0x50] sm:$0xff] }
 0x872   :  { %v798_v42 = vadd.f32 1.0, %v3565_v12  ;;  %v1197_v12 = vld [vmem:[%s5503_s5 + $0x38] sm:$0xff] }
 0x873   :  { %804 = vrot.lane.b32.xlu1 %v802_v40, %s3845_s24  ;;  %v1199_v40 = vld [vmem:[%s5503_s5 + $0x48] sm:$0xff] }
 0x874   :  { %3566 = vrcp.f32 %v798_v42  ;;  %v1196_v42 = vld [vmem:[%s5503_s5 + $0x30] sm:$0xff] }
 0x881   :  { %v3567_v44 = vpop.eup %3566 }
 0x8e5   :  { %v805_v8 = vpop.permute.xlu1 %804 }
 0x8e6   :  { %v807_v14 = vadd.f32 %v805_v8, %v801_v1  ;;  %v1194_v1 = vld [vmem:[%s5503_s5 + $0x20] sm:$0xff]  ;;  %v1193_v8 = vld [vmem:[%s5503_s5 + $0x18] sm:$0xff] }
 0x8e8   :  { %3568 = vtanh.f32 %v807_v14 }
 0x8f5   :  { %v3569_v49 = vpop.eup %3568 }
 0x8f6   :  { %v4346_v50 = vmul.f32 %v3569_v49, %v3567_v44  ;;  %v1191_v44 = vld [vmem:[%s5503_s5 + $0x8] sm:$0xff]  ;;  %v1190_v49 = vld [vmem:[%s5503_s5] sm:$0xff] }
 0x8f8   :  { %v817_v55 = vsel %vm815_vm10, %v4346_v50, %v701_v63 }
 0x8f9   :  { %827 = vrot.lane.b32.xlu1 %v817_v55, %s3845_s24 }
 0x8fd   :  { %929 = vperm.xlu1 %3509, %v927_v47   ;;  %v208_v47 = vadd.f32 %v4257_v20, %v4115_v39  ;;  %v4459_v20 = vld [vmem:[%s5504_s6 + $0x78] sm:$0xff] }
 0x96b   :  { %v828_v10 = vpop.permute.xlu1 %827 }
 0x96c   :  { %3423 = vmatmul.mubr.msk.f32.vlgmr.msra.gmra.mxu1 %vm80_vm0, %v828_v10 }
 0x96d   :  { %1080 = vmatpush1.msra.mxu1 %v3935_v3  ;;  %1127 = vmatprep.mubr.f32.mxu1 %v3843_v33  ;;  %v202_v3 = vadd.f32 %v4253_v16, %v4115_v39 }
 0x96e   :  { %1081 = vmatprep.subr.mxu1 %v3943_v5 }
 0x96f   :  { %1082 = vmatpush1.msra.mxu1 %v3952_v7 }
 0x970   :  { %1083 = vmatprep.subr.mxu1 %v3961_v9 }
 0x971   :  { %1084 = vmatpush1.msra.mxu1 %v3969_v11 }
 0x972   :  { %1085 = vmatprep.subr.mxu1 %v3978_v13  ;;  %v204_v13 = vadd.f32 %v4255_v18, %v4121_v46  ;;  %v4382_v18 = vsel %vm815_vm10, %v807_v14, %v700_v43  ;;  %v1195_v43 = vld [vmem:[%s5503_s5 + $0x28] sm:$0xff]  ;;  %v1192_v14 = vld [vmem:[%s5503_s5 + $0x10] sm:$0xff] }
 0x973   :  { %1086 = vmatpush1.msra.mxu1 %v3987_v15 }
 0x974   :  { %1087 = vmatprep.subr.mxu1 %v3996_v17 }
 0x975   :  { %1088 = vmatpush1.msra.mxu1 %v4005_v19 }
 0x976   :  { %1089 = vmatprep.subr.mxu1 %v4014_v21 }
 0x977   :  { %1090 = vmatpush1.msra.mxu1 %v4023_v23 }
 0x978   :  { %1091 = vmatprep.subr.mxu1 %v4032_v25  ;;  %v4388_v57 = vpop.permute.xlu1 %929 }
 0x979   :  { %1092 = vmatpush1.msra.mxu1 %v4041_v27  ;;  %v1205_v27 = vld [vmem:[%s5503_s5 + $0x78] sm:$0xff]  ;;  %vm931_vm12 = vcmp.eq.s32.totalorder %v4388_v57, 1 }
 0x97a   :  { %1093 = vmatprep.subr.mxu1 %v4050_v29  ;;  %1258 = vmatprep.subr.mxu0 %v1205_v27 }
 0x97b   :  { %1094 = vmatpush1.msra.mxu1 %v4060_v31 }
 0x97c   :  { %1405 = vmatprep.subr.mxu1 %v4459_v20 }
 0xa2c   :  { %v897_v5 = vpop.f32.mrf.mxu1 }
 0xa2d   :  { %v902_v7 = vadd.f32 %v897_v5, %v202_v3 }
 0xa2e   :  { %v899_v11 = vpop.f32.mrf.mxu1 }
 0xa2f   :  { %v3424_v9 = vmul.f32 -1.442695, %v902_v7  ;;  %v903_v15 = vadd.f32 %v899_v11, %v204_v13 }
 0xa31   :  { %3570 = vpow2.f32 %v3424_v9  ;;  %v3425_v29 = vmul.f32 -1.442695, %v903_v15  ;;  %v210_v9 = vadd.f32 %v4259_v22, %v4121_v46 }
 0xa32   :  { %3572 = vtanh.f32 %v903_v15 }
 0xa3e   :  { %v3571_v17 = vpop.eup %3570 }
 0xa3f   :  { %v907_v19 = vadd.f32 1.0, %v3571_v17  ;;  %v3573_v21 = vpop.eup %3572 }
 0xa41   :  { %3574 = vrcp.f32 %v907_v19 }
 0xa42   :  { %3576 = vpow2.f32 %v3425_v29 }
 0xa4e   :  { %v3575_v23 = vpop.eup %3574 }
 0xa4f   :  { %v918_v25 = vmul.f32 %v3575_v23, %v3573_v21  ;;  %v3577_v31 = vpop.eup %3576  ;;  %v917_v63 = vmul.f32 %v3575_v23, %v4382_v18 }
 0xa50   :  { %v914_v16 = vadd.f32 1.0, %v3577_v31 }
 0xa51   :  { %920 = vrot.lane.b32.xlu0 %v918_v25, %s3845_s24 }
 0xa52   :  { %3578 = vrcp.f32 %v914_v16 }
 0xa5f   :  { %v3579_v54 = vpop.eup %3578 }
 0xac3   :  { %v921_v51 = vpop.permute.xlu0 %920 }
 0xac4   :  { %v4385_v56 = vadd.f32 %v921_v51, %v917_v63  ;;  %v4476_v63 = vld [vmem:[%s5504_s6 + $0x70] sm:$0xff]  ;;  %v4481_v51 = vld [vmem:[%s5504_s6 + $0x68] sm:$0xff] }
 0xac6   :  { %3580 = vtanh.f32 %v4385_v56  ;;  %v4467_v27 = vsel %vm931_vm12, %v4385_v56, %v4382_v18  ;;  %v4487_v18 = vld [vmem:[%s5504_s6 + $0x60] sm:$0xff]  ;;  %v4493_v56 = vld [vmem:[%s5504_s6 + $0x58] sm:$0xff] }
 0xad3   :  { %v3581_v2 = vpop.eup %3580 }
 0xad4   :  { %v4390_v62 = vmul.f32 %v3581_v2, %v3579_v54  ;;  %v4499_v54 = vld [vmem:[%s5504_s6 + $0x50] sm:$0xff]  ;;  %v4505_v2 = vld [vmem:[%s5504_s6 + $0x48] sm:$0xff] }
 0xad6   :  { %v4397_v6 = vsel %vm931_vm12, %v4390_v62, %v817_v55  ;;  %v1182_v55 = vld [vmem:[#allocation3] sm:$0xff] }
 0xad7   :  { %943 = vrot.lane.b32.xlu0 %v4397_v6, %s3845_s24 }
 0xadb   :  { %1045 = vperm.xlu0 %3508, %v1043_v28   ;;  %v4511_v28 = vld [vmem:[%s5504_s6 + $0x40] sm:$0xff] }
 0xb49   :  { %v944_v32 = vpop.permute.xlu0 %943 }
 0xb4a   :  { %3426 = vmatmul.mubr.msk.f32.vlgmr.msra.gmra.mxu0 %vm80_vm0, %v944_v32 }
 0xb4b   :  { %1259 = vmatpush1.msra.mxu0 %v1204_v30  ;;  %1306 = vmatprep.mubr.f32.mxu0 %v3843_v33  ;;  %v4517_v30 = vld [vmem:[%s5504_s6 + $0x38] sm:$0xff] }
 0xb4c   :  { %1260 = vmatprep.subr.mxu0 %v1203_v53 }
 0xb4d   :  { %1261 = vmatpush1.msra.mxu0 %v1202_v35  ;;  %v4525_v35 = vld [vmem:[%s5504_s6 + $0x30] sm:$0xff] }
 0xb4e   :  { %1262 = vmatprep.subr.mxu0 %v1201_v36 }
 0xb4f   :  { %1263 = vmatpush1.msra.mxu0 %v1200_v38  ;;  %v4531_v38 = vld [vmem:[%s5504_s6 + $0x28] sm:$0xff] }
 0xb50   :  { %1264 = vmatprep.subr.mxu0 %v1199_v40 }
 0xb51   :  { %1265 = vmatpush1.msra.mxu0 %v1198_v41  ;;  %v4539_v41 = vld [vmem:[%s5504_s6 + $0x20] sm:$0xff] }
 0xb52   :  { %1266 = vmatprep.subr.mxu0 %v1197_v12  ;;  %v4546_v12 = vld [vmem:[%s5504_s6 + $0x18] sm:$0xff] }
 0xb53   :  { %1267 = vmatpush1.msra.mxu0 %v1196_v42 }
 0xb54   :  { %1268 = vmatprep.subr.mxu0 %v1195_v43  ;;  %v4558_v43 = vld [vmem:[%s5504_s6 + $0x10] sm:$0xff] }
 0xb55   :  { %1269 = vmatpush1.msra.mxu0 %v1194_v1  ;;  %v4566_v1 = vld [vmem:[%s5504_s6 + $0x8] sm:$0xff] }
 0xb56   :  { %1270 = vmatprep.subr.mxu0 %v1193_v8  ;;  %v4520_v53 = vpop.permute.xlu0 %1045  ;;  %v470_v8 = vsel %vm467_vm4, %v4214_v61, 0.0 }
 0xb57   :  { %1271 = vmatpush1.msra.mxu0 %v1192_v14  ;;  %vm1047_vm14 = vcmp.eq.s32.totalorder %v4520_v53, 1 }
 0xb58   :  { %1272 = vmatprep.subr.mxu0 %v1191_v44 }
 0xb59   :  { %1273 = vmatpush1.msra.mxu0 %v1190_v49  ;;  %v214_v49 = vadd.f32 %v4261_v24, %v4115_v39 }
 0xb5a   :  { %3432 = vmatmul.mubr.msk.f32.vlgmr.msra.gmra.mxu0 %vm80_vm0, %v1182_v55  ;;  %1621 = vmatprep.subr.mxu0 %v4459_v20 }
 0xb5b   :  { %1312 = vmatprep.mubr.f32.mxu0 %v3843_v33  ;;  %1622 = vmatpush1.msra.mxu0 %v4476_v63 }
 0xb5c   :  { %1623 = vmatprep.subr.mxu0 %v4481_v51 }
 0xb5d   :  { %1624 = vmatpush1.msra.mxu0 %v4487_v18 }
 0xb5e   :  { %1625 = vmatprep.subr.mxu0 %v4493_v56 }
 0xb5f   :  { %1626 = vmatpush1.msra.mxu0 %v4499_v54 }
 0xb60   :  { %1627 = vmatprep.subr.mxu0 %v4505_v2 }
 0xb61   :  { %1628 = vmatpush1.msra.mxu0 %v4511_v28 }
 0xb62   :  { %1629 = vmatprep.subr.mxu0 %v4517_v30 }
 0xb63   :  { %1630 = vmatpush1.msra.mxu0 %v4525_v35 }
 0xb64   :  { %1631 = vmatprep.subr.mxu0 %v4531_v38 }
 0xb65   :  { %1632 = vmatpush1.msra.mxu0 %v4539_v41 }
 0xb66   :  { %1633 = vmatprep.subr.mxu0 %v4546_v12 }
 0xb67   :  { %1634 = vmatpush1.msra.mxu0 %v4558_v43 }
 0xb68   :  { %1635 = vmatprep.subr.mxu0 %v4566_v1 }
 0xc0a   :  { %v1013_v10 = vpop.f32.mrf.mxu0 }
 0xc0b   :  { %v1018_v3 = vadd.f32 %v1013_v10, %v208_v47 }
 0xc0c   :  { %v1015_v7 = vpop.f32.mrf.mxu0 }
 0xc0d   :  { %v3427_v5 = vmul.f32 -1.442695, %v1018_v3  ;;  %v1019_v11 = vadd.f32 %v1015_v7, %v210_v9  ;;  %v1206_v3 = vld [vmem:[%s5505_s7] sm:$0x3] }
 0xc0f   :  { %3582 = vpow2.f32 %v3427_v5  ;;  %v3428_v22 = vmul.f32 -1.442695, %v1019_v11  ;;  %v4626_v5 = vrot.slane %v1206_v3, %v4109_v37 }
 0xc10   :  { %3584 = vtanh.f32 %v1019_v11  ;;  %v216_v11 = vadd.f32 %v4263_v26, %v4121_v46 }
 0xc1a   :  { %v1308_v7 = vpop.f32.mrf.mxu0 }
 0xc1c   :  { %v3583_v13 = vpop.eup %3582 }
 0xc1d   :  { %v1023_v15 = vadd.f32 1.0, %v3583_v13  ;;  %v3585_v17 = vpop.eup %3584  ;;  %v1309_v13 = vadd.f32 %v1308_v7, %v4626_v5 }
 0xc1f   :  { %3586 = vrcp.f32 %v1023_v15 }
 0xc20   :  { %3588 = vpow2.f32 %v3428_v22  ;;  %v4635_v22 = vrot.slane %v1206_v3, %v4118_v45 }
 0xc2c   :  { %v3587_v19 = vpop.eup %3586 }
 0xc2d   :  { %v1034_v21 = vmul.f32 %v3587_v19, %v3585_v17  ;;  %v3589_v23 = vpop.eup %3588  ;;  %v1033_v29 = vmul.f32 %v3587_v19, %v4467_v27 }
 0xc2e   :  { %v1030_v25 = vadd.f32 1.0, %v3589_v23  ;;  %v1310_v23 = vpop.f32.mrf.mxu0 }
 0xc2f   :  { %1036 = vrot.lane.b32.xlu1 %v1034_v21, %s3845_s24  ;;  %v1311_v46 = vadd.f32 %v1310_v23, %v4635_v22 }
 0xc30   :  { %3590 = vrcp.f32 %v1030_v25 }
 0xc3d   :  { %v3591_v32 = vpop.eup %3590 }
 0xca1   :  { %v1037_v31 = vpop.permute.xlu1 %1036 }
 0xca2   :  { %v4470_v16 = vadd.f32 %v1037_v31, %v1033_v29 }
 0xca4   :  { %3592 = vtanh.f32 %v4470_v16 }
 0xcb1   :  { %v3593_v36 = vpop.eup %3592 }
 0xcb2   :  { %v4534_v40 = vmul.f32 %v3593_v36, %v3591_v32 }
 0xcb4   :  { %v4553_v42 = vsel %vm1047_vm14, %v4534_v40, %v4397_v6  ;;  %v4572_v6 = vld [vmem:[%s5504_s6] sm:$0xff]  ;;  %v1050_v23 = vsel %vm1047_vm14, %v4534_v40, 0.0 }
 0xcb5   :  { %1059 = vrot.lane.b32.xlu1 %v4553_v42, %s3845_s24  ;;  %1636 = vmatpush1.msra.mxu0 %v4572_v6 }
 0xcb6   :  { %1841 = vmatprep.subr.mxu0 %v4459_v20 }
 0xcb9   :  { %472 = vrot.lane.b32.xlu1 %v470_v8, %s3845_s24 }
 0xd27   :  { %v1060_v14 = vpop.permute.xlu1 %1059 }
 0xd28   :  { %3429 = vmatmul.mubr.msk.f32.vlgmr.msra.gmra.mxu1 %vm80_vm0, %v1060_v14 }
 0xd29   :  { %1406 = vmatpush1.msra.mxu1 %v4476_v63  ;;  %1453 = vmatprep.mubr.f32.mxu1 %v3843_v33 }
 0xd2a   :  { %1407 = vmatprep.subr.mxu1 %v4481_v51 }
 0xd2b   :  { %1408 = vmatpush1.msra.mxu1 %v4487_v18  ;;  %v473_v44 = vpop.permute.xlu1 %472 }
 0xd2c   :  { %1409 = vmatprep.subr.mxu1 %v4493_v56  ;;  %475 = vst.msk [vmem:[#allocation3 + $0x8] sm:$0xff] %vm80_vm0, %v473_v44 }
 0xd2d   :  { %1410 = vmatpush1.msra.mxu1 %v4499_v54 }
 0xd2e   :  { %1411 = vmatprep.subr.mxu1 %v4505_v2 }
 0xd2f   :  { %1412 = vmatpush1.msra.mxu1 %v4511_v28 }
 0xd30   :  { %1413 = vmatprep.subr.mxu1 %v4517_v30 }
 0xd31   :  { %1414 = vmatpush1.msra.mxu1 %v4525_v35 }
 0xd32   :  { %1415 = vmatprep.subr.mxu1 %v4531_v38 }
 0xd33   :  { %1416 = vmatpush1.msra.mxu1 %v4539_v41  ;;  %v1183_v61 = vld [vmem:[#allocation3 + $0x8] sm:$0xff] }
 0xd34   :  { %1417 = vmatprep.subr.mxu1 %v4546_v12  ;;  %3433 = vmatmul.mubr.msk.f32.gmra.mxu0 %vm80_vm0, %v1183_v61 }
 0xd35   :  { %1418 = vmatpush1.msra.mxu1 %v4558_v43  ;;  %1318 = vmatprep.mubr.f32.mxu0 %v3843_v33 }
 0xd36   :  { %1419 = vmatprep.subr.mxu1 %v4566_v1 }
 0xd37   :  { %1420 = vmatpush1.msra.mxu1 %v4572_v6 }
 0xd38   :  { %1454 = vmatmul.mubr.f32.vlgmr.msra.gmra.mxu1 %v3843_v33  ;;  %1511 = vmatprep.subr.mxu1 %v4459_v20 }
 0xd39   :  { %1512 = vmatpush1.msra.mxu1 %v4476_v63  ;;  %1559 = vmatprep.mubr.f32.mxu1 %v3843_v33 }
 0xd3a   :  { %1513 = vmatprep.subr.mxu1 %v4481_v51 }
 0xd3b   :  { %1514 = vmatpush1.msra.mxu1 %v4487_v18 }
 0xd3c   :  { %1515 = vmatprep.subr.mxu1 %v4493_v56 }
 0xd3d   :  { %1516 = vmatpush1.msra.mxu1 %v4499_v54 }
 0xd3e   :  { %1517 = vmatprep.subr.mxu1 %v4505_v2 }
 0xd3f   :  { %1518 = vmatpush1.msra.mxu1 %v4511_v28 }
 0xd40   :  { %1519 = vmatprep.subr.mxu1 %v4517_v30 }
 0xd41   :  { %1520 = vmatpush1.msra.mxu1 %v4525_v35 }
 0xd42   :  { %1521 = vmatprep.subr.mxu1 %v4531_v38 }
 0xd43   :  { %1522 = vmatpush1.msra.mxu1 %v4539_v41 }
 0xd44   :  { %1523 = vmatprep.subr.mxu1 %v4546_v12 }
 0xd45   :  { %1524 = vmatpush1.msra.mxu1 %v4558_v43 }
 0xd46   :  { %1525 = vmatprep.subr.mxu1 %v4566_v1 }
 0xd47   :  { %1526 = vmatpush1.msra.mxu1 %v4572_v6 }
 0xd48   :  { %1731 = vmatprep.subr.mxu1 %v4459_v20 }
 0xde8   :  { %v1129_v55 = vpop.f32.mrf.mxu1 }
 0xde9   :  { %v1134_v47 = vadd.f32 %v1129_v55, %v214_v49 }
 0xdea   :  { %v1131_v9 = vpop.f32.mrf.mxu1 }
 0xdeb   :  { %v3430_v10 = vmul.f32 -1.442695, %v1134_v47  ;;  %v4631_v15 = vadd.f32 %v1131_v9, %v216_v11 }
 0xded   :  { %3594 = vpow2.f32 %v3430_v10 }
 0xdee   :  { %3596 = vtanh.f32 %v4631_v15 }
 0xdf8   :  { %v1455_v39 = vpop.f32.mrf.mxu1 }
 0xdf9   :  { %v1460_v24 = vadd.f32 %v1455_v39, %v1309_v13  ;;  %v3798_v39 = vld [vmem:[%s5498_s0] sm:$0xff] }
 0xdfa   :  { %v3595_v17 = vpop.eup %3594  ;;  %v1457_v25 = vpop.f32.mrf.mxu1  ;;  %vm1158_vm15 = vcmp.gt.s32.totalorder %v3798_v39, 7 }
 0xdfb   :  { %v1139_v19 = vadd.f32 1.0, %v3595_v17  ;;  %v3440_v21 = vmul.f32 -1.442695, %v1460_v24  ;;  %v3597_v26 = vpop.eup %3596  ;;  %v1461_v29 = vadd.f32 %v1457_v25, %v1311_v46  ;;  %v1159_v17 = vsel %vm1158_vm15, 1, %v3844_v34 }
 0xdfd   :  { %3598 = vrcp.f32 %v1139_v19  ;;  %v3441_v49 = vmul.f32 -1.442695, %v1461_v29  ;;  %v586_v19 = vsel %vm583_vm6, %v4274_v0, 0.0 }
 0xdfe   :  { %3600 = vpow2.f32 %v3440_v21  ;;  %v818_v21 = vsel %vm815_vm10, %v4346_v50, 0.0 }
 0xdff   :  { %3602 = vtanh.f32 %v1461_v29 }
 0xe0a   :  { %v4638_v31 = vpop.eup %3598 }
 0xe0b   :  { %v3601_v32 = vpop.eup %3600  ;;  %v1150_v36 = vmul.f32 %v4638_v31, %v3597_v26  ;;  %v1314_v26 = vpop.f32.mrf.mxu0 }
 0xe0c   :  { %v1465_v8 = vadd.f32 1.0, %v3601_v32  ;;  %v3603_v14 = vpop.eup %3602  ;;  %v1315_v29 = vadd.f32 %v1314_v26, %v4626_v5 }
 0xe0d   :  { %1152 = vrot.lane.b32.xlu1 %v1150_v36, %s3845_s24 }
 0xe0e   :  { %3604 = vrcp.f32 %v1465_v8 }
 0xe0f   :  { %3606 = vpow2.f32 %v3441_v49 }
 0xe1b   :  { %v3605_v44 = vpop.eup %3604 }
 0xe1c   :  { %v1476_v61 = vmul.f32 %v3605_v44, %v3603_v14  ;;  %v3607_v55 = vpop.eup %3606  ;;  %v1475_v10 = vmul.f32 0.0, %v3605_v44  ;;  %v3431_v14 = vmul.f32 -1.442695, %v4631_v15  ;;  %v1316_v44 = vpop.f32.mrf.mxu0 }
 0xe1d   :  { %v1472_v47 = vadd.f32 1.0, %v3607_v55  ;;  %v1317_v49 = vadd.f32 %v1316_v44, %v4635_v22 }
 0xe1e   :  { %1478 = vrot.lane.b32.xlu0 %v1476_v61, %s3845_s24 }
 0xe1f   :  { %3608 = vrcp.f32 %v1472_v47 }
 0xe2c   :  { %v3609_v9 = vpop.eup %3608 }
 0xe90   :  { %v1479_v3 = vpop.permute.xlu0 %1478 }
 0xe91   :  { %v4643_v7 = vadd.f32 %v1479_v3, %v1475_v10  ;;  %v1153_v3 = vpop.permute.xlu1 %1152 }
 0xe93   :  { %3610 = vtanh.f32 %v4643_v7 }
 0xea0   :  { %v3611_v11 = vpop.eup %3610 }
 0xea1   :  { %v1483_v13 = vmul.f32 %v3611_v11, %v3609_v9  ;;  %v4701_v9 = vsel %vm1047_vm14, %v4470_v16, %v4467_v27  ;;  %v702_v27 = vsel %vm699_vm8, %v4311_v58, 0.0 }
 0xea2   :  { %v1149_v15 = vmul.f32 %v4638_v31, %v4701_v9  ;;  %v934_v31 = vsel %vm931_vm12, %v4390_v62, 0.0  ;;  %v4727_v62 = vsel %vm355_vm2, %v4643_v7, 0.0 }
 0xea3   :  { %v4651_v24 = vsel %vm355_vm2, %v1483_v13, 0.0 }
 0xea4   :  { %1487 = vrot.lane.b32.xlu0 %v4651_v24, %s3845_s24  ;;  %v4705_v13 = vadd.f32 %v1153_v3, %v1149_v15 }
 0xea8   :  { %1161 = vperm.xlu0 %3508, %v1159_v17  }
 0xeac   :  { %588 = vrot.lane.b32.xlu0 %v586_v19, %s3845_s24 }
 0xeb0   :  { %820 = vrot.lane.b32.xlu0 %v818_v21, %s3845_s24 }
 0xeb4   :  { %1052 = vrot.lane.b32.xlu0 %v1050_v23, %s3845_s24 }
 0xf16   :  { %v1488_v34 = vpop.permute.xlu0 %1487 }
 0xf17   :  { %1490 = vst.msk [vmem:[#allocation3] sm:$0xff] %vm80_vm0, %v1488_v34  ;;  %3442 = vmatmul.mubr.msk.f32.vlgmr.msra.gmra.mxu1 %vm80_vm0, %v1488_v34 }
 0xf18   :  { %1732 = vmatpush1.msra.mxu1 %v4476_v63  ;;  %1779 = vmatprep.mubr.f32.mxu1 %v3843_v33 }
 0xf19   :  { %1733 = vmatprep.subr.mxu1 %v4481_v51 }
 0xf1a   :  { %1734 = vmatpush1.msra.mxu1 %v4487_v18 }
 0xf1b   :  { %1735 = vmatprep.subr.mxu1 %v4493_v56 }
 0xf1c   :  { %1736 = vmatpush1.msra.mxu1 %v4499_v54 }
 0xf1d   :  { %1737 = vmatprep.subr.mxu1 %v4505_v2 }
 0xf1e   :  { %1738 = vmatpush1.msra.mxu1 %v4511_v28 }
 0xf1f   :  { %1739 = vmatprep.subr.mxu1 %v4517_v30 }
 0xf20   :  { %1740 = vmatpush1.msra.mxu1 %v4525_v35 }
 0xf21   :  { %1741 = vmatprep.subr.mxu1 %v4531_v38 }
 0xf22   :  { %1742 = vmatpush1.msra.mxu1 %v4539_v41 }
 0xf23   :  { %v4682_v0 = vpop.permute.xlu0 %1161  ;;  %1743 = vmatprep.subr.mxu1 %v4546_v12 }
 0xf24   :  { %1744 = vmatpush1.msra.mxu1 %v4558_v43  ;;  %vm1163_vm1 = vcmp.eq.s32.totalorder %v4682_v0, 1 }
 0xf25   :  { %1745 = vmatprep.subr.mxu1 %v4566_v1 }
 0xf26   :  { %1746 = vmatpush1.msra.mxu1 %v4572_v6 }
 0xf27   :  { %v589_v50 = vpop.permute.xlu0 %588  ;;  %1951 = vmatprep.subr.mxu1 %v4459_v20 }
 0xf28   :  { %591 = vst.msk [vmem:[#allocation3 + $0x10] sm:$0xff] %vm80_vm0, %v589_v50 }
 0xf2b   :  { %v821_v40 = vpop.permute.xlu0 %820 }
 0xf2c   :  { %823 = vst.msk [vmem:[#allocation3 + $0x20] sm:$0xff] %vm80_vm0, %v821_v40 }
 0xf2f   :  { %v1053_v25 = vpop.permute.xlu0 %1052  ;;  %v1184_v46 = vld [vmem:[#allocation3 + $0x10] sm:$0xff] }
 0xf30   :  { %1055 = vst.msk [vmem:[#allocation3 + $0x30] sm:$0xff] %vm80_vm0, %v1053_v25  ;;  %3434 = vmatmul.mubr.msk.f32.gmra.mxu0 %vm80_vm0, %v1184_v46 }
 0xf31   :  { %1324 = vmatprep.mubr.f32.mxu0 %v3843_v33 }
 0xfd7   :  { %v1561_v32 = vpop.f32.mrf.mxu1 }
 0xfd8   :  { %v1566_v36 = vadd.f32 %v1561_v32, %v1315_v29 }
 0xfd9   :  { %v1563_v61 = vpop.f32.mrf.mxu1 }
 0xfda   :  { %v3443_v8 = vmul.f32 -1.442695, %v1566_v36  ;;  %v1567_v55 = vadd.f32 %v1563_v61, %v1317_v49  ;;  %v1186_v61 = vld [vmem:[#allocation3 + $0x20] sm:$0xff] }
 0xfdc   :  { %3612 = vpow2.f32 %v3443_v8  ;;  %v3444_v58 = vmul.f32 -1.442695, %v1567_v55 }
 0xfdd   :  { %3614 = vpow2.f32 %v3431_v14 }
 0xfde   :  { %3616 = vtanh.f32 %v1567_v55 }
 0xfe9   :  { %v3613_v47 = vpop.eup %3612 }
 0xfea   :  { %v1571_v10 = vadd.f32 1.0, %v3613_v47  ;;  %v3615_v11 = vpop.eup %3614 }
 0xfeb   :  { %v1146_v39 = vadd.f32 1.0, %v3615_v11  ;;  %v3617_v17 = vpop.eup %3616 }
 0xfec   :  { %3618 = vrcp.f32 %v1571_v10  ;;  %v1188_v10 = vld [vmem:[#allocation3 + $0x30] sm:$0xff] }
 0xfed   :  { %3620 = vtanh.f32 %v4705_v13 }
 0xfee   :  { %3622 = vrcp.f32 %v1146_v39 }
 0xfef   :  { %3624 = vpow2.f32 %v3444_v58 }
 0xff0   :  { %v1320_v15 = vpop.f32.mrf.mxu0 }
 0xff2   :  { %v1322_v11 = vpop.f32.mrf.mxu0 }
 0xff9   :  { %v3619_v19 = vpop.eup %3618 }
 0xffa   :  { %v1582_v21 = vmul.f32 %v3619_v19, %v3617_v17  ;;  %v3621_v16 = vpop.eup %3620  ;;  %v1581_v46 = vmul.f32 %v3619_v19, %v4727_v62 }
 0xffb   :  { %v3623_v23 = vpop.eup %3622 }
 0xffc   :  { %1584 = vrot.lane.b32.xlu1 %v1582_v21, %s3845_s24  ;;  %v4718_v34 = vmul.f32 %v3623_v23, %v3621_v16  ;;  %v3625_v40 = vpop.eup %3624 }
 0xffd   :  { %v1578_v25 = vadd.f32 1.0, %v3625_v40  ;;  %v1321_v40 = vadd.f32 %v1320_v15, %v4626_v5 }
 0xffe   :  { %v1166_v50 = vsel %vm1163_vm1, %v4718_v34, 0.0 }
 0xfff   :  { %3626 = vrcp.f32 %v1578_v25 }
0x1000   :  { %704 = vrot.lane.b32.xlu1 %v702_v27, %s3845_s24 }
0x1004   :  { %936 = vrot.lane.b32.xlu1 %v934_v31, %s3845_s24 }
0x1008   :  { %1168 = vrot.lane.b32.xlu1 %v1166_v50, %s3845_s24 }
0x100c   :  { %v3627_v7 = vpop.eup %3626 }
0x106e   :  { %v1585_v26 = vpop.permute.xlu1 %1584 }
0x106f   :  { %v4730_v29 = vadd.f32 %v1585_v26, %v1581_v46 }
0x1071   :  { %3628 = vtanh.f32 %v4730_v29  ;;  %v1590_v15 = vsel %vm467_vm4, %v4730_v29, %v4727_v62 }
0x1072   :  { %v705_v32 = vpop.permute.xlu1 %704 }
0x1073   :  { %707 = vst.msk [vmem:[#allocation3 + $0x18] sm:$0xff] %vm80_vm0, %v705_v32 }
0x1076   :  { %v937_v36 = vpop.permute.xlu1 %936 }
0x1077   :  { %939 = vst.msk [vmem:[#allocation3 + $0x28] sm:$0xff] %vm80_vm0, %v937_v36  ;;  %v1323_v36 = vadd.f32 %v1322_v11, %v4635_v22 }
0x107a   :  { %v1169_v8 = vpop.permute.xlu1 %1168  ;;  %v1185_v14 = vld [vmem:[#allocation3 + $0x18] sm:$0xff] }
0x107b   :  { %1171 = vst.msk [vmem:[#allocation3 + $0x38] sm:$0xff] %vm80_vm0, %v1169_v8  ;;  %3435 = vmatmul.mubr.msk.f32.gmra.mxu0 %vm80_vm0, %v1185_v14 }
0x107c   :  { %1330 = vmatprep.mubr.f32.mxu0 %v3843_v33 }
0x107e   :  { %v3629_v44 = vpop.eup %3628  ;;  %v1187_v47 = vld [vmem:[#allocation3 + $0x28] sm:$0xff] }
0x107f   :  { %3436 = vmatmul.mubr.msk.f32.gmra.mxu0 %vm80_vm0, %v1186_v61  ;;  %v4739_v49 = vmul.f32 %v3629_v44, %v3627_v7 }
0x1080   :  { %1336 = vmatprep.mubr.f32.mxu0 %v3843_v33 }
0x1081   :  { %v4746_v55 = vsel %vm467_vm4, %v4739_v49, %v4651_v24 }
0x1082   :  { %1601 = vrot.lane.b32.xlu0 %v4746_v55, %s3845_s24  ;;  %v1189_v3 = vld [vmem:[#allocation3 + $0x38] sm:$0xff] }
0x1083   :  { %3437 = vmatmul.mubr.msk.f32.gmra.mxu0 %vm80_vm0, %v1187_v47 }
0x1084   :  { %1342 = vmatprep.mubr.f32.mxu0 %v3843_v33 }
0x1087   :  { %3438 = vmatmul.mubr.msk.f32.gmra.mxu0 %vm80_vm0, %v1188_v10 }
0x1088   :  { %1348 = vmatprep.mubr.f32.mxu0 %v3843_v33 }
0x108b   :  { %3439 = vmatmul.mubr.msk.f32.gmra.mxu0 %vm80_vm0, %v1189_v3 }
0x108c   :  { %1669 = vmatprep.mubr.f32.mxu0 %v3843_v33 }
0x10f4   :  { %v1602_v24 = vpop.permute.xlu0 %1601 }
0x10f5   :  { %3445 = vmatmul.mubr.msk.f32.vlgmr.msra.gmra.mxu0 %vm80_vm0, %v1602_v24 }
0x10f6   :  { %1842 = vmatpush1.msra.mxu0 %v4476_v63  ;;  %1889 = vmatprep.mubr.f32.mxu0 %v3843_v33 }
0x10f7   :  { %1843 = vmatprep.subr.mxu0 %v4481_v51 }
0x10f8   :  { %1844 = vmatpush1.msra.mxu0 %v4487_v18 }
0x10f9   :  { %1845 = vmatprep.subr.mxu0 %v4493_v56 }
0x10fa   :  { %1846 = vmatpush1.msra.mxu0 %v4499_v54 }
0x10fb   :  { %1847 = vmatprep.subr.mxu0 %v4505_v2 }
0x10fc   :  { %1848 = vmatpush1.msra.mxu0 %v4511_v28 }
0x10fd   :  { %1849 = vmatprep.subr.mxu0 %v4517_v30 }
0x10fe   :  { %1850 = vmatpush1.msra.mxu0 %v4525_v35 }
0x10ff   :  { %1851 = vmatprep.subr.mxu0 %v4531_v38 }
0x1100   :  { %1852 = vmatpush1.msra.mxu0 %v4539_v41 }
0x1101   :  { %1853 = vmatprep.subr.mxu0 %v4546_v12 }
0x1102   :  { %1854 = vmatpush1.msra.mxu0 %v4558_v43 }
0x1103   :  { %1855 = vmatprep.subr.mxu0 %v4566_v1 }
0x1104   :  { %1856 = vmatpush1.msra.mxu0 %v4572_v6 }
0x1105   :  { %2061 = vmatprep.subr.mxu0 %v4459_v20 }
0x113b   :  { %v1326_v39 = vpop.f32.mrf.mxu0 }
0x113c   :  { %v1327_v62 = vadd.f32 %v1326_v39, %v4626_v5 }
0x113d   :  { %v4774_v17 = vpop.f32.mrf.mxu0 }
0x113f   :  { %v4776_v19 = vpop.f32.mrf.mxu0 }
0x1141   :  { %v4778_v21 = vpop.f32.mrf.mxu0 }
0x1143   :  { %v4780_v27 = vpop.f32.mrf.mxu0 }
0x1145   :  { %v4782_v16 = vpop.f32.mrf.mxu0 }
0x1147   :  { %v4784_v31 = vpop.f32.mrf.mxu0 }
0x1149   :  { %v4786_v23 = vpop.f32.mrf.mxu0 }
0x114b   :  { %v4788_v50 = vpop.f32.mrf.mxu0 }
0x114d   :  { %v4790_v58 = vpop.f32.mrf.mxu0 }
0x11b5   :  { %v1671_v25 = vpop.f32.mrf.mxu0 }
0x11b6   :  { %v1676_v46 = vadd.f32 %v1671_v25, %v1321_v40 }
0x11b7   :  { %v1673_v32 = vpop.f32.mrf.mxu0 }
0x11b8   :  { %v3446_v26 = vmul.f32 -1.442695, %v1676_v46  ;;  %v1677_v8 = vadd.f32 %v1673_v32, %v1323_v36 }
0x11ba   :  { %3630 = vpow2.f32 %v3446_v26  ;;  %v3447_v10 = vmul.f32 -1.442695, %v1677_v8 }
0x11bb   :  { %3632 = vtanh.f32 %v1677_v8 }
0x11c7   :  { %v3631_v14 = vpop.eup %3630 }
0x11c8   :  { %v1681_v7 = vadd.f32 1.0, %v3631_v14  ;;  %v3633_v44 = vpop.eup %3632 }
0x11ca   :  { %3634 = vrcp.f32 %v1681_v7 }
0x11cb   :  { %3636 = vpow2.f32 %v3447_v10 }
0x11d7   :  { %v3635_v61 = vpop.eup %3634 }
0x11d8   :  { %v1692_v47 = vmul.f32 %v3635_v61, %v3633_v44  ;;  %v3637_v3 = vpop.eup %3636  ;;  %v1691_v11 = vmul.f32 %v3635_v61, %v1590_v15  ;;  %v1329_v44 = vadd.f32 %v4774_v17, %v4635_v22 }
0x11d9   :  { %v1688_v24 = vadd.f32 1.0, %v3637_v3 }
0x11da   :  { %1694 = vrot.lane.b32.xlu1 %v1692_v47, %s3845_s24 }
0x11db   :  { %3638 = vrcp.f32 %v1688_v24 }
0x11e8   :  { %v3639_v46 = vpop.eup %3638 }
0x124c   :  { %v1695_v40 = vpop.permute.xlu1 %1694 }
0x124d   :  { %v1697_v25 = vadd.f32 %v1695_v40, %v1691_v11 }
0x124f   :  { %3640 = vtanh.f32 %v1697_v25 }
0x125c   :  { %v3641_v26 = vpop.eup %3640 }
0x125d   :  { %v4799_v32 = vmul.f32 %v3641_v26, %v3639_v46  ;;  %v1700_v46 = vsel %vm583_vm6, %v1697_v25, %v1590_v15  ;;  %v1333_v15 = vadd.f32 %v4776_v19, %v4626_v5 }
0x125f   :  { %v1701_v36 = vsel %vm583_vm6, %v4799_v32, %v4746_v55 }
0x1260   :  { %1711 = vrot.lane.b32.xlu0 %v1701_v36, %s3845_s24 }
0x12d2   :  { %v1712_v8 = vpop.permute.xlu0 %1711 }
0x12d3   :  { %3448 = vmatmul.mubr.msk.f32.vlgmr.msra.gmra.mxu1 %vm80_vm0, %v1712_v8 }
0x12d4   :  { %1952 = vmatpush1.msra.mxu1 %v4476_v63  ;;  %1999 = vmatprep.mubr.f32.mxu1 %v3843_v33 }
0x12d5   :  { %1953 = vmatprep.subr.mxu1 %v4481_v51 }
0x12d6   :  { %1954 = vmatpush1.msra.mxu1 %v4487_v18 }
0x12d7   :  { %1955 = vmatprep.subr.mxu1 %v4493_v56 }
0x12d8   :  { %1956 = vmatpush1.msra.mxu1 %v4499_v54 }
0x12d9   :  { %1957 = vmatprep.subr.mxu1 %v4505_v2 }
0x12da   :  { %1958 = vmatpush1.msra.mxu1 %v4511_v28 }
0x12db   :  { %1959 = vmatprep.subr.mxu1 %v4517_v30 }
0x12dc   :  { %1960 = vmatpush1.msra.mxu1 %v4525_v35 }
0x12dd   :  { %1961 = vmatprep.subr.mxu1 %v4531_v38 }
0x12de   :  { %1962 = vmatpush1.msra.mxu1 %v4539_v41 }
0x12df   :  { %1963 = vmatprep.subr.mxu1 %v4546_v12 }
0x12e0   :  { %1964 = vmatpush1.msra.mxu1 %v4558_v43 }
0x12e1   :  { %1965 = vmatprep.subr.mxu1 %v4566_v1 }
0x12e2   :  { %1966 = vmatpush1.msra.mxu1 %v4572_v6 }
0x12e3   :  { %2171 = vmatprep.subr.mxu1 %v4459_v20 }
0x1393   :  { %v1781_v29 = vpop.f32.mrf.mxu1 }
0x1394   :  { %v1786_v55 = vadd.f32 %v1781_v29, %v1327_v62 }
0x1395   :  { %v1783_v7 = vpop.f32.mrf.mxu1 }
0x1396   :  { %v3449_v14 = vmul.f32 -1.442695, %v1786_v55  ;;  %v1787_v61 = vadd.f32 %v1783_v7, %v1329_v44 }
0x1398   :  { %3642 = vpow2.f32 %v3449_v14  ;;  %v3450_v20 = vmul.f32 -1.442695, %v1787_v61 }
0x1399   :  { %3644 = vtanh.f32 %v1787_v61 }
0x13a5   :  { %v3643_v47 = vpop.eup %3642 }
0x13a6   :  { %v1791_v10 = vadd.f32 1.0, %v3643_v47  ;;  %v3645_v3 = vpop.eup %3644  ;;  %v1335_v47 = vadd.f32 %v4778_v21, %v4635_v22 }
0x13a8   :  { %3646 = vrcp.f32 %v1791_v10 }
0x13a9   :  { %3648 = vpow2.f32 %v3450_v20 }
0x13b5   :  { %v3647_v24 = vpop.eup %3646 }
0x13b6   :  { %v1802_v11 = vmul.f32 %v3647_v24, %v3645_v3  ;;  %v3649_v39 = vpop.eup %3648  ;;  %v1801_v26 = vmul.f32 %v3647_v24, %v1700_v46 }
0x13b7   :  { %v1798_v40 = vadd.f32 1.0, %v3649_v39 }
0x13b8   :  { %1804 = vrot.lane.b32.xlu1 %v1802_v11, %s3845_s24 }
0x13b9   :  { %3650 = vrcp.f32 %v1798_v40 }
0x13c6   :  { %v3651_v62 = vpop.eup %3650 }
0x142a   :  { %v1805_v8 = vpop.permute.xlu1 %1804 }
0x142b   :  { %v1807_v17 = vadd.f32 %v1805_v8, %v1801_v26 }
0x142d   :  { %3652 = vtanh.f32 %v1807_v17  ;;  %v1810_v8 = vsel %vm699_vm8, %v1807_v17, %v1700_v46 }
0x143a   :  { %v3653_v29 = vpop.eup %3652 }
0x143b   :  { %v4830_v55 = vmul.f32 %v3653_v29, %v3651_v62 }
0x143d   :  { %v1811_v14 = vsel %vm699_vm8, %v4830_v55, %v1701_v36 }
0x143e   :  { %1821 = vrot.lane.b32.xlu0 %v1811_v14, %s3845_s24 }
0x14b0   :  { %v1822_v7 = vpop.permute.xlu0 %1821 }
0x14b1   :  { %3451 = vmatmul.mubr.msk.f32.vlgmr.msra.gmra.mxu0 %vm80_vm0, %v1822_v7 }
0x14b2   :  { %2062 = vmatpush1.msra.mxu0 %v4476_v63  ;;  %2109 = vmatprep.mubr.f32.mxu0 %v3843_v33 }
0x14b3   :  { %2063 = vmatprep.subr.mxu0 %v4481_v51 }
0x14b4   :  { %2064 = vmatpush1.msra.mxu0 %v4487_v18 }
0x14b5   :  { %2065 = vmatprep.subr.mxu0 %v4493_v56 }
0x14b6   :  { %2066 = vmatpush1.msra.mxu0 %v4499_v54 }
0x14b7   :  { %2067 = vmatprep.subr.mxu0 %v4505_v2 }
0x14b8   :  { %2068 = vmatpush1.msra.mxu0 %v4511_v28 }
0x14b9   :  { %2069 = vmatprep.subr.mxu0 %v4517_v30 }
0x14ba   :  { %2070 = vmatpush1.msra.mxu0 %v4525_v35 }
0x14bb   :  { %2071 = vmatprep.subr.mxu0 %v4531_v38 }
0x14bc   :  { %2072 = vmatpush1.msra.mxu0 %v4539_v41 }
0x14bd   :  { %2073 = vmatprep.subr.mxu0 %v4546_v12 }
0x14be   :  { %2074 = vmatpush1.msra.mxu0 %v4558_v43 }
0x14bf   :  { %2075 = vmatprep.subr.mxu0 %v4566_v1 }
0x14c0   :  { %2076 = vmatpush1.msra.mxu0 %v4572_v6 }
0x1571   :  { %v1891_v25 = vpop.f32.mrf.mxu0 }
0x1572   :  { %v1896_v36 = vadd.f32 %v1891_v25, %v1333_v15 }
0x1573   :  { %v1893_v61 = vpop.f32.mrf.mxu0 }
0x1574   :  { %v3452_v44 = vmul.f32 -1.442695, %v1896_v36  ;;  %v1897_v10 = vadd.f32 %v1893_v61, %v1335_v47 }
0x1576   :  { %3654 = vpow2.f32 %v3452_v44  ;;  %v3453_v40 = vmul.f32 -1.442695, %v1897_v10 }
0x1577   :  { %3656 = vtanh.f32 %v1897_v10 }
0x1583   :  { %v3655_v3 = vpop.eup %3654 }
0x1584   :  { %v1901_v24 = vadd.f32 1.0, %v3655_v3  ;;  %v3657_v11 = vpop.eup %3656 }
0x1586   :  { %3658 = vrcp.f32 %v1901_v24  ;;  %v2292_v24 = vld [vmem:[%s5506_s8 + $0x70] sm:$0xff] }
0x1587   :  { %3660 = vpow2.f32 %v3453_v40  ;;  %v2289_v40 = vld [vmem:[%s5506_s8 + $0x58] sm:$0xff] }
0x1593   :  { %v3659_v20 = vpop.eup %3658 }
0x1594   :  { %v1912_v39 = vmul.f32 %v3659_v20, %v3657_v11  ;;  %v3661_v19 = vpop.eup %3660  ;;  %v1911_v62 = vmul.f32 %v3659_v20, %v1810_v8  ;;  %v2291_v20 = vld [vmem:[%s5506_s8 + $0x68] sm:$0xff] }
0x1595   :  { %v1908_v26 = vadd.f32 1.0, %v3661_v19  ;;  %v2288_v19 = vld [vmem:[%s5506_s8 + $0x50] sm:$0xff] }
0x1596   :  { %1914 = vrot.lane.b32.xlu1 %v1912_v39, %s3845_s24  ;;  %v2290_v39 = vld [vmem:[%s5506_s8 + $0x60] sm:$0xff] }
0x1597   :  { %3662 = vrcp.f32 %v1908_v26  ;;  %v2287_v26 = vld [vmem:[%s5506_s8 + $0x48] sm:$0xff] }
0x15a4   :  { %v3663_v7 = vpop.eup %3662 }
0x1608   :  { %v1915_v29 = vpop.permute.xlu1 %1914 }
0x1609   :  { %v1917_v21 = vadd.f32 %v1915_v29, %v1911_v62  ;;  %v2285_v62 = vld [vmem:[%s5506_s8 + $0x38] sm:$0xff]  ;;  %v2284_v29 = vld [vmem:[%s5506_s8 + $0x30] sm:$0xff] }
0x160b   :  { %3664 = vtanh.f32 %v1917_v21 }
0x1618   :  { %v3665_v15 = vpop.eup %3664 }
0x1619   :  { %v4860_v25 = vmul.f32 %v3665_v15, %v3663_v7  ;;  %v2282_v7 = vld [vmem:[%s5506_s8 + $0x20] sm:$0xff]  ;;  %v2281_v15 = vld [vmem:[%s5506_s8 + $0x18] sm:$0xff] }
0x161b   :  { %v1921_v36 = vsel %vm815_vm10, %v4860_v25, %v1811_v14 }
0x161c   :  { %1931 = vrot.lane.b32.xlu0 %v1921_v36, %s3845_s24 }
0x168e   :  { %v1932_v44 = vpop.permute.xlu0 %1931 }
0x168f   :  { %3454 = vmatmul.mubr.msk.f32.vlgmr.msra.gmra.mxu1 %vm80_vm0, %v1932_v44  ;;  %v2279_v44 = vld [vmem:[%s5506_s8 + $0x8] sm:$0xff] }
0x1690   :  { %2172 = vmatpush1.msra.mxu1 %v4476_v63  ;;  %2219 = vmatprep.mubr.f32.mxu1 %v3843_v33  ;;  %v1339_v63 = vadd.f32 %v4780_v27, %v4626_v5 }
0x1691   :  { %2173 = vmatprep.subr.mxu1 %v4481_v51 }
0x1692   :  { %2174 = vmatpush1.msra.mxu1 %v4487_v18 }
0x1693   :  { %2175 = vmatprep.subr.mxu1 %v4493_v56 }
0x1694   :  { %2176 = vmatpush1.msra.mxu1 %v4499_v54 }
0x1695   :  { %2177 = vmatprep.subr.mxu1 %v4505_v2  ;;  %v1341_v2 = vadd.f32 %v4782_v16, %v4635_v22  ;;  %v4893_v16 = vsel %vm815_vm10, %v1917_v21, %v1810_v8  ;;  %v2286_v8 = vld [vmem:[%s5506_s8 + $0x40] sm:$0xff]  ;;  %v2283_v21 = vld [vmem:[%s5506_s8 + $0x28] sm:$0xff] }
0x1696   :  { %2178 = vmatpush1.msra.mxu1 %v4511_v28 }
0x1697   :  { %2179 = vmatprep.subr.mxu1 %v4517_v30 }
0x1698   :  { %2180 = vmatpush1.msra.mxu1 %v4525_v35 }
0x1699   :  { %2181 = vmatprep.subr.mxu1 %v4531_v38 }
0x169a   :  { %2182 = vmatpush1.msra.mxu1 %v4539_v41 }
0x169b   :  { %2183 = vmatprep.subr.mxu1 %v4546_v12 }
0x169c   :  { %2184 = vmatpush1.msra.mxu1 %v4558_v43  ;;  %v2293_v43 = vld [vmem:[%s5506_s8 + $0x78] sm:$0xff] }
0x169d   :  { %2185 = vmatprep.subr.mxu1 %v4566_v1  ;;  %2346 = vmatprep.subr.mxu0 %v2293_v43 }
0x169e   :  { %2186 = vmatpush1.msra.mxu1 %v4572_v6 }
0x174f   :  { %v2001_v51 = vpop.f32.mrf.mxu1 }
0x1750   :  { %v2006_v18 = vadd.f32 %v2001_v51, %v1339_v63  ;;  %v2278_v63 = vld [vmem:[%s5506_s8] sm:$0xff] }
0x1751   :  { %v2003_v54 = vpop.f32.mrf.mxu1  ;;  %v2270_v51 = vld [vmem:[#allocation3] sm:$0xff] }
0x1752   :  { %v3455_v56 = vmul.f32 -1.442695, %v2006_v18  ;;  %v2007_v28 = vadd.f32 %v2003_v54, %v1341_v2  ;;  %v1345_v18 = vadd.f32 %v4784_v31, %v4626_v5  ;;  %v4965_v31 = vld [vmem:[%s5507_s9 + $0x78] sm:$0xff] }
0x1753   :  { %2493 = vmatprep.subr.mxu1 %v4965_v31 }
0x1754   :  { %3666 = vpow2.f32 %v3455_v56  ;;  %v3456_v1 = vmul.f32 -1.442695, %v2007_v28 }
0x1755   :  { %3668 = vtanh.f32 %v2007_v28 }
0x1761   :  { %v3667_v30 = vpop.eup %3666 }
0x1762   :  { %v2011_v35 = vadd.f32 1.0, %v3667_v30  ;;  %v3669_v38 = vpop.eup %3668  ;;  %v1347_v30 = vadd.f32 %v4786_v23, %v4635_v22 }
0x1764   :  { %3670 = vrcp.f32 %v2011_v35 }
0x1765   :  { %3672 = vpow2.f32 %v3456_v1 }
0x1771   :  { %v3671_v41 = vpop.eup %3670 }
0x1772   :  { %v2022_v12 = vmul.f32 %v3671_v41, %v3669_v38  ;;  %v3673_v6 = vpop.eup %3672  ;;  %v2021_v46 = vmul.f32 %v3671_v41, %v4893_v16 }
0x1773   :  { %v2018_v27 = vadd.f32 1.0, %v3673_v6 }
0x1774   :  { %2024 = vrot.lane.b32.xlu1 %v2022_v12, %s3845_s24 }
0x1775   :  { %3674 = vrcp.f32 %v2018_v27 }
0x1782   :  { %v3675_v61 = vpop.eup %3674 }
0x17e6   :  { %v2025_v17 = vpop.permute.xlu1 %2024 }
0x17e7   :  { %v4896_v14 = vadd.f32 %v2025_v17, %v2021_v46 }
0x17e9   :  { %3676 = vtanh.f32 %v4896_v14  ;;  %v4973_v46 = vsel %vm931_vm12, %v4896_v14, %v4893_v16  ;;  %v4993_v16 = vld [vmem:[%s5507_s9 + $0x60] sm:$0xff]  ;;  %v4999_v14 = vld [vmem:[%s5507_s9 + $0x58] sm:$0xff] }
0x17f6   :  { %v3677_v47 = vpop.eup %3676 }
0x17f7   :  { %v4899_v10 = vmul.f32 %v3677_v47, %v3675_v61 }
0x17f9   :  { %v4904_v3 = vsel %vm931_vm12, %v4899_v10, %v1921_v36  ;;  %v2280_v36 = vld [vmem:[%s5506_s8 + $0x10] sm:$0xff] }
0x17fa   :  { %2041 = vrot.lane.b32.xlu0 %v4904_v3, %s3845_s24 }
0x186c   :  { %v2042_v11 = vpop.permute.xlu0 %2041 }
0x186d   :  { %3457 = vmatmul.mubr.msk.f32.vlgmr.msra.gmra.mxu0 %vm80_vm0, %v2042_v11  ;;  %v4987_v11 = vld [vmem:[%s5507_s9 + $0x68] sm:$0xff] }
0x186e   :  { %2347 = vmatpush1.msra.mxu0 %v2292_v24  ;;  %2394 = vmatprep.mubr.f32.mxu0 %v3843_v33  ;;  %v4982_v24 = vld [vmem:[%s5507_s9 + $0x70] sm:$0xff] }
0x186f   :  { %2348 = vmatprep.subr.mxu0 %v2291_v20  ;;  %v5005_v20 = vld [vmem:[%s5507_s9 + $0x50] sm:$0xff] }
0x1870   :  { %2349 = vmatpush1.msra.mxu0 %v2290_v39  ;;  %v5011_v39 = vld [vmem:[%s5507_s9 + $0x48] sm:$0xff] }
0x1871   :  { %2350 = vmatprep.subr.mxu0 %v2289_v40  ;;  %v5017_v40 = vld [vmem:[%s5507_s9 + $0x40] sm:$0xff] }
0x1872   :  { %2351 = vmatpush1.msra.mxu0 %v2288_v19  ;;  %v5023_v19 = vld [vmem:[%s5507_s9 + $0x38] sm:$0xff] }
0x1873   :  { %2352 = vmatprep.subr.mxu0 %v2287_v26 }
0x1874   :  { %2353 = vmatpush1.msra.mxu0 %v2286_v8  ;;  %v5029_v8 = vld [vmem:[%s5507_s9 + $0x30] sm:$0xff] }
0x1875   :  { %2354 = vmatprep.subr.mxu0 %v2285_v62 }
0x1876   :  { %2355 = vmatpush1.msra.mxu0 %v2284_v29  ;;  %v5035_v29 = vld [vmem:[%s5507_s9 + $0x28] sm:$0xff] }
0x1877   :  { %2356 = vmatprep.subr.mxu0 %v2283_v21 }
0x1878   :  { %2357 = vmatpush1.msra.mxu0 %v2282_v7  ;;  %v5043_v7 = vld [vmem:[%s5507_s9 + $0x20] sm:$0xff] }
0x1879   :  { %2358 = vmatprep.subr.mxu0 %v2281_v15  ;;  %v5049_v15 = vld [vmem:[%s5507_s9 + $0x18] sm:$0xff] }
0x187a   :  { %2359 = vmatpush1.msra.mxu0 %v2280_v36 }
0x187b   :  { %2360 = vmatprep.subr.mxu0 %v2279_v44  ;;  %v5061_v44 = vld [vmem:[%s5507_s9 + $0x10] sm:$0xff] }
0x187c   :  { %2361 = vmatpush1.msra.mxu0 %v2278_v63  ;;  %v5069_v63 = vld [vmem:[%s5507_s9 + $0x8] sm:$0xff] }
0x187d   :  { %3463 = vmatmul.mubr.msk.f32.vlgmr.msra.gmra.mxu0 %vm80_vm0, %v2270_v51  ;;  %2710 = vmatprep.subr.mxu0 %v4965_v31  ;;  %v1592_v51 = vsel %vm467_vm4, %v4739_v49, 0.0 }
0x187e   :  { %2400 = vmatprep.mubr.f32.mxu0 %v3843_v33  ;;  %2711 = vmatpush1.msra.mxu0 %v4982_v24 }
0x187f   :  { %2712 = vmatprep.subr.mxu0 %v4987_v11 }
0x1880   :  { %2713 = vmatpush1.msra.mxu0 %v4993_v16 }
0x1881   :  { %2714 = vmatprep.subr.mxu0 %v4999_v14 }
0x1882   :  { %2715 = vmatpush1.msra.mxu0 %v5005_v20 }
0x1883   :  { %2716 = vmatprep.subr.mxu0 %v5011_v39 }
0x1884   :  { %2717 = vmatpush1.msra.mxu0 %v5017_v40 }
0x1885   :  { %2718 = vmatprep.subr.mxu0 %v5023_v19 }
0x1886   :  { %2719 = vmatpush1.msra.mxu0 %v5029_v8 }
0x1887   :  { %2720 = vmatprep.subr.mxu0 %v5035_v29 }
0x1888   :  { %2721 = vmatpush1.msra.mxu0 %v5043_v7 }
0x1889   :  { %2722 = vmatprep.subr.mxu0 %v5049_v15 }
0x188a   :  { %2723 = vmatpush1.msra.mxu0 %v5061_v44 }
0x188b   :  { %2724 = vmatprep.subr.mxu0 %v5069_v63 }
0x192d   :  { %v2111_v56 = vpop.f32.mrf.mxu0 }
0x192e   :  { %v2116_v54 = vadd.f32 %v2111_v56, %v1345_v18 }
0x192f   :  { %v2113_v28 = vpop.f32.mrf.mxu0 }
0x1930   :  { %v3458_v2 = vmul.f32 -1.442695, %v2116_v54  ;;  %v2117_v35 = vadd.f32 %v2113_v28, %v1347_v30  ;;  %v1351_v54 = vadd.f32 %v4788_v50, %v4626_v5 }
0x1932   :  { %3678 = vpow2.f32 %v3458_v2  ;;  %v3459_v23 = vmul.f32 -1.442695, %v2117_v35 }
0x1933   :  { %3680 = vtanh.f32 %v2117_v35  ;;  %v2294_v35 = vld [vmem:[%s5508_s10] sm:$0x3] }
0x193f   :  { %v3679_v38 = vpop.eup %3678 }
0x1940   :  { %v2121_v41 = vadd.f32 1.0, %v3679_v38  ;;  %v3681_v12 = vpop.eup %3680  ;;  %v5129_v38 = vrot.slane %v2294_v35, %v4109_v37 }
0x1942   :  { %3682 = vrcp.f32 %v2121_v41  ;;  %v2396_v41 = vpop.f32.mrf.mxu0 }
0x1943   :  { %3684 = vpow2.f32 %v3459_v23 }
0x1944   :  { %v2398_v37 = vpop.f32.mrf.mxu0 }
0x194f   :  { %v3683_v43 = vpop.eup %3682 }
0x1950   :  { %v2132_v1 = vmul.f32 %v3683_v43, %v3681_v12  ;;  %v3685_v6 = vpop.eup %3684  ;;  %v2131_v17 = vmul.f32 %v3683_v43, %v4973_v46  ;;  %v1353_v43 = vadd.f32 %v4790_v58, %v4635_v22 }
0x1951   :  { %v2128_v27 = vadd.f32 1.0, %v3685_v6 }
0x1952   :  { %2134 = vrot.lane.b32.xlu1 %v2132_v1, %s3845_s24  ;;  %v2397_v1 = vadd.f32 %v2396_v41, %v5129_v38 }
0x1953   :  { %3686 = vrcp.f32 %v2128_v27 }
0x1960   :  { %v3687_v26 = vpop.eup %3686 }
0x19c4   :  { %v2135_v61 = vpop.permute.xlu1 %2134 }
0x19c5   :  { %v4976_v47 = vadd.f32 %v2135_v61, %v2131_v17  ;;  %v5135_v61 = vrot.slane %v2294_v35, %v4118_v45  ;;  %v1922_v45 = vsel %vm815_vm10, %v4860_v25, 0.0 }
0x19c7   :  { %3688 = vtanh.f32 %v4976_v47  ;;  %v5156_v25 = vsel %vm1047_vm14, %v4976_v47, %v4973_v46 }
0x19d4   :  { %v3689_v62 = vpop.eup %3688 }
0x19d5   :  { %v5038_v21 = vmul.f32 %v3689_v62, %v3687_v26  ;;  %v2399_v62 = vadd.f32 %v2398_v37, %v5135_v61 }
0x19d7   :  { %v5056_v36 = vsel %vm1047_vm14, %v5038_v21, %v4904_v3  ;;  %v5075_v3 = vld [vmem:[%s5507_s9] sm:$0xff] }
0x19d8   :  { %2151 = vrot.lane.b32.xlu0 %v5056_v36, %s3845_s24  ;;  %2725 = vmatpush1.msra.mxu0 %v5075_v3 }
0x19d9   :  { %2932 = vmatprep.subr.mxu0 %v4965_v31 }
0x19dc   :  { %1594 = vrot.lane.b32.xlu0 %v1592_v51, %s3845_s24 }
0x1a4a   :  { %v2152_v18 = vpop.permute.xlu0 %2151 }
0x1a4b   :  { %3460 = vmatmul.mubr.msk.f32.vlgmr.msra.gmra.mxu1 %vm80_vm0, %v2152_v18 }
0x1a4c   :  { %2494 = vmatpush1.msra.mxu1 %v4982_v24  ;;  %2541 = vmatprep.mubr.f32.mxu1 %v3843_v33 }
0x1a4d   :  { %2495 = vmatprep.subr.mxu1 %v4987_v11 }
0x1a4e   :  { %2496 = vmatpush1.msra.mxu1 %v4993_v16  ;;  %v1595_v56 = vpop.permute.xlu0 %1594 }
0x1a4f   :  { %2497 = vmatprep.subr.mxu1 %v4999_v14  ;;  %1597 = vst.msk [vmem:[#allocation3 + $0x8] sm:$0xff] %vm80_vm0, %v1595_v56 }
0x1a50   :  { %2498 = vmatpush1.msra.mxu1 %v5005_v20 }
0x1a51   :  { %2499 = vmatprep.subr.mxu1 %v5011_v39 }
0x1a52   :  { %2500 = vmatpush1.msra.mxu1 %v5017_v40 }
0x1a53   :  { %2501 = vmatprep.subr.mxu1 %v5023_v19 }
0x1a54   :  { %2502 = vmatpush1.msra.mxu1 %v5029_v8 }
0x1a55   :  { %2503 = vmatprep.subr.mxu1 %v5035_v29 }
0x1a56   :  { %2504 = vmatpush1.msra.mxu1 %v5043_v7  ;;  %v2271_v49 = vld [vmem:[#allocation3 + $0x8] sm:$0xff] }
0x1a57   :  { %2505 = vmatprep.subr.mxu1 %v5049_v15  ;;  %3464 = vmatmul.mubr.msk.f32.gmra.mxu0 %vm80_vm0, %v2271_v49 }
0x1a58   :  { %2506 = vmatpush1.msra.mxu1 %v5061_v44  ;;  %2406 = vmatprep.mubr.f32.mxu0 %v3843_v33 }
0x1a59   :  { %2507 = vmatprep.subr.mxu1 %v5069_v63 }
0x1a5a   :  { %2508 = vmatpush1.msra.mxu1 %v5075_v3 }
0x1a5b   :  { %2542 = vmatmul.mubr.f32.vlgmr.msra.gmra.mxu1 %v3843_v33  ;;  %2599 = vmatprep.subr.mxu1 %v4965_v31 }
0x1a5c   :  { %2600 = vmatpush1.msra.mxu1 %v4982_v24  ;;  %2647 = vmatprep.mubr.f32.mxu1 %v3843_v33 }
0x1a5d   :  { %2601 = vmatprep.subr.mxu1 %v4987_v11 }
0x1a5e   :  { %2602 = vmatpush1.msra.mxu1 %v4993_v16 }
0x1a5f   :  { %2603 = vmatprep.subr.mxu1 %v4999_v14 }
0x1a60   :  { %2604 = vmatpush1.msra.mxu1 %v5005_v20 }
0x1a61   :  { %2605 = vmatprep.subr.mxu1 %v5011_v39 }
0x1a62   :  { %2606 = vmatpush1.msra.mxu1 %v5017_v40 }
0x1a63   :  { %2607 = vmatprep.subr.mxu1 %v5023_v19 }
0x1a64   :  { %2608 = vmatpush1.msra.mxu1 %v5029_v8 }
0x1a65   :  { %2609 = vmatprep.subr.mxu1 %v5035_v29 }
0x1a66   :  { %2610 = vmatpush1.msra.mxu1 %v5043_v7 }
0x1a67   :  { %2611 = vmatprep.subr.mxu1 %v5049_v15 }
0x1a68   :  { %2612 = vmatpush1.msra.mxu1 %v5061_v44 }
0x1a69   :  { %2613 = vmatprep.subr.mxu1 %v5069_v63 }
0x1a6a   :  { %2614 = vmatpush1.msra.mxu1 %v5075_v3 }
0x1a6b   :  { %2821 = vmatprep.subr.mxu1 %v4965_v31 }
0x1b0b   :  { %v2221_v2 = vpop.f32.mrf.mxu1 }
0x1b0c   :  { %v2226_v28 = vadd.f32 %v2221_v2, %v1351_v54  ;;  %v1702_v54 = vsel %vm583_vm6, %v4799_v32, 0.0  ;;  %v2142_v2 = vsel %vm1047_vm14, %v5038_v21, 0.0 }
0x1b0d   :  { %v2223_v12 = vpop.f32.mrf.mxu1 }
0x1b0e   :  { %v3461_v30 = vmul.f32 -1.442695, %v2226_v28  ;;  %v2227_v23 = vadd.f32 %v2223_v12, %v1353_v43 }
0x1b10   :  { %3690 = vpow2.f32 %v3461_v30  ;;  %v3462_v32 = vmul.f32 -1.442695, %v2227_v23 }
0x1b11   :  { %3692 = vtanh.f32 %v2227_v23 }
0x1b1b   :  { %v2543_v5 = vpop.f32.mrf.mxu1 }
0x1b1c   :  { %v2548_v50 = vadd.f32 %v2543_v5, %v2397_v1 }
0x1b1d   :  { %v3691_v6 = vpop.eup %3690  ;;  %v2545_v26 = vpop.f32.mrf.mxu1 }
0x1b1e   :  { %v2231_v27 = vadd.f32 1.0, %v3691_v6  ;;  %v3471_v17 = vmul.f32 -1.442695, %v2548_v50  ;;  %v3693_v51 = vpop.eup %3692  ;;  %v2549_v22 = vadd.f32 %v2545_v26, %v2399_v62 }
0x1b20   :  { %3694 = vrcp.f32 %v2231_v27  ;;  %v3472_v12 = vmul.f32 -1.442695, %v2549_v22 }
0x1b21   :  { %3696 = vpow2.f32 %v3471_v17 }
0x1b22   :  { %3698 = vtanh.f32 %v2549_v22 }
0x1b2d   :  { %v3695_v58 = vpop.eup %3694 }
0x1b2e   :  { %v3697_v18 = vpop.eup %3696  ;;  %v2242_v56 = vmul.f32 %v3695_v58, %v3693_v51  ;;  %v2241_v21 = vmul.f32 %v3695_v58, %v5156_v25 }
0x1b2f   :  { %v2553_v49 = vadd.f32 1.0, %v3697_v18  ;;  %v3699_v28 = vpop.eup %3698 }
0x1b30   :  { %2244 = vrot.lane.b32.xlu0 %v2242_v56, %s3845_s24 }
0x1b31   :  { %3700 = vrcp.f32 %v2553_v49 }
0x1b32   :  { %3702 = vpow2.f32 %v3462_v32 }
0x1b33   :  { %3704 = vpow2.f32 %v3472_v12 }
0x1b34   :  { %1704 = vrot.lane.b32.xlu0 %v1702_v54, %s3845_s24 }
0x1b38   :  { %1924 = vrot.lane.b32.xlu0 %v1922_v45, %s3845_s24  ;;  %v2402_v45 = vpop.f32.mrf.mxu0 }
0x1b3a   :  { %v2404_v32 = vpop.f32.mrf.mxu0 }
0x1b3b   :  { %v2405_v12 = vadd.f32 %v2404_v32, %v5135_v61 }
0x1b3c   :  { %2144 = vrot.lane.b32.xlu0 %v2142_v2, %s3845_s24  ;;  %v2403_v2 = vadd.f32 %v2402_v45, %v5129_v38 }
0x1b3e   :  { %v3701_v30 = vpop.eup %3700 }
0x1b3f   :  { %v2564_v35 = vmul.f32 %v3701_v30, %v3699_v28  ;;  %v3703_v41 = vpop.eup %3702  ;;  %v2563_v26 = vmul.f32 0.0, %v3701_v30 }
0x1b40   :  { %v2238_v43 = vadd.f32 1.0, %v3703_v41  ;;  %v3705_v6 = vpop.eup %3704 }
0x1b41   :  { %2566 = vrot.lane.b32.xlu1 %v2564_v35, %s3845_s24  ;;  %v2560_v47 = vadd.f32 1.0, %v3705_v6 }
0x1b42   :  { %3706 = vrcp.f32 %v2238_v43 }
0x1b4f   :  { %v3707_v46 = vpop.eup %3706 }
0x1ba2   :  { %v2245_v1 = vpop.permute.xlu0 %2244 }
0x1ba3   :  { %v5159_v5 = vadd.f32 %v2245_v1, %v2241_v21 }
0x1ba5   :  { %3708 = vtanh.f32 %v5159_v5 }
0x1ba6   :  { %v1705_v23 = vpop.permute.xlu0 %1704  ;;  %3710 = vrcp.f32 %v2560_v47 }
0x1ba7   :  { %1707 = vst.msk [vmem:[#allocation3 + $0x10] sm:$0xff] %vm80_vm0, %v1705_v23 }
0x1baa   :  { %v1925_v50 = vpop.permute.xlu0 %1924 }
0x1bab   :  { %1927 = vst.msk [vmem:[#allocation3 + $0x20] sm:$0xff] %vm80_vm0, %v1925_v50 }
0x1bae   :  { %v2145_v27 = vpop.permute.xlu0 %2144  ;;  %v2272_v17 = vld [vmem:[#allocation3 + $0x10] sm:$0xff] }
0x1baf   :  { %2147 = vst.msk [vmem:[#allocation3 + $0x30] sm:$0xff] %vm80_vm0, %v2145_v27  ;;  %3465 = vmatmul.mubr.msk.f32.gmra.mxu0 %vm80_vm0, %v2272_v17  ;;  %v1812_v27 = vsel %vm699_vm8, %v4830_v55, 0.0  ;;  %v2032_v17 = vsel %vm931_vm12, %v4899_v10, 0.0 }
0x1bb0   :  { %2412 = vmatprep.mubr.f32.mxu0 %v3843_v33 }
0x1bb2   :  { %v3709_v37 = vpop.eup %3708 }
0x1bb3   :  { %v2567_v62 = vpop.permute.xlu1 %2566  ;;  %v5167_v51 = vmul.f32 %v3709_v37, %v3707_v46  ;;  %v3711_v58 = vpop.eup %3710 }
0x1bb4   :  { %v2569_v22 = vadd.f32 %v2567_v62, %v2563_v26 }
0x1bb5   :  { %v2252_v46 = vsel %vm1163_vm1, %v5167_v51, 0.0 }
0x1bb6   :  { %3712 = vtanh.f32 %v2569_v22  ;;  %v5214_v55 = vsel %vm355_vm2, %v2569_v22, 0.0  ;;  %v2276_v32 = vld [vmem:[#allocation3 + $0x30] sm:$0xff] }
0x1bc3   :  { %v3713_v18 = vpop.eup %3712 }
0x1bc4   :  { %v2571_v56 = vmul.f32 %v3713_v18, %v3711_v58 }
0x1bc6   :  { %v5171_v49 = vsel %vm355_vm2, %v2571_v56, 0.0 }
0x1bc7   :  { %2575 = vrot.lane.b32.xlu1 %v5171_v49, %s3845_s24 }
0x1c39   :  { %v2576_v54 = vpop.permute.xlu1 %2575 }
0x1c3a   :  { %2578 = vst.msk [vmem:[%s5509_s11] sm:$0xff] %vm80_vm0, %v2576_v54  ;;  %3473 = vmatmul.mubr.msk.f32.vlgmr.msra.gmra.mxu1 %vm80_vm0, %v2576_v54 }
0x1c3b   :  { %2822 = vmatpush1.msra.mxu1 %v4982_v24  ;;  %2869 = vmatprep.mubr.f32.mxu1 %v3843_v33 }
0x1c3c   :  { %2823 = vmatprep.subr.mxu1 %v4987_v11 }
0x1c3d   :  { %2824 = vmatpush1.msra.mxu1 %v4993_v16 }
0x1c3e   :  { %2825 = vmatprep.subr.mxu1 %v4999_v14 }
0x1c3f   :  { %2826 = vmatpush1.msra.mxu1 %v5005_v20 }
0x1c40   :  { %2827 = vmatprep.subr.mxu1 %v5011_v39 }
0x1c41   :  { %2828 = vmatpush1.msra.mxu1 %v5017_v40 }
0x1c42   :  { %2829 = vmatprep.subr.mxu1 %v5023_v19 }
0x1c43   :  { %2830 = vmatpush1.msra.mxu1 %v5029_v8 }
0x1c44   :  { %2831 = vmatprep.subr.mxu1 %v5035_v29 }
0x1c45   :  { %2832 = vmatpush1.msra.mxu1 %v5043_v7 }
0x1c46   :  { %2833 = vmatprep.subr.mxu1 %v5049_v15 }
0x1c47   :  { %2834 = vmatpush1.msra.mxu1 %v5061_v44 }
0x1c48   :  { %2835 = vmatprep.subr.mxu1 %v5069_v63 }
0x1c49   :  { %2836 = vmatpush1.msra.mxu1 %v5075_v3 }
0x1c4a   :  { %3043 = vmatprep.subr.mxu1 %v4965_v31 }
0x1cfa   :  { %v2649_v28 = vpop.f32.mrf.mxu1 }
0x1cfb   :  { %v2654_v30 = vadd.f32 %v2649_v28, %v2403_v2  ;;  %v2274_v2 = vld [vmem:[#allocation3 + $0x20] sm:$0xff] }
0x1cfc   :  { %v2651_v41 = vpop.f32.mrf.mxu1 }
0x1cfd   :  { %v3474_v35 = vmul.f32 -1.442695, %v2654_v30  ;;  %v2655_v43 = vadd.f32 %v2651_v41, %v2405_v12  ;;  %v2408_v12 = vpop.f32.mrf.mxu0 }
0x1cff   :  { %3714 = vpow2.f32 %v3474_v35  ;;  %v3475_v47 = vmul.f32 -1.442695, %v2655_v43 }
0x1d00   :  { %3716 = vtanh.f32 %v2655_v43  ;;  %v2410_v43 = vpop.f32.mrf.mxu0 }
0x1d0c   :  { %v3715_v21 = vpop.eup %3714 }
0x1d0d   :  { %v2659_v1 = vadd.f32 1.0, %v3715_v21  ;;  %v3717_v23 = vpop.eup %3716 }
0x1d0f   :  { %3718 = vrcp.f32 %v2659_v1 }
0x1d10   :  { %3720 = vpow2.f32 %v3475_v47 }
0x1d1c   :  { %v3719_v50 = vpop.eup %3718 }
0x1d1d   :  { %v2670_v6 = vmul.f32 %v3719_v50, %v3717_v23  ;;  %v3721_v37 = vpop.eup %3720  ;;  %v2669_v62 = vmul.f32 %v3719_v50, %v5214_v55 }
0x1d1e   :  { %v2666_v26 = vadd.f32 1.0, %v3721_v37 }
0x1d1f   :  { %2672 = vrot.lane.b32.xlu1 %v2670_v6, %s3845_s24 }
0x1d20   :  { %3722 = vrcp.f32 %v2666_v26  ;;  %v2409_v26 = vadd.f32 %v2408_v12, %v5129_v38 }
0x1d23   :  { %1814 = vrot.lane.b32.xlu1 %v1812_v27, %s3845_s24 }
0x1d27   :  { %2034 = vrot.lane.b32.xlu1 %v2032_v17, %s3845_s24 }
0x1d2b   :  { %2254 = vrot.lane.b32.xlu1 %v2252_v46, %s3845_s24 }
0x1d2d   :  { %v3723_v4 = vpop.eup %3722 }
0x1d91   :  { %v2673_v58 = vpop.permute.xlu1 %2672 }
0x1d92   :  { %v5217_v10 = vadd.f32 %v2673_v58, %v2669_v62 }
0x1d94   :  { %3724 = vtanh.f32 %v5217_v10 }
0x1d95   :  { %v1815_v18 = vpop.permute.xlu1 %1814 }
0x1d96   :  { %1817 = vst.msk [vmem:[#allocation3 + $0x18] sm:$0xff] %vm80_vm0, %v1815_v18 }
0x1d99   :  { %v2035_v56 = vpop.permute.xlu1 %2034 }
0x1d9a   :  { %2037 = vst.msk [vmem:[#allocation3 + $0x28] sm:$0xff] %vm80_vm0, %v2035_v56 }
0x1d9d   :  { %v2255_v54 = vpop.permute.xlu1 %2254  ;;  %v2273_v45 = vld [vmem:[#allocation3 + $0x18] sm:$0xff] }
0x1d9e   :  { %2257 = vst.msk [vmem:[#allocation3 + $0x38] sm:$0xff] %vm80_vm0, %v2255_v54  ;;  %3466 = vmatmul.mubr.msk.f32.gmra.mxu0 %vm80_vm0, %v2273_v45  ;;  %v2411_v54 = vadd.f32 %v2410_v43, %v5135_v61 }
0x1d9f   :  { %2418 = vmatprep.mubr.f32.mxu0 %v3843_v33 }
0x1da1   :  { %v3725_v22 = vpop.eup %3724  ;;  %v2275_v35 = vld [vmem:[#allocation3 + $0x28] sm:$0xff] }
0x1da2   :  { %3467 = vmatmul.mubr.msk.f32.gmra.mxu0 %vm80_vm0, %v2274_v2  ;;  %v5226_v28 = vmul.f32 %v3725_v22, %v3723_v4 }
0x1da3   :  { %2424 = vmatprep.mubr.f32.mxu0 %v3843_v33 }
0x1da4   :  { %v5233_v30 = vsel %vm467_vm4, %v5226_v28, %v5171_v49 }
0x1da5   :  { %2690 = vrot.lane.b32.xlu0 %v5233_v30, %s3845_s24  ;;  %v2277_v41 = vld [vmem:[#allocation3 + $0x38] sm:$0xff] }
0x1da6   :  { %3468 = vmatmul.mubr.msk.f32.gmra.mxu0 %vm80_vm0, %v2275_v35 }
0x1da7   :  { %2430 = vmatprep.mubr.f32.mxu0 %v3843_v33 }
0x1daa   :  { %3469 = vmatmul.mubr.msk.f32.gmra.mxu0 %vm80_vm0, %v2276_v32 }
0x1dab   :  { %2436 = vmatprep.mubr.f32.mxu0 %v3843_v33 }
0x1dae   :  { %3470 = vmatmul.mubr.msk.f32.gmra.mxu0 %vm80_vm0, %v2277_v41 }
0x1daf   :  { %2758 = vmatprep.mubr.f32.mxu0 %v3843_v33 }
0x1e17   :  { %v2691_v49 = vpop.permute.xlu0 %2690 }
0x1e18   :  { %3477 = vmatmul.mubr.msk.f32.vlgmr.msra.gmra.mxu0 %vm80_vm0, %v2691_v49 }
0x1e19   :  { %2933 = vmatpush1.msra.mxu0 %v4982_v24  ;;  %2980 = vmatprep.mubr.f32.mxu0 %v3843_v33 }
0x1e1a   :  { %2934 = vmatprep.subr.mxu0 %v4987_v11 }
0x1e1b   :  { %2935 = vmatpush1.msra.mxu0 %v4993_v16 }
0x1e1c   :  { %2936 = vmatprep.subr.mxu0 %v4999_v14 }
0x1e1d   :  { %2937 = vmatpush1.msra.mxu0 %v5005_v20 }
0x1e1e   :  { %2938 = vmatprep.subr.mxu0 %v5011_v39 }
0x1e1f   :  { %2939 = vmatpush1.msra.mxu0 %v5017_v40 }
0x1e20   :  { %2940 = vmatprep.subr.mxu0 %v5023_v19 }
0x1e21   :  { %2941 = vmatpush1.msra.mxu0 %v5029_v8 }
0x1e22   :  { %2942 = vmatprep.subr.mxu0 %v5035_v29 }
0x1e23   :  { %2943 = vmatpush1.msra.mxu0 %v5043_v7 }
0x1e24   :  { %2944 = vmatprep.subr.mxu0 %v5049_v15 }
0x1e25   :  { %2945 = vmatpush1.msra.mxu0 %v5061_v44 }
0x1e26   :  { %2946 = vmatprep.subr.mxu0 %v5069_v63 }
0x1e27   :  { %2947 = vmatpush1.msra.mxu0 %v5075_v3 }
0x1e28   :  { %3154 = vmatprep.subr.mxu0 %v4965_v31 }
0x1e5e   :  { %v2414_v21 = vpop.f32.mrf.mxu0 }
0x1e60   :  { %v5261_v1 = vpop.f32.mrf.mxu0 }
0x1e62   :  { %v5263_v23 = vpop.f32.mrf.mxu0 }
0x1e64   :  { %v5265_v50 = vpop.f32.mrf.mxu0 }
0x1e66   :  { %v5267_v6 = vpop.f32.mrf.mxu0 }
0x1e68   :  { %v5269_v27 = vpop.f32.mrf.mxu0 }
0x1e6a   :  { %v5271_v17 = vpop.f32.mrf.mxu0 }
0x1e6c   :  { %v5273_v46 = vpop.f32.mrf.mxu0 }
0x1e6e   :  { %v5275_v47 = vpop.f32.mrf.mxu0 }
0x1e70   :  { %v5277_v37 = vpop.f32.mrf.mxu0 }
0x1ed8   :  { %v2760_v62 = vpop.f32.mrf.mxu0 }
0x1ed9   :  { %v2765_v58 = vadd.f32 %v2760_v62, %v2409_v26  ;;  %v2678_v26 = vsel %vm467_vm4, %v5217_v10, %v5214_v55  ;;  %v2415_v55 = vadd.f32 %v2414_v21, %v5129_v38 }
0x1eda   :  { %v2762_v56 = vpop.f32.mrf.mxu0 }
0x1edb   :  { %v3478_v18 = vmul.f32 -1.442695, %v2765_v58  ;;  %v2766_v45 = vadd.f32 %v2762_v56, %v2411_v54 }
0x1edd   :  { %3726 = vpow2.f32 %v3478_v18  ;;  %v3479_v41 = vmul.f32 -1.442695, %v2766_v45 }
0x1ede   :  { %3728 = vtanh.f32 %v2766_v45 }
0x1eea   :  { %v3727_v4 = vpop.eup %3726 }
0x1eeb   :  { %v2770_v22 = vadd.f32 1.0, %v3727_v4  ;;  %v3729_v2 = vpop.eup %3728 }
0x1eed   :  { %3730 = vrcp.f32 %v2770_v22 }
0x1eee   :  { %3732 = vpow2.f32 %v3479_v41 }
0x1efa   :  { %v3731_v35 = vpop.eup %3730 }
0x1efb   :  { %v2781_v32 = vmul.f32 %v3731_v35, %v3729_v2  ;;  %v3733_v49 = vpop.eup %3732  ;;  %v2780_v43 = vmul.f32 %v3731_v35, %v2678_v26  ;;  %v2417_v35 = vadd.f32 %v5261_v1, %v5135_v61 }
0x1efc   :  { %v2777_v12 = vadd.f32 1.0, %v3733_v49 }
0x1efd   :  { %2783 = vrot.lane.b32.xlu1 %v2781_v32, %s3845_s24 }
0x1efe   :  { %3734 = vrcp.f32 %v2777_v12 }
0x1f0b   :  { %v3735_v18 = vpop.eup %3734 }
0x1f6f   :  { %v2784_v62 = vpop.permute.xlu1 %2783 }
0x1f70   :  { %v2786_v58 = vadd.f32 %v2784_v62, %v2780_v43 }
0x1f72   :  { %3736 = vtanh.f32 %v2786_v58 }
0x1f7f   :  { %v3737_v56 = vpop.eup %3736 }
0x1f80   :  { %v5286_v54 = vmul.f32 %v3737_v56, %v3735_v18  ;;  %v2789_v56 = vsel %vm583_vm6, %v2786_v58, %v2678_v26  ;;  %v2421_v26 = vadd.f32 %v5263_v23, %v5129_v38 }
0x1f82   :  { %v2790_v45 = vsel %vm583_vm6, %v5286_v54, %v5233_v30 }
0x1f83   :  { %2801 = vrot.lane.b32.xlu0 %v2790_v45, %s3845_s24 }
0x1ff5   :  { %v2802_v4 = vpop.permute.xlu0 %2801 }
0x1ff6   :  { %3481 = vmatmul.mubr.msk.f32.vlgmr.msra.gmra.mxu1 %vm80_vm0, %v2802_v4 }
0x1ff7   :  { %3044 = vmatpush1.msra.mxu1 %v4982_v24  ;;  %3091 = vmatprep.mubr.f32.mxu1 %v3843_v33 }
0x1ff8   :  { %3045 = vmatprep.subr.mxu1 %v4987_v11 }
0x1ff9   :  { %3046 = vmatpush1.msra.mxu1 %v4993_v16 }
0x1ffa   :  { %3047 = vmatprep.subr.mxu1 %v4999_v14 }
0x1ffb   :  { %3048 = vmatpush1.msra.mxu1 %v5005_v20 }
0x1ffc   :  { %3049 = vmatprep.subr.mxu1 %v5011_v39 }
0x1ffd   :  { %3050 = vmatpush1.msra.mxu1 %v5017_v40 }
0x1ffe   :  { %3051 = vmatprep.subr.mxu1 %v5023_v19 }
0x1fff   :  { %3052 = vmatpush1.msra.mxu1 %v5029_v8 }
0x2000   :  { %3053 = vmatprep.subr.mxu1 %v5035_v29 }
0x2001   :  { %3054 = vmatpush1.msra.mxu1 %v5043_v7 }
0x2002   :  { %3055 = vmatprep.subr.mxu1 %v5049_v15 }
0x2003   :  { %3056 = vmatpush1.msra.mxu1 %v5061_v44 }
0x2004   :  { %3057 = vmatprep.subr.mxu1 %v5069_v63 }
0x2005   :  { %3058 = vmatpush1.msra.mxu1 %v5075_v3 }
0x2006   :  { %3265 = vmatprep.subr.mxu1 %v4965_v31 }
0x20b6   :  { %v2871_v10 = vpop.f32.mrf.mxu1 }
0x20b7   :  { %v2876_v30 = vadd.f32 %v2871_v10, %v2415_v55 }
0x20b8   :  { %v2873_v2 = vpop.f32.mrf.mxu1 }
0x20b9   :  { %v3482_v22 = vmul.f32 -1.442695, %v2876_v30  ;;  %v2877_v32 = vadd.f32 %v2873_v2, %v2417_v35 }
0x20bb   :  { %3738 = vpow2.f32 %v3482_v22  ;;  %v3483_v31 = vmul.f32 -1.442695, %v2877_v32 }
0x20bc   :  { %3740 = vtanh.f32 %v2877_v32 }
0x20c8   :  { %v3739_v41 = vpop.eup %3738 }
0x20c9   :  { %v2881_v49 = vadd.f32 1.0, %v3739_v41  ;;  %v3741_v12 = vpop.eup %3740 }
0x20cb   :  { %3742 = vrcp.f32 %v2881_v49  ;;  %v2423_v49 = vadd.f32 %v5265_v50, %v5135_v61 }
0x20cc   :  { %3744 = vpow2.f32 %v3483_v31 }
0x20d8   :  { %v3743_v43 = vpop.eup %3742 }
0x20d9   :  { %v2892_v62 = vmul.f32 %v3743_v43, %v3741_v12  ;;  %v3745_v21 = vpop.eup %3744  ;;  %v2891_v4 = vmul.f32 %v3743_v43, %v2789_v56 }
0x20da   :  { %v2888_v18 = vadd.f32 1.0, %v3745_v21 }
0x20db   :  { %2894 = vrot.lane.b32.xlu1 %v2892_v62, %s3845_s24 }
0x20dc   :  { %3746 = vrcp.f32 %v2888_v18 }
0x20e9   :  { %v3747_v10 = vpop.eup %3746 }
0x214d   :  { %v2895_v55 = vpop.permute.xlu1 %2894 }
0x214e   :  { %v2897_v1 = vadd.f32 %v2895_v55, %v2891_v4 }
0x2150   :  { %3748 = vtanh.f32 %v2897_v1 }
0x215d   :  { %v3749_v30 = vpop.eup %3748 }
0x215e   :  { %v5317_v22 = vmul.f32 %v3749_v30, %v3747_v10  ;;  %v2900_v10 = vsel %vm699_vm8, %v2897_v1, %v2789_v56 }
0x2160   :  { %v2901_v2 = vsel %vm699_vm8, %v5317_v22, %v2790_v45 }
0x2161   :  { %2912 = vrot.lane.b32.xlu0 %v2901_v2, %s3845_s24 }
0x21d3   :  { %v2913_v35 = vpop.permute.xlu0 %2912 }
0x21d4   :  { %3485 = vmatmul.mubr.msk.f32.vlgmr.msra.gmra.mxu0 %vm80_vm0, %v2913_v35 }
0x21d5   :  { %3155 = vmatpush1.msra.mxu0 %v4982_v24  ;;  %3202 = vmatprep.mubr.f32.mxu0 %v3843_v33 }
0x21d6   :  { %3156 = vmatprep.subr.mxu0 %v4987_v11 }
0x21d7   :  { %3157 = vmatpush1.msra.mxu0 %v4993_v16 }
0x21d8   :  { %3158 = vmatprep.subr.mxu0 %v4999_v14 }
0x21d9   :  { %3159 = vmatpush1.msra.mxu0 %v5005_v20 }
0x21da   :  { %3160 = vmatprep.subr.mxu0 %v5011_v39 }
0x21db   :  { %3161 = vmatpush1.msra.mxu0 %v5017_v40 }
0x21dc   :  { %3162 = vmatprep.subr.mxu0 %v5023_v19 }
0x21dd   :  { %3163 = vmatpush1.msra.mxu0 %v5029_v8 }
0x21de   :  { %3164 = vmatprep.subr.mxu0 %v5035_v29 }
0x21df   :  { %3165 = vmatpush1.msra.mxu0 %v5043_v7 }
0x21e0   :  { %3166 = vmatprep.subr.mxu0 %v5049_v15 }
0x21e1   :  { %3167 = vmatpush1.msra.mxu0 %v5061_v44 }
0x21e2   :  { %3168 = vmatprep.subr.mxu0 %v5069_v63 }
0x21e3   :  { %3169 = vmatpush1.msra.mxu0 %v5075_v3 }
0x2294   :  { %v2982_v58 = vpop.f32.mrf.mxu0 }
0x2295   :  { %v2987_v45 = vadd.f32 %v2982_v58, %v2421_v26 }
0x2296   :  { %v2984_v41 = vpop.f32.mrf.mxu0 }
0x2297   :  { %v3486_v32 = vmul.f32 -1.442695, %v2987_v45  ;;  %v2988_v12 = vadd.f32 %v2984_v41, %v2423_v49 }
0x2299   :  { %3750 = vpow2.f32 %v3486_v32  ;;  %v3487_v4 = vmul.f32 -1.442695, %v2988_v12 }
0x229a   :  { %3752 = vtanh.f32 %v2988_v12 }
0x22a6   :  { %v3751_v43 = vpop.eup %3750 }
0x22a7   :  { %v2992_v62 = vadd.f32 1.0, %v3751_v43  ;;  %v3753_v31 = vpop.eup %3752 }
0x22a9   :  { %3754 = vrcp.f32 %v2992_v62  ;;  %v2433_v62 = vadd.f32 %v5271_v17, %v5129_v38 }
0x22aa   :  { %3756 = vpow2.f32 %v3487_v4 }
0x22b6   :  { %v3755_v21 = vpop.eup %3754 }
0x22b7   :  { %v3003_v18 = vmul.f32 %v3755_v21, %v3753_v31  ;;  %v3757_v23 = vpop.eup %3756  ;;  %v3002_v30 = vmul.f32 %v3755_v21, %v2900_v10 }
0x22b8   :  { %v2999_v55 = vadd.f32 1.0, %v3757_v23  ;;  %v2435_v23 = vadd.f32 %v5273_v46, %v5135_v61 }
0x22b9   :  { %3005 = vrot.lane.b32.xlu1 %v3003_v18, %s3845_s24 }
0x22ba   :  { %3758 = vrcp.f32 %v2999_v55 }
0x22c7   :  { %v3759_v26 = vpop.eup %3758 }
0x232b   :  { %v3006_v35 = vpop.permute.xlu1 %3005 }
0x232c   :  { %v3008_v50 = vadd.f32 %v3006_v35, %v3002_v30 }
0x232e   :  { %3760 = vtanh.f32 %v3008_v50 }
0x233b   :  { %v3761_v58 = vpop.eup %3760 }
0x233c   :  { %v5347_v45 = vmul.f32 %v3761_v58, %v3759_v26 }
0x233e   :  { %v3012_v32 = vsel %vm815_vm10, %v5347_v45, %v2901_v2 }
0x233f   :  { %3023 = vrot.lane.b32.xlu0 %v3012_v32, %s3845_s24 }
0x23b1   :  { %v3024_v41 = vpop.permute.xlu0 %3023 }
0x23b2   :  { %3489 = vmatmul.mubr.msk.f32.vlgmr.msra.gmra.mxu1 %vm80_vm0, %v3024_v41 }
0x23b3   :  { %3266 = vmatpush1.msra.mxu1 %v4982_v24  ;;  %3313 = vmatprep.mubr.f32.mxu1 %v3843_v33  ;;  %v2427_v33 = vadd.f32 %v5267_v6, %v5129_v38 }
0x23b4   :  { %3267 = vmatprep.subr.mxu1 %v4987_v11 }
0x23b5   :  { %3268 = vmatpush1.msra.mxu1 %v4993_v16 }
0x23b6   :  { %3269 = vmatprep.subr.mxu1 %v4999_v14 }
0x23b7   :  { %3270 = vmatpush1.msra.mxu1 %v5005_v20  ;;  %v2429_v20 = vadd.f32 %v5269_v27, %v5135_v61 }
0x23b8   :  { %3271 = vmatprep.subr.mxu1 %v5011_v39 }
0x23b9   :  { %3272 = vmatpush1.msra.mxu1 %v5017_v40 }
0x23ba   :  { %3273 = vmatprep.subr.mxu1 %v5023_v19 }
0x23bb   :  { %3274 = vmatpush1.msra.mxu1 %v5029_v8 }
0x23bc   :  { %3275 = vmatprep.subr.mxu1 %v5035_v29 }
0x23bd   :  { %3276 = vmatpush1.msra.mxu1 %v5043_v7 }
0x23be   :  { %3277 = vmatprep.subr.mxu1 %v5049_v15 }
0x23bf   :  { %3278 = vmatpush1.msra.mxu1 %v5061_v44 }
0x23c0   :  { %3279 = vmatprep.subr.mxu1 %v5069_v63 }
0x23c1   :  { %3280 = vmatpush1.msra.mxu1 %v5075_v3  ;;  %v3011_v3 = vsel %vm815_vm10, %v3008_v50, %v2900_v10 }
0x2472   :  { %v3093_v24 = vpop.f32.mrf.mxu1 }
0x2473   :  { %v3098_v11 = vadd.f32 %v3093_v24, %v2427_v33 }
0x2474   :  { %v3095_v14 = vpop.f32.mrf.mxu1 }
0x2475   :  { %v3490_v16 = vmul.f32 -1.442695, %v3098_v11  ;;  %v3099_v39 = vadd.f32 %v3095_v14, %v2429_v20 }
0x2477   :  { %3762 = vpow2.f32 %v3490_v16  ;;  %v3491_v15 = vmul.f32 -1.442695, %v3099_v39 }
0x2478   :  { %3764 = vtanh.f32 %v3099_v39  ;;  %v1165_v39 = vsel %vm1163_vm1, %v4718_v34, %v4553_v42 }
0x2484   :  { %v3763_v40 = vpop.eup %3762 }
0x2485   :  { %v3103_v19 = vadd.f32 1.0, %v3763_v40  ;;  %v3765_v8 = vpop.eup %3764  ;;  %v2251_v40 = vsel %vm1163_vm1, %v5167_v51, %v5056_v36 }
0x2487   :  { %3766 = vrcp.f32 %v3103_v19  ;;  %v2680_v19 = vsel %vm467_vm4, %v5226_v28, 0.0  ;;  %v2439_v28 = vadd.f32 %v5275_v47, %v5129_v38  ;;  %v1164_v47 = vsel %vm1163_vm1, %v4705_v13, %v4701_v9 }
0x2488   :  { %3768 = vpow2.f32 %v3491_v15 }
0x2494   :  { %v3767_v29 = vpop.eup %3766 }
0x2495   :  { %v3114_v7 = vmul.f32 %v3767_v29, %v3765_v8  ;;  %v3769_v44 = vpop.eup %3768  ;;  %v3113_v6 = vmul.f32 %v3767_v29, %v3011_v3  ;;  %v2902_v8 = vsel %vm699_vm8, %v5317_v22, 0.0 }
0x2496   :  { %v3110_v63 = vadd.f32 1.0, %v3769_v44  ;;  %v2441_v44 = vadd.f32 %v5277_v37, %v5135_v61  ;;  %v2250_v61 = vsel %vm1163_vm1, %v5159_v5, %v5156_v25  ;;  %v2791_v37 = vsel %vm583_vm6, %v5286_v54, 0.0 }
0x2497   :  { %3116 = vrot.lane.b32.xlu1 %v3114_v7, %s3845_s24 }
0x2498   :  { %3770 = vrcp.f32 %v3110_v63 }
0x24a5   :  { %v3771_v1 = vpop.eup %3770 }
0x2509   :  { %v3117_v56 = vpop.permute.xlu1 %3116 }
0x250a   :  { %v3119_v27 = vadd.f32 %v3117_v56, %v3113_v6 }
0x250c   :  { %3772 = vtanh.f32 %v3119_v27  ;;  %v3122_v41 = vsel %vm931_vm12, %v3119_v27, %v3011_v3 }
0x2519   :  { %v3773_v2 = vpop.eup %3772 }
0x251a   :  { %v3121_v49 = vmul.f32 %v3773_v2, %v3771_v1 }
0x251c   :  { %v3123_v12 = vsel %vm931_vm12, %v3121_v49, %v3012_v32  ;;  %v3124_v42 = vsel %vm931_vm12, %v3121_v49, 0.0  ;;  %v3013_v49 = vsel %vm815_vm10, %v5347_v45, 0.0 }
0x251d   :  { %3134 = vrot.lane.b32.xlu0 %v3123_v12, %s3845_s24 }
0x258f   :  { %v3135_v43 = vpop.permute.xlu0 %3134 }
0x2590   :  { %3493 = vmatmul.mubr.msk.f32.vlgmr.msra.gmra.mxu0 %vm80_vm0, %v3135_v43 }
0x2650   :  { %v3204_v31 = vpop.f32.mrf.mxu0 }
0x2651   :  { %v3209_v21 = vadd.f32 %v3204_v31, %v2433_v62 }
0x2652   :  { %v3206_v4 = vpop.f32.mrf.mxu0 }
0x2653   :  { %v3494_v18 = vmul.f32 -1.442695, %v3209_v21  ;;  %v3210_v55 = vadd.f32 %v3206_v4, %v2435_v23 }
0x2655   :  { %3774 = vpow2.f32 %v3494_v18  ;;  %v3495_v58 = vmul.f32 -1.442695, %v3210_v55 }
0x2656   :  { %3776 = vtanh.f32 %v3210_v55 }
0x2662   :  { %v3775_v10 = vpop.eup %3774 }
0x2663   :  { %v3214_v30 = vadd.f32 1.0, %v3775_v10  ;;  %v3777_v35 = vpop.eup %3776 }
0x2665   :  { %3778 = vrcp.f32 %v3214_v30 }
0x2666   :  { %3780 = vpow2.f32 %v3495_v58 }
0x2672   :  { %v3779_v50 = vpop.eup %3778 }
0x2673   :  { %v3225_v26 = vmul.f32 %v3779_v50, %v3777_v35  ;;  %v3781_v17 = vpop.eup %3780  ;;  %v3224_v33 = vmul.f32 %v3779_v50, %v3122_v41 }
0x2674   :  { %v3221_v32 = vadd.f32 1.0, %v3781_v17 }
0x2675   :  { %3227 = vrot.lane.b32.xlu1 %v3225_v26, %s3845_s24 }
0x2676   :  { %3782 = vrcp.f32 %v3221_v32 }
0x2683   :  { %v3783_v11 = vpop.eup %3782 }
0x26e7   :  { %v3228_v24 = vpop.permute.xlu1 %3227 }
0x26e8   :  { %v3230_v46 = vadd.f32 %v3228_v24, %v3224_v33 }
0x26ea   :  { %3784 = vtanh.f32 %v3230_v46  ;;  %v3233_v1 = vsel %vm1047_vm14, %v3230_v46, %v3122_v41 }
0x26f7   :  { %v3785_v16 = vpop.eup %3784 }
0x26f8   :  { %v5388_v14 = vmul.f32 %v3785_v16, %v3783_v11 }
0x26fa   :  { %v5393_v20 = vsel %vm1047_vm14, %v5388_v14, %v3123_v12  ;;  %v3235_v48 = vsel %vm1047_vm14, %v5388_v14, 0.0 }
0x26fb   :  { %3245 = vrot.lane.b32.xlu0 %v5393_v20, %s3845_s24 }
0x26ff   :  { %1173 = vrot.lane.b32.xlu0 %v1165_v39, %s3845_s24 }
0x2703   :  { %2259 = vrot.lane.b32.xlu0 %v2251_v40, %s3845_s24 }
0x2707   :  { %2682 = vrot.lane.b32.xlu0 %v2680_v19, %s3845_s24 }
0x270b   :  { %2904 = vrot.lane.b32.xlu0 %v2902_v8, %s3845_s24 }
0x270f   :  { %3126 = vrot.lane.b32.xlu0 %v3124_v42, %s3845_s24 }
0x276d   :  { %v3246_v34 = vpop.permute.xlu0 %3245 }
0x276e   :  { %3497 = vmatmul.mubr.msk.f32.vlgmr.msra.gmra.mxu1 %vm80_vm0, %v3246_v34 }
0x2771   :  { %v1174_v36 = vpop.permute.xlu0 %1173 }
0x2772   :  { %1176 = vst.msk [vmem:[#allocation4] sm:$0xff] %vm80_vm0, %v1174_v36 }
0x2775   :  { %v2260_v59 = vpop.permute.xlu0 %2259 }
0x2776   :  { %2263 = vst.msk [vmem:[#allocation4 + $0x8] sm:$0xff] %vm80_vm0, %v2260_v59 }
0x2779   :  { %v2683_v51 = vpop.permute.xlu0 %2682 }
0x277a   :  { %3476 = vst.msk [vmem:[%s5509_s11 + $0x8] sm:$0xff] %vm80_vm0, %v2683_v51 }
0x277d   :  { %v2905_v52 = vpop.permute.xlu0 %2904 }
0x277e   :  { %3484 = vst.msk [vmem:[%s5509_s11 + $0x18] sm:$0xff] %vm80_vm0, %v2905_v52 }
0x2781   :  { %v3127_v57 = vpop.permute.xlu0 %3126 }
0x2782   :  { %3492 = vst.msk [vmem:[%s5509_s11 + $0x28] sm:$0xff] %vm80_vm0, %v3127_v57 }
0x282e   :  { %v3315_v22 = vpop.f32.mrf.mxu1 }
0x282f   :  { %v3320_v29 = vadd.f32 %v3315_v22, %v2439_v28 }
0x2830   :  { %v3317_v15 = vpop.f32.mrf.mxu1 }
0x2831   :  { %v3498_v7 = vmul.f32 -1.442695, %v3320_v29  ;;  %v3321_v63 = vadd.f32 %v3317_v15, %v2441_v44 }
0x2833   :  { %3786 = vpow2.f32 %v3498_v7  ;;  %v3499_v9 = vmul.f32 -1.442695, %v3321_v63 }
0x2834   :  { %3788 = vtanh.f32 %v3321_v63 }
0x2840   :  { %v3787_v3 = vpop.eup %3786 }
0x2841   :  { %v3325_v6 = vadd.f32 1.0, %v3787_v3  ;;  %v3789_v56 = vpop.eup %3788 }
0x2843   :  { %3790 = vrcp.f32 %v3325_v6 }
0x2844   :  { %3792 = vpow2.f32 %v3499_v9 }
0x2850   :  { %v3791_v27 = vpop.eup %3790 }
0x2851   :  { %v3336_v2 = vmul.f32 %v3791_v27, %v3789_v56  ;;  %v3335_v38 = vmul.f32 %v3791_v27, %v3233_v1  ;;  %v3793_v13 = vpop.eup %3792 }
0x2852   :  { %v3332_v12 = vadd.f32 1.0, %v3793_v13 }
0x2853   :  { %3338 = vrot.lane.b32.xlu1 %v3336_v2, %s3845_s24 }
0x2854   :  { %3794 = vrcp.f32 %v3332_v12 }
0x2857   :  { %1178 = vrot.lane.b32.xlu1 %v1164_v47, %s3845_s24 }
0x285b   :  { %2265 = vrot.lane.b32.xlu1 %v2250_v61, %s3845_s24 }
0x285f   :  { %2793 = vrot.lane.b32.xlu1 %v2791_v37, %s3845_s24 }
0x2861   :  { %v3795_v62 = vpop.eup %3794 }
0x2863   :  { %3015 = vrot.lane.b32.xlu1 %v3013_v49, %s3845_s24 }
0x28c5   :  { %v3339_v43 = vpop.permute.xlu1 %3338 }
0x28c6   :  { %v3341_v25 = vadd.f32 %v3339_v43, %v3335_v38 }
0x28c8   :  { %3796 = vtanh.f32 %v3341_v25  ;;  %v3344_v60 = vsel %vm1163_vm1, %v3341_v25, %v3233_v1 }
0x28c9   :  { %v1179_v5 = vpop.permute.xlu1 %1178  ;;  %3360 = vrot.lane.b32.xlu1 %v3344_v60, %s3845_s24 }
0x28ca   :  { %1181 = vst.msk [vmem:[#allocation6] sm:$0xff] %vm80_vm0, %v1179_v5 }
0x28cd   :  { %v2266_v54 = vpop.permute.xlu1 %2265  ;;  %3237 = vrot.lane.b32.xlu1 %v3235_v48, %s3845_s24 }
0x28ce   :  { %2269 = vst.msk [vmem:[#allocation6 + $0x8] sm:$0xff] %vm80_vm0, %v2266_v54 }
0x28d1   :  { %v2794_v45 = vpop.permute.xlu1 %2793 }
0x28d2   :  { %3480 = vst.msk [vmem:[%s5509_s11 + $0x10] sm:$0xff] %vm80_vm0, %v2794_v45 }
0x28d5   :  { %v3797_v31 = vpop.eup %3796  ;;  %v3016_v21 = vpop.permute.xlu1 %3015 }
0x28d6   :  { %3488 = vst.msk [vmem:[%s5509_s11 + $0x20] sm:$0xff] %vm80_vm0, %v3016_v21  ;;  %v3343_v53 = vmul.f32 %v3797_v31, %v3795_v62 }
0x28d8   :  { %v3345_v18 = vsel %vm1163_vm1, %v3343_v53, %v5393_v20  ;;  %v3346_v4 = vsel %vm1163_vm1, %v3343_v53, 0.0 }
0x28d9   :  { %3354 = vrot.lane.b32.xlu0 %v3345_v18, %s3845_s24 }
0x28dd   :  { %3348 = vrot.lane.b32.xlu0 %v3346_v4, %s3845_s24 }
0x293b   :  { %v3361_v23 = vpop.permute.xlu1 %3360 }
0x293c   :  { %3364 = vst.msk [vmem:[#allocation6 + $0x10] sm:$0xff] %vm80_vm0, %v3361_v23 }
0x293d   :  { %3810 = shalt.err (!%p3807_p4)
}
0x293e   :  { %s3847_s27 = smov 128   ;;  %s3848_s28 = smov 8  }
0x293f   :  { %3390 = dma.vmem_to_hbm [thread:$0]  %s3385_s25, 384, %s5511_s13, [#allocation7], %s3847_s27, %s3847_s27, %s3848_s28   ;;  %v3238_v0 = vpop.permute.xlu1 %3237 }
0x2940   :  { %3496 = vst.msk [vmem:[%s5509_s11 + $0x30] sm:$0xff] %vm80_vm0, %v3238_v0  ;;  %s3849_s5 = smov [#allocation4]  }
0x2941   :  { %s3372_s14 = sshll.u32 %s3849_s5, 4  ;;  %s3373_s14 = int_to_ptr.vmem [resolvable:$true] %s3372_s14 }
0x2942   :  { %s3819_s15 = scalar_lea.vmem %s3373_s14, 384  ;;  %p3824_p6 = scmp.lt.s32.totalorder %s3373_s14, %s3373_s14 }
0x2943   :  { %p3820_p5 = scmp.ne.s32.totalorder %s3373_s14, %s3819_s15  ;;  %p3825_p7 = scmp.lt.s32.totalorder %s3819_s15, %s3819_s15 }
0x2945   :  { %p3826_p8 = por %p3825_p7, %p3824_p6 }
0x2947   :  { %p3827_p9 = pnand %p3826_p8, %p3820_p5 }
0x294b   :  { %v3355_v55 = vpop.permute.xlu0 %3354 }
0x294c   :  { %3358 = vst.msk [vmem:[#allocation4 + $0x10] sm:$0xff] %vm80_vm0, %v3355_v55 }
0x294d   :  { %3830 = shalt.err (!%p3827_p9)
}
0x294e   :  { %3378 = dma.vmem_to_hbm [thread:$0]  %s3373_s14, 384, %s5510_s12, [#allocation5], %s3847_s27, %s3847_s27, %s3848_s28  }
0x294f   :  { %v3349_v10 = vpop.permute.xlu0 %3348 }
0x2950   :  { %3500 = vst.msk [vmem:[%s5509_s11 + $0x38] sm:$0xff] %vm80_vm0, %v3349_v10 }
0x2951   :  { %3839 = dma.done.wait [#allocation5], 384  }
0x2952   :  { %3840 = vsyncadd [#allocation5], 4294966912 }
0x2953   :  { %3841 = dma.done.wait [#allocation7], 384  }
0x2954   :  { %3842 = vsyncadd [#allocation7], 4294966912 }
0x2955   :  { %3399 = vsyncpa [#allocation5], 1 }
0x2956   :  { %3400 = vsyncpa [#allocation7], 1 }

</bundles_post_ra>
